<compile_context>
chip_gen: v7x
topology: tpu7x:2x2x1
jax: 0.10.0
libtpu: 0.0.40
codegen_flags: <defaults>
</compile_context>

<pallas_src>
import jax
import jax.numpy as jnp
from jax.experimental import pallas as pl
from jax.experimental.pallas import tpu as pltpu


def _round_up(x, m):
    return ((x + m - 1) // m) * m


def rnn_kernel(tokens_ref, table_ref, w_hh_ref, w_fc_ref, b_fc_ref, out_ref):
    """Operands:
         tokens_ref : (B, T)   int32 in SMEM (scalar-indexed per step)
         table_ref  : (V, Hp)  f32 VMEM, pre-projected embedding table
                                rows = emb[v] @ W_ih^T + (b_ih + b_hh), zero-padded
         w_hh_ref   : (Hp, Hp) f32 VMEM, recurrent weights (zero-padded)
         w_fc_ref   : (Hp, Vp) f32 VMEM, final linear weights (zero-padded)
         b_fc_ref   : (1,  Vp) f32 VMEM
         out_ref    : (B,  Vp) f32 VMEM, logits for the last timestep
    """
    B, T = tokens_ref.shape
    Hp = w_hh_ref.shape[0]

    w_hh = w_hh_ref[...]  # hoist once; reused across all T steps
    # TODO(synk): if a bundle dump shows Mosaic re-pushing W_hh into the MXU on
    # every unrolled step, switch to pltpu.matmul_push_rhs/matmul_acc_lhs/
    # matmul_pop to keep the 128x128 weights resident across the recurrence.

    h = jnp.zeros((B, Hp), jnp.float32)
    for t in range(T):  # T is small & static; use lax.fori_loop once T >~ 16
        # Fused gather: B dynamic row slices of the pre-projected table.
        # Each row already equals x_t[b] @ W_ih^T + b_ih + b_hh.
        x_t = jnp.concatenate(
            [table_ref[pl.ds(tokens_ref[b, t], 1), :] for b in range(B)],
            axis=0)  # (B, Hp)
        h = jnp.tanh(
            x_t + jnp.dot(h, w_hh,
                          preferred_element_type=jnp.float32,
                          precision=jax.lax.Precision.HIGHEST))

    # fc(output[:, -1, :]) == fc(h_T); lane-dense (B, Vp) store.
    out_ref[...] = (
        jnp.dot(h, w_fc_ref[...],
                preferred_element_type=jnp.float32,
                precision=jax.lax.Precision.HIGHEST)
        + b_fc_ref[...])


def pack_params(emb_table, w_ih, w_hh, b_ih, b_hh, w_fc, b_fc):
    """Fold W_ih + RNN bias into the embedding table; transpose & zero-pad
    torch-layout weights to lane-dense shapes.

    Padding invariant (required for correctness): all padded rows/columns of
    emb_proj, w_hh_p, w_fc_p and all padded bias lanes are EXACTLY ZERO, and the
    activation satisfies f(0) == 0 (tanh).  Then padded hidden lanes stay zero
    through the recurrence and never contaminate the real outputs.
    """
    f32 = jnp.float32
    V, E = emb_table.shape
    H = w_hh.shape[0]
    assert w_ih.shape == (H, E) and w_fc.shape == (V, H)
    Hp = _round_up(H, 128)
    Vp = _round_up(V, 128)

    with jax.default_matmul_precision("highest"):
        proj = emb_table.astype(f32) @ jnp.transpose(w_ih).astype(f32)  # (V, H)
    proj = proj + (b_ih + b_hh).astype(f32)[None, :]

    emb_proj = jnp.zeros((V, Hp), f32).at[:, :H].set(proj)
    w_hh_p = jnp.zeros((Hp, Hp), f32).at[:H, :H].set(jnp.transpose(w_hh).astype(f32))
    w_fc_p = jnp.zeros((Hp, Vp), f32).at[:H, :V].set(jnp.transpose(w_fc).astype(f32))
    b_fc_p = jnp.zeros((1, Vp), f32).at[0, :V].set(b_fc.astype(f32))
    return {
        "emb_proj": emb_proj,
        "w_hh_p": w_hh_p,
        "w_fc_p": w_fc_p,
        "b_fc_p": b_fc_p,
        "vocab_size": V,
    }


def rnn_model_forward(tokens, params):
    """Equivalent of RNNModel.forward. tokens: (B, T) int (or (B, 1, T))."""
    if tokens.ndim == 3:
        # mirrors `if x.dim() == 4: x = x.squeeze(1)` after the embedding
        tokens = tokens[:, 0, :]
    tokens = tokens.astype(jnp.int32)
    B, T = tokens.shape

    V = params["vocab_size"]
    Hp = params["w_hh_p"].shape[0]
    Vp = params["w_fc_p"].shape[1]

    flops = 2 * T * B * Hp * Hp + 2 * B * Hp * Vp
    bytes_accessed = 4 * (B * T + V * Hp + Hp * Hp + Hp * Vp + Vp + B * Vp)

    smem = pl.BlockSpec(memory_space=pltpu.MemorySpace.SMEM)
    vmem = pl.BlockSpec(memory_space=pltpu.MemorySpace.VMEM)

    out_p = pl.pallas_call(
        rnn_kernel,
        out_shape=jax.ShapeDtypeStruct((B, Vp), jnp.float32),
        in_specs=[smem, vmem, vmem, vmem, vmem],
        out_specs=vmem,
        cost_estimate=pl.CostEstimate(
            flops=flops, transcendentals=T * B * Hp,
            bytes_accessed=bytes_accessed),
    )(
        tokens,
        params["emb_proj"],
        params["w_hh_p"],
        params["w_fc_p"],
        params["b_fc_p"],
    )
    # Drop padded vocab lanes (no-op when V is already a multiple of 128).
    return out_p[:, :V]


if __name__ == "__main__":
    # Small, TPU-friendly shapes consistent with the module's forward.
    V, E, H = 128, 50, 64          # vocab_size, embedding_dim, hidden_size
    B, T = 8, 8                    # batch, sequence length

    key = jax.random.PRNGKey(0)
    ks = jax.random.split(key, 8)
    scale = 0.1
    emb_table = jax.random.normal(ks[0], (V, E), jnp.float32) * scale
    w_ih = jax.random.normal(ks[1], (H, E), jnp.float32) * scale   # torch weight_ih_l0
    w_hh = jax.random.normal(ks[2], (H, H), jnp.float32) * scale   # torch weight_hh_l0
    b_ih = jax.random.normal(ks[3], (H,), jnp.float32) * scale
    b_hh = jax.random.normal(ks[4], (H,), jnp.float32) * scale
    w_fc = jax.random.normal(ks[5], (V, H), jnp.float32) * scale   # torch fc.weight
    b_fc = jax.random.normal(ks[6], (V,), jnp.float32) * scale
    tokens = jax.random.randint(ks[7], (B, T), 0, V, jnp.int32)

    params = pack_params(emb_table, w_ih, w_hh, b_ih, b_hh, w_fc, b_fc)
    out = jax.block_until_ready(rnn_model_forward(tokens, params))

    # Pure-JAX reference of the PyTorch semantics (precision pinned to match
    # the in-kernel Precision.HIGHEST matmuls).
    with jax.default_matmul_precision("highest"):
        x = emb_table[tokens]                        # (B, T, E)
        h = jnp.zeros((B, H), jnp.float32)
        for t in range(T):
            h = jnp.tanh(x[:, t, :] @ w_ih.T + b_ih + h @ w_hh.T + b_hh)
        ref = h @ w_fc.T + b_fc

    assert out.shape == (B, V)
    assert jnp.allclose(out, ref, atol=1e-5, rtol=1e-5), "mismatch vs reference"
    print("KERNEL_OK")
</pallas_src>

<mosaic_0001>
module attributes {stable_mosaic.version = 11 : i64} {
  func.func @rnn_kernel(%arg0: memref<8x8xi32, #tpu.memory_space<smem>>, %arg1: memref<128x128xf32, #tpu.memory_space<vmem>>, %arg2: memref<128x128xf32, #tpu.memory_space<vmem>>, %arg3: memref<128x128xf32, #tpu.memory_space<vmem>>, %arg4: memref<1x128xf32, #tpu.memory_space<vmem>>, %arg5: memref<8x128xf32, #tpu.memory_space<vmem>>) attributes {dimension_semantics = [], scalar_prefetch = 0 : i64, scratch_operands = 0 : i64, tpu.core_type = #tpu.core_type<tc>} {
    %c0 = arith.constant 0 : index
    %c0_0 = arith.constant 0 : index
    %0 = vector.load %arg2[%c0, %c0_0] : memref<128x128xf32, #tpu.memory_space<vmem>>, vector<128x128xf32>
    %cst = arith.constant 0.000000e+00 : f32
    %1 = vector.broadcast %cst : f32 to vector<8x128xf32>
    %c0_1 = arith.constant 0 : index
    %c0_2 = arith.constant 0 : index
    %2 = memref.load %arg0[%c0_1, %c0_2] : memref<8x8xi32, #tpu.memory_space<smem>>
    %3 = arith.index_cast %2 : i32 to index
    %c0_3 = arith.constant 0 : index
    %4 = vector.load %arg1[%3, %c0_3] : memref<128x128xf32, #tpu.memory_space<vmem>>, vector<1x128xf32>
    %c1 = arith.constant 1 : index
    %c0_4 = arith.constant 0 : index
    %5 = memref.load %arg0[%c1, %c0_4] : memref<8x8xi32, #tpu.memory_space<smem>>
    %6 = arith.index_cast %5 : i32 to index
    %c0_5 = arith.constant 0 : index
    %7 = vector.load %arg1[%6, %c0_5] : memref<128x128xf32, #tpu.memory_space<vmem>>, vector<1x128xf32>
    %c2 = arith.constant 2 : index
    %c0_6 = arith.constant 0 : index
    %8 = memref.load %arg0[%c2, %c0_6] : memref<8x8xi32, #tpu.memory_space<smem>>
    %9 = arith.index_cast %8 : i32 to index
    %c0_7 = arith.constant 0 : index
    %10 = vector.load %arg1[%9, %c0_7] : memref<128x128xf32, #tpu.memory_space<vmem>>, vector<1x128xf32>
    %c3 = arith.constant 3 : index
    %c0_8 = arith.constant 0 : index
    %11 = memref.load %arg0[%c3, %c0_8] : memref<8x8xi32, #tpu.memory_space<smem>>
    %12 = arith.index_cast %11 : i32 to index
    %c0_9 = arith.constant 0 : index
    %13 = vector.load %arg1[%12, %c0_9] : memref<128x128xf32, #tpu.memory_space<vmem>>, vector<1x128xf32>
    %c4 = arith.constant 4 : index
    %c0_10 = arith.constant 0 : index
    %14 = memref.load %arg0[%c4, %c0_10] : memref<8x8xi32, #tpu.memory_space<smem>>
    %15 = arith.index_cast %14 : i32 to index
    %c0_11 = arith.constant 0 : index
    %16 = vector.load %arg1[%15, %c0_11] : memref<128x128xf32, #tpu.memory_space<vmem>>, vector<1x128xf32>
    %c5 = arith.constant 5 : index
    %c0_12 = arith.constant 0 : index
    %17 = memref.load %arg0[%c5, %c0_12] : memref<8x8xi32, #tpu.memory_space<smem>>
    %18 = arith.index_cast %17 : i32 to index
    %c0_13 = arith.constant 0 : index
    %19 = vector.load %arg1[%18, %c0_13] : memref<128x128xf32, #tpu.memory_space<vmem>>, vector<1x128xf32>
    %c6 = arith.constant 6 : index
    %c0_14 = arith.constant 0 : index
    %20 = memref.load %arg0[%c6, %c0_14] : memref<8x8xi32, #tpu.memory_space<smem>>
    %21 = arith.index_cast %20 : i32 to index
    %c0_15 = arith.constant 0 : index
    %22 = vector.load %arg1[%21, %c0_15] : memref<128x128xf32, #tpu.memory_space<vmem>>, vector<1x128xf32>
    %c7 = arith.constant 7 : index
    %c0_16 = arith.constant 0 : index
    %23 = memref.load %arg0[%c7, %c0_16] : memref<8x8xi32, #tpu.memory_space<smem>>
    %24 = arith.index_cast %23 : i32 to index
    %c0_17 = arith.constant 0 : index
    %25 = vector.load %arg1[%24, %c0_17] : memref<128x128xf32, #tpu.memory_space<vmem>>, vector<1x128xf32>
    %26 = tpu.concatenate %4, %7, %10, %13, %16, %19, %22, %25 in 0 : vector<1x128xf32>, vector<1x128xf32>, vector<1x128xf32>, vector<1x128xf32>, vector<1x128xf32>, vector<1x128xf32>, vector<1x128xf32>, vector<1x128xf32> -> vector<8x128xf32>
    %cst_18 = arith.constant dense<0.000000e+00> : vector<8x128xf32>
    %27 = tpu.matmul %1, %0, %cst_18 {dimension_numbers = #tpu.dot_dimension_numbers<[1], [0], [0], [1], [0, 0, 1, 1], [], []>, precision = #tpu.contract_precision<fp32>} : vector<8x128xf32>, vector<128x128xf32>, vector<8x128xf32> -> vector<8x128xf32>
    %28 = arith.addf %26, %27 : vector<8x128xf32>
    %29 = math.tanh %28 : vector<8x128xf32>
    %c0_19 = arith.constant 0 : index
    %c1_20 = arith.constant 1 : index
    %30 = memref.load %arg0[%c0_19, %c1_20] : memref<8x8xi32, #tpu.memory_space<smem>>
    %31 = arith.index_cast %30 : i32 to index
    %c0_21 = arith.constant 0 : index
    %32 = vector.load %arg1[%31, %c0_21] : memref<128x128xf32, #tpu.memory_space<vmem>>, vector<1x128xf32>
    %c1_22 = arith.constant 1 : index
    %c1_23 = arith.constant 1 : index
    %33 = memref.load %arg0[%c1_22, %c1_23] : memref<8x8xi32, #tpu.memory_space<smem>>
    %34 = arith.index_cast %33 : i32 to index
    %c0_24 = arith.constant 0 : index
    %35 = vector.load %arg1[%34, %c0_24] : memref<128x128xf32, #tpu.memory_space<vmem>>, vector<1x128xf32>
    %c2_25 = arith.constant 2 : index
    %c1_26 = arith.constant 1 : index
    %36 = memref.load %arg0[%c2_25, %c1_26] : memref<8x8xi32, #tpu.memory_space<smem>>
    %37 = arith.index_cast %36 : i32 to index
    %c0_27 = arith.constant 0 : index
    %38 = vector.load %arg1[%37, %c0_27] : memref<128x128xf32, #tpu.memory_space<vmem>>, vector<1x128xf32>
    %c3_28 = arith.constant 3 : index
    %c1_29 = arith.constant 1 : index
    %39 = memref.load %arg0[%c3_28, %c1_29] : memref<8x8xi32, #tpu.memory_space<smem>>
    %40 = arith.index_cast %39 : i32 to index
    %c0_30 = arith.constant 0 : index
    %41 = vector.load %arg1[%40, %c0_30] : memref<128x128xf32, #tpu.memory_space<vmem>>, vector<1x128xf32>
    %c4_31 = arith.constant 4 : index
    %c1_32 = arith.constant 1 : index
    %42 = memref.load %arg0[%c4_31, %c1_32] : memref<8x8xi32, #tpu.memory_space<smem>>
    %43 = arith.index_cast %42 : i32 to index
    %c0_33 = arith.constant 0 : index
    %44 = vector.load %arg1[%43, %c0_33] : memref<128x128xf32, #tpu.memory_space<vmem>>, vector<1x128xf32>
    %c5_34 = arith.constant 5 : index
    %c1_35 = arith.constant 1 : index
    %45 = memref.load %arg0[%c5_34, %c1_35] : memref<8x8xi32, #tpu.memory_space<smem>>
    %46 = arith.index_cast %45 : i32 to index
    %c0_36 = arith.constant 0 : index
    %47 = vector.load %arg1[%46, %c0_36] : memref<128x128xf32, #tpu.memory_space<vmem>>, vector<1x128xf32>
    %c6_37 = arith.constant 6 : index
    %c1_38 = arith.constant 1 : index
    %48 = memref.load %arg0[%c6_37, %c1_38] : memref<8x8xi32, #tpu.memory_space<smem>>
    %49 = arith.index_cast %48 : i32 to index
    %c0_39 = arith.constant 0 : index
    %50 = vector.load %arg1[%49, %c0_39] : memref<128x128xf32, #tpu.memory_space<vmem>>, vector<1x128xf32>
    %c7_40 = arith.constant 7 : index
    %c1_41 = arith.constant 1 : index
    %51 = memref.load %arg0[%c7_40, %c1_41] : memref<8x8xi32, #tpu.memory_space<smem>>
    %52 = arith.index_cast %51 : i32 to index
    %c0_42 = arith.constant 0 : index
    %53 = vector.load %arg1[%52, %c0_42] : memref<128x128xf32, #tpu.memory_space<vmem>>, vector<1x128xf32>
    %54 = tpu.concatenate %32, %35, %38, %41, %44, %47, %50, %53 in 0 : vector<1x128xf32>, vector<1x128xf32>, vector<1x128xf32>, vector<1x128xf32>, vector<1x128xf32>, vector<1x128xf32>, vector<1x128xf32>, vector<1x128xf32> -> vector<8x128xf32>
    %cst_43 = arith.constant dense<0.000000e+00> : vector<8x128xf32>
    %55 = tpu.matmul %29, %0, %cst_43 {dimension_numbers = #tpu.dot_dimension_numbers<[1], [0], [0], [1], [0, 0, 1, 1], [], []>, precision = #tpu.contract_precision<fp32>} : vector<8x128xf32>, vector<128x128xf32>, vector<8x128xf32> -> vector<8x128xf32>
    %56 = arith.addf %54, %55 : vector<8x128xf32>
    %57 = math.tanh %56 : vector<8x128xf32>
    %c0_44 = arith.constant 0 : index
    %c2_45 = arith.constant 2 : index
    %58 = memref.load %arg0[%c0_44, %c2_45] : memref<8x8xi32, #tpu.memory_space<smem>>
    %59 = arith.index_cast %58 : i32 to index
    %c0_46 = arith.constant 0 : index
    %60 = vector.load %arg1[%59, %c0_46] : memref<128x128xf32, #tpu.memory_space<vmem>>, vector<1x128xf32>
    %c1_47 = arith.constant 1 : index
    %c2_48 = arith.constant 2 : index
    %61 = memref.load %arg0[%c1_47, %c2_48] : memref<8x8xi32, #tpu.memory_space<smem>>
    %62 = arith.index_cast %61 : i32 to index
    %c0_49 = arith.constant 0 : index
    %63 = vector.load %arg1[%62, %c0_49] : memref<128x128xf32, #tpu.memory_space<vmem>>, vector<1x128xf32>
    %c2_50 = arith.constant 2 : index
    %c2_51 = arith.constant 2 : index
    %64 = memref.load %arg0[%c2_50, %c2_51] : memref<8x8xi32, #tpu.memory_space<smem>>
    %65 = arith.index_cast %64 : i32 to index
    %c0_52 = arith.constant 0 : index
    %66 = vector.load %arg1[%65, %c0_52] : memref<128x128xf32, #tpu.memory_space<vmem>>, vector<1x128xf32>
    %c3_53 = arith.constant 3 : index
    %c2_54 = arith.constant 2 : index
    %67 = memref.load %arg0[%c3_53, %c2_54] : memref<8x8xi32, #tpu.memory_space<smem>>
    %68 = arith.index_cast %67 : i32 to index
    %c0_55 = arith.constant 0 : index
    %69 = vector.load %arg1[%68, %c0_55] : memref<128x128xf32, #tpu.memory_space<vmem>>, vector<1x128xf32>
    %c4_56 = arith.constant 4 : index
    %c2_57 = arith.constant 2 : index
    %70 = memref.load %arg0[%c4_56, %c2_57] : memref<8x8xi32, #tpu.memory_space<smem>>
    %71 = arith.index_cast %70 : i32 to index
    %c0_58 = arith.constant 0 : index
    %72 = vector.load %arg1[%71, %c0_58] : memref<128x128xf32, #tpu.memory_space<vmem>>, vector<1x128xf32>
    %c5_59 = arith.constant 5 : index
    %c2_60 = arith.constant 2 : index
    %73 = memref.load %arg0[%c5_59, %c2_60] : memref<8x8xi32, #tpu.memory_space<smem>>
    %74 = arith.index_cast %73 : i32 to index
    %c0_61 = arith.constant 0 : index
    %75 = vector.load %arg1[%74, %c0_61] : memref<128x128xf32, #tpu.memory_space<vmem>>, vector<1x128xf32>
    %c6_62 = arith.constant 6 : index
    %c2_63 = arith.constant 2 : index
    %76 = memref.load %arg0[%c6_62, %c2_63] : memref<8x8xi32, #tpu.memory_space<smem>>
    %77 = arith.index_cast %76 : i32 to index
    %c0_64 = arith.constant 0 : index
    %78 = vector.load %arg1[%77, %c0_64] : memref<128x128xf32, #tpu.memory_space<vmem>>, vector<1x128xf32>
    %c7_65 = arith.constant 7 : index
    %c2_66 = arith.constant 2 : index
    %79 = memref.load %arg0[%c7_65, %c2_66] : memref<8x8xi32, #tpu.memory_space<smem>>
    %80 = arith.index_cast %79 : i32 to index
    %c0_67 = arith.constant 0 : index
    %81 = vector.load %arg1[%80, %c0_67] : memref<128x128xf32, #tpu.memory_space<vmem>>, vector<1x128xf32>
    %82 = tpu.concatenate %60, %63, %66, %69, %72, %75, %78, %81 in 0 : vector<1x128xf32>, vector<1x128xf32>, vector<1x128xf32>, vector<1x128xf32>, vector<1x128xf32>, vector<1x128xf32>, vector<1x128xf32>, vector<1x128xf32> -> vector<8x128xf32>
    %cst_68 = arith.constant dense<0.000000e+00> : vector<8x128xf32>
    %83 = tpu.matmul %57, %0, %cst_68 {dimension_numbers = #tpu.dot_dimension_numbers<[1], [0], [0], [1], [0, 0, 1, 1], [], []>, precision = #tpu.contract_precision<fp32>} : vector<8x128xf32>, vector<128x128xf32>, vector<8x128xf32> -> vector<8x128xf32>
    %84 = arith.addf %82, %83 : vector<8x128xf32>
    %85 = math.tanh %84 : vector<8x128xf32>
    %c0_69 = arith.constant 0 : index
    %c3_70 = arith.constant 3 : index
    %86 = memref.load %arg0[%c0_69, %c3_70] : memref<8x8xi32, #tpu.memory_space<smem>>
    %87 = arith.index_cast %86 : i32 to index
    %c0_71 = arith.constant 0 : index
    %88 = vector.load %arg1[%87, %c0_71] : memref<128x128xf32, #tpu.memory_space<vmem>>, vector<1x128xf32>
    %c1_72 = arith.constant 1 : index
    %c3_73 = arith.constant 3 : index
    %89 = memref.load %arg0[%c1_72, %c3_73] : memref<8x8xi32, #tpu.memory_space<smem>>
    %90 = arith.index_cast %89 : i32 to index
    %c0_74 = arith.constant 0 : index
    %91 = vector.load %arg1[%90, %c0_74] : memref<128x128xf32, #tpu.memory_space<vmem>>, vector<1x128xf32>
    %c2_75 = arith.constant 2 : index
    %c3_76 = arith.constant 3 : index
    %92 = memref.load %arg0[%c2_75, %c3_76] : memref<8x8xi32, #tpu.memory_space<smem>>
    %93 = arith.index_cast %92 : i32 to index
    %c0_77 = arith.constant 0 : index
    %94 = vector.load %arg1[%93, %c0_77] : memref<128x128xf32, #tpu.memory_space<vmem>>, vector<1x128xf32>
    %c3_78 = arith.constant 3 : index
    %c3_79 = arith.constant 3 : index
    %95 = memref.load %arg0[%c3_78, %c3_79] : memref<8x8xi32, #tpu.memory_space<smem>>
    %96 = arith.index_cast %95 : i32 to index
    %c0_80 = arith.constant 0 : index
    %97 = vector.load %arg1[%96, %c0_80] : memref<128x128xf32, #tpu.memory_space<vmem>>, vector<1x128xf32>
    %c4_81 = arith.constant 4 : index
    %c3_82 = arith.constant 3 : index
    %98 = memref.load %arg0[%c4_81, %c3_82] : memref<8x8xi32, #tpu.memory_space<smem>>
    %99 = arith.index_cast %98 : i32 to index
    %c0_83 = arith.constant 0 : index
    %100 = vector.load %arg1[%99, %c0_83] : memref<128x128xf32, #tpu.memory_space<vmem>>, vector<1x128xf32>
    %c5_84 = arith.constant 5 : index
    %c3_85 = arith.constant 3 : index
    %101 = memref.load %arg0[%c5_84, %c3_85] : memref<8x8xi32, #tpu.memory_space<smem>>
    %102 = arith.index_cast %101 : i32 to index
    %c0_86 = arith.constant 0 : index
    %103 = vector.load %arg1[%102, %c0_86] : memref<128x128xf32, #tpu.memory_space<vmem>>, vector<1x128xf32>
    %c6_87 = arith.constant 6 : index
    %c3_88 = arith.constant 3 : index
    %104 = memref.load %arg0[%c6_87, %c3_88] : memref<8x8xi32, #tpu.memory_space<smem>>
    %105 = arith.index_cast %104 : i32 to index
    %c0_89 = arith.constant 0 : index
    %106 = vector.load %arg1[%105, %c0_89] : memref<128x128xf32, #tpu.memory_space<vmem>>, vector<1x128xf32>
    %c7_90 = arith.constant 7 : index
    %c3_91 = arith.constant 3 : index
    %107 = memref.load %arg0[%c7_90, %c3_91] : memref<8x8xi32, #tpu.memory_space<smem>>
    %108 = arith.index_cast %107 : i32 to index
    %c0_92 = arith.constant 0 : index
    %109 = vector.load %arg1[%108, %c0_92] : memref<128x128xf32, #tpu.memory_space<vmem>>, vector<1x128xf32>
    %110 = tpu.concatenate %88, %91, %94, %97, %100, %103, %106, %109 in 0 : vector<1x128xf32>, vector<1x128xf32>, vector<1x128xf32>, vector<1x128xf32>, vector<1x128xf32>, vector<1x128xf32>, vector<1x128xf32>, vector<1x128xf32> -> vector<8x128xf32>
    %cst_93 = arith.constant dense<0.000000e+00> : vector<8x128xf32>
    %111 = tpu.matmul %85, %0, %cst_93 {dimension_numbers = #tpu.dot_dimension_numbers<[1], [0], [0], [1], [0, 0, 1, 1], [], []>, precision = #tpu.contract_precision<fp32>} : vector<8x128xf32>, vector<128x128xf32>, vector<8x128xf32> -> vector<8x128xf32>
    %112 = arith.addf %110, %111 : vector<8x128xf32>
    %113 = math.tanh %112 : vector<8x128xf32>
    %c0_94 = arith.constant 0 : index
    %c4_95 = arith.constant 4 : index
    %114 = memref.load %arg0[%c0_94, %c4_95] : memref<8x8xi32, #tpu.memory_space<smem>>
    %115 = arith.index_cast %114 : i32 to index
    %c0_96 = arith.constant 0 : index
    %116 = vector.load %arg1[%115, %c0_96] : memref<128x128xf32, #tpu.memory_space<vmem>>, vector<1x128xf32>
    %c1_97 = arith.constant 1 : index
    %c4_98 = arith.constant 4 : index
    %117 = memref.load %arg0[%c1_97, %c4_98] : memref<8x8xi32, #tpu.memory_space<smem>>
    %118 = arith.index_cast %117 : i32 to index
    %c0_99 = arith.constant 0 : index
    %119 = vector.load %arg1[%118, %c0_99] : memref<128x128xf32, #tpu.memory_space<vmem>>, vector<1x128xf32>
    %c2_100 = arith.constant 2 : index
    %c4_101 = arith.constant 4 : index
    %120 = memref.load %arg0[%c2_100, %c4_101] : memref<8x8xi32, #tpu.memory_space<smem>>
    %121 = arith.index_cast %120 : i32 to index
    %c0_102 = arith.constant 0 : index
    %122 = vector.load %arg1[%121, %c0_102] : memref<128x128xf32, #tpu.memory_space<vmem>>, vector<1x128xf32>
    %c3_103 = arith.constant 3 : index
    %c4_104 = arith.constant 4 : index
    %123 = memref.load %arg0[%c3_103, %c4_104] : memref<8x8xi32, #tpu.memory_space<smem>>
    %124 = arith.index_cast %123 : i32 to index
    %c0_105 = arith.constant 0 : index
    %125 = vector.load %arg1[%124, %c0_105] : memref<128x128xf32, #tpu.memory_space<vmem>>, vector<1x128xf32>
    %c4_106 = arith.constant 4 : index
    %c4_107 = arith.constant 4 : index
    %126 = memref.load %arg0[%c4_106, %c4_107] : memref<8x8xi32, #tpu.memory_space<smem>>
    %127 = arith.index_cast %126 : i32 to index
    %c0_108 = arith.constant 0 : index
    %128 = vector.load %arg1[%127, %c0_108] : memref<128x128xf32, #tpu.memory_space<vmem>>, vector<1x128xf32>
    %c5_109 = arith.constant 5 : index
    %c4_110 = arith.constant 4 : index
    %129 = memref.load %arg0[%c5_109, %c4_110] : memref<8x8xi32, #tpu.memory_space<smem>>
    %130 = arith.index_cast %129 : i32 to index
    %c0_111 = arith.constant 0 : index
    %131 = vector.load %arg1[%130, %c0_111] : memref<128x128xf32, #tpu.memory_space<vmem>>, vector<1x128xf32>
    %c6_112 = arith.constant 6 : index
    %c4_113 = arith.constant 4 : index
    %132 = memref.load %arg0[%c6_112, %c4_113] : memref<8x8xi32, #tpu.memory_space<smem>>
    %133 = arith.index_cast %132 : i32 to index
    %c0_114 = arith.constant 0 : index
    %134 = vector.load %arg1[%133, %c0_114] : memref<128x128xf32, #tpu.memory_space<vmem>>, vector<1x128xf32>
    %c7_115 = arith.constant 7 : index
    %c4_116 = arith.constant 4 : index
    %135 = memref.load %arg0[%c7_115, %c4_116] : memref<8x8xi32, #tpu.memory_space<smem>>
    %136 = arith.index_cast %135 : i32 to index
    %c0_117 = arith.constant 0 : index
    %137 = vector.load %arg1[%136, %c0_117] : memref<128x128xf32, #tpu.memory_space<vmem>>, vector<1x128xf32>
    %138 = tpu.concatenate %116, %119, %122, %125, %128, %131, %134, %137 in 0 : vector<1x128xf32>, vector<1x128xf32>, vector<1x128xf32>, vector<1x128xf32>, vector<1x128xf32>, vector<1x128xf32>, vector<1x128xf32>, vector<1x128xf32> -> vector<8x128xf32>
    %cst_118 = arith.constant dense<0.000000e+00> : vector<8x128xf32>
    %139 = tpu.matmul %113, %0, %cst_118 {dimension_numbers = #tpu.dot_dimension_numbers<[1], [0], [0], [1], [0, 0, 1, 1], [], []>, precision = #tpu.contract_precision<fp32>} : vector<8x128xf32>, vector<128x128xf32>, vector<8x128xf32> -> vector<8x128xf32>
    %140 = arith.addf %138, %139 : vector<8x128xf32>
    %141 = math.tanh %140 : vector<8x128xf32>
    %c0_119 = arith.constant 0 : index
    %c5_120 = arith.constant 5 : index
    %142 = memref.load %arg0[%c0_119, %c5_120] : memref<8x8xi32, #tpu.memory_space<smem>>
    %143 = arith.index_cast %142 : i32 to index
    %c0_121 = arith.constant 0 : index
    %144 = vector.load %arg1[%143, %c0_121] : memref<128x128xf32, #tpu.memory_space<vmem>>, vector<1x128xf32>
    %c1_122 = arith.constant 1 : index
    %c5_123 = arith.constant 5 : index
    %145 = memref.load %arg0[%c1_122, %c5_123] : memref<8x8xi32, #tpu.memory_space<smem>>
    %146 = arith.index_cast %145 : i32 to index
    %c0_124 = arith.constant 0 : index
    %147 = vector.load %arg1[%146, %c0_124] : memref<128x128xf32, #tpu.memory_space<vmem>>, vector<1x128xf32>
    %c2_125 = arith.constant 2 : index
    %c5_126 = arith.constant 5 : index
    %148 = memref.load %arg0[%c2_125, %c5_126] : memref<8x8xi32, #tpu.memory_space<smem>>
    %149 = arith.index_cast %148 : i32 to index
    %c0_127 = arith.constant 0 : index
    %150 = vector.load %arg1[%149, %c0_127] : memref<128x128xf32, #tpu.memory_space<vmem>>, vector<1x128xf32>
    %c3_128 = arith.constant 3 : index
    %c5_129 = arith.constant 5 : index
    %151 = memref.load %arg0[%c3_128, %c5_129] : memref<8x8xi32, #tpu.memory_space<smem>>
    %152 = arith.index_cast %151 : i32 to index
    %c0_130 = arith.constant 0 : index
    %153 = vector.load %arg1[%152, %c0_130] : memref<128x128xf32, #tpu.memory_space<vmem>>, vector<1x128xf32>
    %c4_131 = arith.constant 4 : index
    %c5_132 = arith.constant 5 : index
    %154 = memref.load %arg0[%c4_131, %c5_132] : memref<8x8xi32, #tpu.memory_space<smem>>
    %155 = arith.index_cast %154 : i32 to index
    %c0_133 = arith.constant 0 : index
    %156 = vector.load %arg1[%155, %c0_133] : memref<128x128xf32, #tpu.memory_space<vmem>>, vector<1x128xf32>
    %c5_134 = arith.constant 5 : index
    %c5_135 = arith.constant 5 : index
    %157 = memref.load %arg0[%c5_134, %c5_135] : memref<8x8xi32, #tpu.memory_space<smem>>
    %158 = arith.index_cast %157 : i32 to index
    %c0_136 = arith.constant 0 : index
    %159 = vector.load %arg1[%158, %c0_136] : memref<128x128xf32, #tpu.memory_space<vmem>>, vector<1x128xf32>
    %c6_137 = arith.constant 6 : index
    %c5_138 = arith.constant 5 : index
    %160 = memref.load %arg0[%c6_137, %c5_138] : memref<8x8xi32, #tpu.memory_space<smem>>
    %161 = arith.index_cast %160 : i32 to index
    %c0_139 = arith.constant 0 : index
    %162 = vector.load %arg1[%161, %c0_139] : memref<128x128xf32, #tpu.memory_space<vmem>>, vector<1x128xf32>
    %c7_140 = arith.constant 7 : index
    %c5_141 = arith.constant 5 : index
    %163 = memref.load %arg0[%c7_140, %c5_141] : memref<8x8xi32, #tpu.memory_space<smem>>
    %164 = arith.index_cast %163 : i32 to index
    %c0_142 = arith.constant 0 : index
    %165 = vector.load %arg1[%164, %c0_142] : memref<128x128xf32, #tpu.memory_space<vmem>>, vector<1x128xf32>
    %166 = tpu.concatenate %144, %147, %150, %153, %156, %159, %162, %165 in 0 : vector<1x128xf32>, vector<1x128xf32>, vector<1x128xf32>, vector<1x128xf32>, vector<1x128xf32>, vector<1x128xf32>, vector<1x128xf32>, vector<1x128xf32> -> vector<8x128xf32>
    %cst_143 = arith.constant dense<0.000000e+00> : vector<8x128xf32>
    %167 = tpu.matmul %141, %0, %cst_143 {dimension_numbers = #tpu.dot_dimension_numbers<[1], [0], [0], [1], [0, 0, 1, 1], [], []>, precision = #tpu.contract_precision<fp32>} : vector<8x128xf32>, vector<128x128xf32>, vector<8x128xf32> -> vector<8x128xf32>
    %168 = arith.addf %166, %167 : vector<8x128xf32>
    %169 = math.tanh %168 : vector<8x128xf32>
    %c0_144 = arith.constant 0 : index
    %c6_145 = arith.constant 6 : index
    %170 = memref.load %arg0[%c0_144, %c6_145] : memref<8x8xi32, #tpu.memory_space<smem>>
    %171 = arith.index_cast %170 : i32 to index
    %c0_146 = arith.constant 0 : index
    %172 = vector.load %arg1[%171, %c0_146] : memref<128x128xf32, #tpu.memory_space<vmem>>, vector<1x128xf32>
    %c1_147 = arith.constant 1 : index
    %c6_148 = arith.constant 6 : index
    %173 = memref.load %arg0[%c1_147, %c6_148] : memref<8x8xi32, #tpu.memory_space<smem>>
    %174 = arith.index_cast %173 : i32 to index
    %c0_149 = arith.constant 0 : index
    %175 = vector.load %arg1[%174, %c0_149] : memref<128x128xf32, #tpu.memory_space<vmem>>, vector<1x128xf32>
    %c2_150 = arith.constant 2 : index
    %c6_151 = arith.constant 6 : index
    %176 = memref.load %arg0[%c2_150, %c6_151] : memref<8x8xi32, #tpu.memory_space<smem>>
    %177 = arith.index_cast %176 : i32 to index
    %c0_152 = arith.constant 0 : index
    %178 = vector.load %arg1[%177, %c0_152] : memref<128x128xf32, #tpu.memory_space<vmem>>, vector<1x128xf32>
    %c3_153 = arith.constant 3 : index
    %c6_154 = arith.constant 6 : index
    %179 = memref.load %arg0[%c3_153, %c6_154] : memref<8x8xi32, #tpu.memory_space<smem>>
    %180 = arith.index_cast %179 : i32 to index
    %c0_155 = arith.constant 0 : index
    %181 = vector.load %arg1[%180, %c0_155] : memref<128x128xf32, #tpu.memory_space<vmem>>, vector<1x128xf32>
    %c4_156 = arith.constant 4 : index
    %c6_157 = arith.constant 6 : index
    %182 = memref.load %arg0[%c4_156, %c6_157] : memref<8x8xi32, #tpu.memory_space<smem>>
    %183 = arith.index_cast %182 : i32 to index
    %c0_158 = arith.constant 0 : index
    %184 = vector.load %arg1[%183, %c0_158] : memref<128x128xf32, #tpu.memory_space<vmem>>, vector<1x128xf32>
    %c5_159 = arith.constant 5 : index
    %c6_160 = arith.constant 6 : index
    %185 = memref.load %arg0[%c5_159, %c6_160] : memref<8x8xi32, #tpu.memory_space<smem>>
    %186 = arith.index_cast %185 : i32 to index
    %c0_161 = arith.constant 0 : index
    %187 = vector.load %arg1[%186, %c0_161] : memref<128x128xf32, #tpu.memory_space<vmem>>, vector<1x128xf32>
    %c6_162 = arith.constant 6 : index
    %c6_163 = arith.constant 6 : index
    %188 = memref.load %arg0[%c6_162, %c6_163] : memref<8x8xi32, #tpu.memory_space<smem>>
    %189 = arith.index_cast %188 : i32 to index
    %c0_164 = arith.constant 0 : index
    %190 = vector.load %arg1[%189, %c0_164] : memref<128x128xf32, #tpu.memory_space<vmem>>, vector<1x128xf32>
    %c7_165 = arith.constant 7 : index
    %c6_166 = arith.constant 6 : index
    %191 = memref.load %arg0[%c7_165, %c6_166] : memref<8x8xi32, #tpu.memory_space<smem>>
    %192 = arith.index_cast %191 : i32 to index
    %c0_167 = arith.constant 0 : index
    %193 = vector.load %arg1[%192, %c0_167] : memref<128x128xf32, #tpu.memory_space<vmem>>, vector<1x128xf32>
    %194 = tpu.concatenate %172, %175, %178, %181, %184, %187, %190, %193 in 0 : vector<1x128xf32>, vector<1x128xf32>, vector<1x128xf32>, vector<1x128xf32>, vector<1x128xf32>, vector<1x128xf32>, vector<1x128xf32>, vector<1x128xf32> -> vector<8x128xf32>
    %cst_168 = arith.constant dense<0.000000e+00> : vector<8x128xf32>
    %195 = tpu.matmul %169, %0, %cst_168 {dimension_numbers = #tpu.dot_dimension_numbers<[1], [0], [0], [1], [0, 0, 1, 1], [], []>, precision = #tpu.contract_precision<fp32>} : vector<8x128xf32>, vector<128x128xf32>, vector<8x128xf32> -> vector<8x128xf32>
    %196 = arith.addf %194, %195 : vector<8x128xf32>
    %197 = math.tanh %196 : vector<8x128xf32>
    %c0_169 = arith.constant 0 : index
    %c7_170 = arith.constant 7 : index
    %198 = memref.load %arg0[%c0_169, %c7_170] : memref<8x8xi32, #tpu.memory_space<smem>>
    %199 = arith.index_cast %198 : i32 to index
    %c0_171 = arith.constant 0 : index
    %200 = vector.load %arg1[%199, %c0_171] : memref<128x128xf32, #tpu.memory_space<vmem>>, vector<1x128xf32>
    %c1_172 = arith.constant 1 : index
    %c7_173 = arith.constant 7 : index
    %201 = memref.load %arg0[%c1_172, %c7_173] : memref<8x8xi32, #tpu.memory_space<smem>>
    %202 = arith.index_cast %201 : i32 to index
    %c0_174 = arith.constant 0 : index
    %203 = vector.load %arg1[%202, %c0_174] : memref<128x128xf32, #tpu.memory_space<vmem>>, vector<1x128xf32>
    %c2_175 = arith.constant 2 : index
    %c7_176 = arith.constant 7 : index
    %204 = memref.load %arg0[%c2_175, %c7_176] : memref<8x8xi32, #tpu.memory_space<smem>>
    %205 = arith.index_cast %204 : i32 to index
    %c0_177 = arith.constant 0 : index
    %206 = vector.load %arg1[%205, %c0_177] : memref<128x128xf32, #tpu.memory_space<vmem>>, vector<1x128xf32>
    %c3_178 = arith.constant 3 : index
    %c7_179 = arith.constant 7 : index
    %207 = memref.load %arg0[%c3_178, %c7_179] : memref<8x8xi32, #tpu.memory_space<smem>>
    %208 = arith.index_cast %207 : i32 to index
    %c0_180 = arith.constant 0 : index
    %209 = vector.load %arg1[%208, %c0_180] : memref<128x128xf32, #tpu.memory_space<vmem>>, vector<1x128xf32>
    %c4_181 = arith.constant 4 : index
    %c7_182 = arith.constant 7 : index
    %210 = memref.load %arg0[%c4_181, %c7_182] : memref<8x8xi32, #tpu.memory_space<smem>>
    %211 = arith.index_cast %210 : i32 to index
    %c0_183 = arith.constant 0 : index
    %212 = vector.load %arg1[%211, %c0_183] : memref<128x128xf32, #tpu.memory_space<vmem>>, vector<1x128xf32>
    %c5_184 = arith.constant 5 : index
    %c7_185 = arith.constant 7 : index
    %213 = memref.load %arg0[%c5_184, %c7_185] : memref<8x8xi32, #tpu.memory_space<smem>>
    %214 = arith.index_cast %213 : i32 to index
    %c0_186 = arith.constant 0 : index
    %215 = vector.load %arg1[%214, %c0_186] : memref<128x128xf32, #tpu.memory_space<vmem>>, vector<1x128xf32>
    %c6_187 = arith.constant 6 : index
    %c7_188 = arith.constant 7 : index
    %216 = memref.load %arg0[%c6_187, %c7_188] : memref<8x8xi32, #tpu.memory_space<smem>>
    %217 = arith.index_cast %216 : i32 to index
    %c0_189 = arith.constant 0 : index
    %218 = vector.load %arg1[%217, %c0_189] : memref<128x128xf32, #tpu.memory_space<vmem>>, vector<1x128xf32>
    %c7_190 = arith.constant 7 : index
    %c7_191 = arith.constant 7 : index
    %219 = memref.load %arg0[%c7_190, %c7_191] : memref<8x8xi32, #tpu.memory_space<smem>>
    %220 = arith.index_cast %219 : i32 to index
    %c0_192 = arith.constant 0 : index
    %221 = vector.load %arg1[%220, %c0_192] : memref<128x128xf32, #tpu.memory_space<vmem>>, vector<1x128xf32>
    %222 = tpu.concatenate %200, %203, %206, %209, %212, %215, %218, %221 in 0 : vector<1x128xf32>, vector<1x128xf32>, vector<1x128xf32>, vector<1x128xf32>, vector<1x128xf32>, vector<1x128xf32>, vector<1x128xf32>, vector<1x128xf32> -> vector<8x128xf32>
    %cst_193 = arith.constant dense<0.000000e+00> : vector<8x128xf32>
    %223 = tpu.matmul %197, %0, %cst_193 {dimension_numbers = #tpu.dot_dimension_numbers<[1], [0], [0], [1], [0, 0, 1, 1], [], []>, precision = #tpu.contract_precision<fp32>} : vector<8x128xf32>, vector<128x128xf32>, vector<8x128xf32> -> vector<8x128xf32>
    %224 = arith.addf %222, %223 : vector<8x128xf32>
    %225 = math.tanh %224 : vector<8x128xf32>
    %c0_194 = arith.constant 0 : index
    %c0_195 = arith.constant 0 : index
    %226 = vector.load %arg3[%c0_194, %c0_195] : memref<128x128xf32, #tpu.memory_space<vmem>>, vector<128x128xf32>
    %cst_196 = arith.constant dense<0.000000e+00> : vector<8x128xf32>
    %227 = tpu.matmul %225, %226, %cst_196 {dimension_numbers = #tpu.dot_dimension_numbers<[1], [0], [0], [1], [0, 0, 1, 1], [], []>, precision = #tpu.contract_precision<fp32>} : vector<8x128xf32>, vector<128x128xf32>, vector<8x128xf32> -> vector<8x128xf32>
    %c0_197 = arith.constant 0 : index
    %c0_198 = arith.constant 0 : index
    %228 = vector.load %arg4[%c0_197, %c0_198] : memref<1x128xf32, #tpu.memory_space<vmem>>, vector<1x128xf32>
    %229 = vector.broadcast %228 : vector<1x128xf32> to vector<8x128xf32>
    %230 = arith.addf %227, %229 : vector<8x128xf32>
    %c0_199 = arith.constant 0 : index
    %c0_200 = arith.constant 0 : index
    %231 = vector.load %arg5[%c0_199, %c0_200] : memref<8x128xf32, #tpu.memory_space<vmem>>, vector<8x128xf32>
    tpu.vector_store %arg5[%c0_199, %c0_200], %230 {strides = array<i32>} : memref<8x128xf32, #tpu.memory_space<vmem>>, vector<8x128xf32>,
    return
  }
}

</mosaic_0001>

<bundles_post_ra>
// kernel: tpu_custom_call.1
= control target key start
LH: loop header
LB: loop body
LE: loop exit
PB: predicated region body
PF: predicated region fallthrough
CT: control target
= control target key end

     0   :  { %10 = vsyncpa [#allocation5], 0  ;;  %s12222_s0 = inlined_call_operand.hbm [shape: s32[8,8], index: 0, kind: input, shape index: {}]   ;;  %s12223_s1 = inlined_call_operand.hbm [shape: f32[128,128], index: 1, kind: input, shape index: {}]   ;;  %s12224_s2 = inlined_call_operand.hbm [shape: f32[128,128], index: 2, kind: input, shape index: {}]   ;;  %s12225_s3 = inlined_call_operand.hbm [shape: f32[128,128], index: 3, kind: input, shape index: {}]   ;;  %s12226_s4 = inlined_call_operand.vmem [shape: f32[1,128], index: 4, kind: input, shape index: {}]   ;;  %s12227_s5 = inlined_call_operand.hbm [shape: f32[8,128], index: 5, kind: output, shape index: {}]  }
   0x1   :  { %11 = vsyncpa [#allocation3], 0 }
   0x2   :  { %12 = vsyncpa [#allocation8], 0 }
   0x3   :  { %13 = vsyncpa [#allocation4], 0  ;;  %s10700_s18 = smov [#allocation7]   ;;  %s10701_s20 = smov [#allocation6]  }
   0x4   :  { %s39_s19 = sshll.u32 %s10700_s18, 4  ;;  %s27_s21 = sshll.u32 %s10701_s20, 4  ;;  %s40_s19 = int_to_ptr.vmem [resolvable:$true] %s39_s19  ;;  %s28_s21 = int_to_ptr.vmem [resolvable:$true] %s27_s21 }
   0x5   :  { %s10594_s24 = scalar_lea.hbm %s12224_s2, 2048 }
   0x6   :  { %p10595_p0 = scmp.ne.s32.totalorder %s12224_s2, %s10594_s24  ;;  %p10598_p1 = scmp.lt.u32.totalorder %s10594_s24, %s12224_s2 }
   0x8   :  { %p10600_p2 = pnand %p10598_p1, %p10595_p0 }
   0xa   :  { %10603 = shalt.err (!%p10600_p2)
}
   0xb   :  { %s10604_s29 = scalar_lea.vmem %s40_s19, 2048  ;;  %p10609_p4 = scmp.lt.s32.totalorder %s40_s19, %s40_s19 }
   0xc   :  { %p10605_p3 = scmp.ne.s32.totalorder %s40_s19, %s10604_s29  ;;  %p10610_p5 = scmp.lt.s32.totalorder %s10604_s29, %s10604_s29 }
   0xe   :  { %p10611_p6 = por %p10610_p5, %p10609_p4 }
  0x10   :  { %p10612_p7 = pnand %p10611_p6, %p10605_p3 }
  0x12   :  { %10615 = shalt.err (!%p10612_p7)
}
  0x13   :  { %s10702_s30 = smov 128   ;;  %s10703_s6 = smov 8  }
  0x14   :  { %45 = dma.hbm_to_vmem [thread:$0]  %s12224_s2, 2048, %s40_s19, [#allocation8], %s10702_s30, %s10702_s30, %s10703_s6  }
  0x15   :  { %s10616_s11 = scalar_lea.hbm %s12222_s0, 128 }
  0x16   :  { %p10617_p8 = scmp.ne.s32.totalorder %s12222_s0, %s10616_s11  ;;  %p10620_p9 = scmp.lt.u32.totalorder %s10616_s11, %s12222_s0 }
  0x18   :  { %p10622_p10 = pnand %p10620_p9, %p10617_p8 }
  0x1a   :  { %10625 = shalt.err (!%p10622_p10)
}
  0x1b   :  { %s10704_s16 = smov [#allocation2]   ;;  %s10626_s20 = scalar_lea.hbm %s12223_s1, 2048 }
  0x1c   :  { %21 = dma.hbm_to_smem %s12222_s0, 128, %s10704_s16, [#allocation5]  }
  0x1d   :  { %p10627_p11 = scmp.ne.s32.totalorder %s12223_s1, %s10626_s20  ;;  %p10630_p12 = scmp.lt.u32.totalorder %s10626_s20, %s12223_s1 }
  0x1f   :  { %p10632_p13 = pnand %p10630_p12, %p10627_p11 }
  0x21   :  { %10635 = shalt.err (!%p10632_p13)
}
  0x22   :  { %s10636_s26 = scalar_lea.vmem %s28_s21, 2048  ;;  %p10641_p1 = scmp.lt.s32.totalorder %s28_s21, %s28_s21 }
  0x23   :  { %p10637_p0 = scmp.ne.s32.totalorder %s28_s21, %s10636_s26  ;;  %p10642_p2 = scmp.lt.s32.totalorder %s10636_s26, %s10636_s26 }
  0x25   :  { %p10643_p3 = por %p10642_p2, %p10641_p1 }
  0x27   :  { %p10644_p4 = pnand %p10643_p3, %p10637_p0 }
  0x29   :  { %10647 = shalt.err (!%p10644_p4)
}
  0x2a   :  { %33 = dma.hbm_to_vmem [thread:$0]  %s12223_s1, 2048, %s28_s21, [#allocation3], %s10702_s30, %s10702_s30, %s10703_s6  }
  0x2b   :  { %s10705_s28 = smov [#allocation9]   ;;  %s10648_s9 = scalar_lea.hbm %s12225_s3, 2048 }
  0x2c   :  { %s51_s29 = sshll.u32 %s10705_s28, 4  ;;  %p10649_p5 = scmp.ne.s32.totalorder %s12225_s3, %s10648_s9  ;;  %s52_s29 = int_to_ptr.vmem [resolvable:$true] %s51_s29 }
  0x2d   :  { %p10652_p6 = scmp.lt.u32.totalorder %s10648_s9, %s12225_s3 }
  0x2f   :  { %p10654_p7 = pnand %p10652_p6, %p10649_p5 }
  0x31   :  { %10657 = shalt.err (!%p10654_p7)
}
  0x32   :  { %s10658_s14 = scalar_lea.vmem %s52_s29, 2048  ;;  %p10663_p9 = scmp.lt.s32.totalorder %s52_s29, %s52_s29 }
  0x33   :  { %p10659_p8 = scmp.ne.s32.totalorder %s52_s29, %s10658_s14  ;;  %p10664_p10 = scmp.lt.s32.totalorder %s10658_s14, %s10658_s14 }
  0x35   :  { %p10665_p11 = por %p10664_p10, %p10663_p9 }
  0x37   :  { %p10666_p12 = pnand %p10665_p11, %p10659_p8 }
  0x39   :  { %10669 = shalt.err (!%p10666_p12)
}
  0x3a   :  { %57 = dma.hbm_to_vmem [thread:$0]  %s12225_s3, 2048, %s52_s29, [#allocation8], %s10702_s30, %s10702_s30, %s10703_s6  }
  0x3b   :  { %10692 = dma.done.wait [#allocation5], 128  }
  0x3c   :  { %10693 = vsyncadd [#allocation5], 4294967168 }
  0x3d   :  { %10694 = dma.done.wait [#allocation3], 2048  }
  0x3e   :  { %10695 = vsyncadd [#allocation3], 4294965248 }
  0x3f   :  { %10696 = dma.done.wait [#allocation8], 4096  }
  0x40   :  { %10697 = vsyncadd [#allocation8], 4294963200 }
  0x41   :  { %72 = sfence }
  0x42   :  { %v73_v0 = vld [vmem:[#allocation7] sm:$0xff]  ;;  %v74_v1 = vld [vmem:[#allocation7 + $0x8] sm:$0xff]  ;;  %v75_v2 = vld [vmem:[#allocation7 + $0x10] sm:$0xff]  ;;  %v10706_v3 = vmov 0.0|0.0   ;;  %vm10707_vm0 = vmmov 0   ;;  %v10708_v8 = vmov 0.0  }
  0x43   :  { %9261 = vmatprep.subr.bf16.mxu1 %v10706_v3  ;;  %v149_v4 = vand.u32 4294901760, %v73_v0  ;;  %v152_v5 = vand.u32 4294901760, %v74_v1  ;;  %v76_v6 = vld [vmem:[#allocation7 + $0x18] sm:$0xff]  ;;  %v155_v7 = vand.u32 4294901760, %v75_v2  ;;  %7403 = vmatprep.mubr.msk.f32.mxu1 %vm10707_vm0, %v10708_v8  ;;  %v77_v10 = vld [vmem:[#allocation7 + $0x20] sm:$0xff]  ;;  %v78_v11 = vld [vmem:[#allocation7 + $0x28] sm:$0xff] }
  0x44   :  { %v158_v9 = vand.u32 4294901760, %v76_v6  ;;  %9405 = vmatprep.subr.bf16.mxu0 %v10706_v3  ;;  %7613 = vmatprep.mubr.msk.f32.mxu0 %vm10707_vm0, %v10708_v8  ;;  %v161_v14 = vand.u32 4294901760, %v77_v10  ;;  %v164_v15 = vand.u32 4294901760, %v78_v11  ;;  %v79_v16 = vld [vmem:[#allocation7 + $0x30] sm:$0xff]  ;;  %v80_v17 = vld [vmem:[#allocation7 + $0x38] sm:$0xff]  ;;  %v81_v21 = vld [vmem:[#allocation7 + $0x40] sm:$0xff] }
  0x45   :  { %v10803_v12 = vpack.c.bf16 %v152_v5, %v149_v4  ;;  %v167_v19 = vand.u32 4294901760, %v79_v16  ;;  %v170_v20 = vand.u32 4294901760, %v80_v17  ;;  %v82_v22 = vld [vmem:[#allocation7 + $0x48] sm:$0xff]  ;;  %v83_v23 = vld [vmem:[#allocation7 + $0x50] sm:$0xff]  ;;  %v84_v24 = vld [vmem:[#allocation7 + $0x58] sm:$0xff]  ;;  %v173_v29 = vand.u32 4294901760, %v81_v21 }
  0x46   :  { %v10806_v13 = vpack.c.bf16 %v158_v9, %v155_v7  ;;  %v10812_v18 = vpack.c.bf16 %v164_v15, %v161_v14  ;;  %v85_v25 = vld [vmem:[#allocation7 + $0x60] sm:$0xff]  ;;  %v86_v26 = vld [vmem:[#allocation7 + $0x68] sm:$0xff]  ;;  %v87_v27 = vld [vmem:[#allocation7 + $0x70] sm:$0xff]  ;;  %v176_v31 = vand.u32 4294901760, %v82_v22  ;;  %v179_v32 = vand.u32 4294901760, %v83_v23  ;;  %s6389_s3 = sld [smem:[#allocation2 + $0x80]] }
  0x47   :  { %9263 = vmatpush3.bf16.msra.mxu1 %v10803_v12  ;;  %9407 = vmatpush3.bf16.msra.mxu0 %v10803_v12  ;;  %v88_v28 = vld [vmem:[#allocation7 + $0x78] sm:$0xff]  ;;  %v10818_v30 = vpack.c.bf16 %v170_v20, %v167_v19  ;;  %v182_v33 = vand.u32 4294901760, %v84_v24  ;;  %v185_v34 = vand.u32 4294901760, %v85_v25  ;;  %v188_v35 = vand.u32 4294901760, %v86_v26  ;;  %s6390_s30 = sld [smem:[#allocation2 + $0x100]]  ;;  %s6397_s27 = sld [smem:[#allocation2 + $0x81]] }
  0x48   :  { %9264 = vmatprep.subr.bf16.mxu1 %v10706_v3  ;;  %9408 = vmatprep.subr.bf16.mxu0 %v10706_v3  ;;  %v191_v36 = vand.u32 4294901760, %v87_v27  ;;  %v194_v37 = vand.u32 4294901760, %v88_v28  ;;  %v10823_v38 = vsub.f32 %v73_v0, %v149_v4  ;;  %v10825_v39 = vsub.f32 %v74_v1, %v152_v5  ;;  %s89_s6 = sld [smem:[#allocation2]]  ;;  %s6398_s28 = sld [smem:[#allocation2 + $0x101]] }
  0x49   :  { %v10827_v40 = vsub.f32 %v75_v2, %v155_v7  ;;  %v10830_v41 = vpack.c.bf16 %v176_v31, %v173_v29  ;;  %v10834_v42 = vpack.c.bf16 %v182_v33, %v179_v32  ;;  %v10836_v43 = vpack.c.bf16 %v188_v35, %v185_v34  ;;  %s6391_s15 = sld [smem:[#allocation2 + $0x180]]  ;;  %s6396_s29 = sld [smem:[#allocation2 + $0x1]] }
  0x4a   :  { %v10838_v44 = vpack.c.bf16 %v194_v37, %v191_v36  ;;  %v237_v45 = vand.u32 4294901760, %v10823_v38  ;;  %v244_v46 = vand.u32 4294901760, %v10825_v39  ;;  %v10843_v47 = vsub.f32 %v76_v6, %v158_v9  ;;  %s6392_s16 = sld [smem:[#allocation2 + $0x200]]  ;;  %s6399_s7 = sld [smem:[#allocation2 + $0x181]] }
  0x4b   :  { %9266 = vmatpush3.bf16.msra.mxu1 %v10806_v13  ;;  %9410 = vmatpush3.bf16.msra.mxu0 %v10806_v13  ;;  %v10845_v48 = vsub.f32 %v77_v10, %v161_v14  ;;  %v251_v49 = vand.u32 4294901760, %v10827_v40  ;;  %v10848_v50 = vsub.f32 %v78_v11, %v164_v15  ;;  %v10850_v51 = vsub.f32 %v79_v16, %v167_v19  ;;  %s6393_s18 = sld [smem:[#allocation2 + $0x280]]  ;;  %s6400_s8 = sld [smem:[#allocation2 + $0x201]] }
  0x4c   :  { %9267 = vmatprep.subr.bf16.mxu1 %v10706_v3  ;;  %9411 = vmatprep.subr.bf16.mxu0 %v10706_v3  ;;  %v10852_v52 = vsub.f32 %v80_v17, %v170_v20  ;;  %v10855_v53 = vsub.f32 %v81_v21, %v173_v29  ;;  %v10857_v54 = vsub.f32 %v82_v22, %v176_v31  ;;  %v258_v60 = vand.u32 4294901760, %v10843_v47  ;;  %s93_s17 = scalar_lea.vmem [#allocation6], %s6389_s3  ;;  %s6394_s20 = sld [smem:[#allocation2 + $0x300]] }
  0x4d   :  { %v10859_v55 = vsub.f32 %v83_v23, %v179_v32  ;;  %v10863_v56 = vsub.f32 %v84_v24, %v182_v33  ;;  %v10865_v57 = vsub.f32 %v85_v25, %v185_v34  ;;  %v10867_v58 = vsub.f32 %v86_v26, %v188_v35  ;;  %s96_s2 = scalar_lea.vmem [#allocation6], %s6390_s30  ;;  %s6395_s23 = sld [smem:[#allocation2 + $0x380]] }
  0x4e   :  { %v238_v59 = vsub.f32 %v10823_v38, %v237_v45  ;;  %v265_v61 = vand.u32 4294901760, %v10845_v48  ;;  %v10873_v62 = vsub.f32 %v87_v27, %v191_v36  ;;  %v245_v63 = vsub.f32 %v10825_v39, %v244_v46  ;;  %s90_s19 = scalar_lea.vmem [#allocation6], %s89_s6  ;;  %s782_s9 = scalar_lea.vmem [#allocation6], %s6397_s27 }
  0x4f   :  { %9269 = vmatpush3.bf16.msra.mxu1 %v10812_v18  ;;  %9413 = vmatpush3.bf16.msra.mxu0 %v10812_v18  ;;  %v252_v0 = vsub.f32 %v10827_v40, %v251_v49  ;;  %v272_v1 = vand.u32 4294901760, %v10848_v50  ;;  %v10878_v2 = vsub.f32 %v88_v28, %v194_v37  ;;  %v279_v4 = vand.u32 4294901760, %v10850_v51  ;;  %s99_s22 = scalar_lea.vmem [#allocation6], %s6391_s15  ;;  %s6401_s10 = sld [smem:[#allocation2 + $0x281]] }
  0x50   :  { %9270 = vmatprep.subr.bf16.mxu1 %v10706_v3  ;;  %9414 = vmatprep.subr.bf16.mxu0 %v10706_v3  ;;  %v286_v5 = vand.u32 4294901760, %v10852_v52  ;;  %v293_v6 = vand.u32 4294901760, %v10855_v53  ;;  %v300_v7 = vand.u32 4294901760, %v10857_v54  ;;  %v307_v9 = vand.u32 4294901760, %v10859_v55  ;;  %s102_s24 = scalar_lea.vmem [#allocation6], %s6392_s16  ;;  %s785_s11 = scalar_lea.vmem [#allocation6], %s6398_s28 }
  0x51   :  { %v314_v10 = vand.u32 4294901760, %v10863_v56  ;;  %v321_v11 = vand.u32 4294901760, %v10865_v57  ;;  %v328_v14 = vand.u32 4294901760, %v10867_v58  ;;  %v335_v15 = vand.u32 4294901760, %v10873_v62  ;;  %s105_s25 = scalar_lea.vmem [#allocation6], %s6393_s18  ;;  %s779_s12 = scalar_lea.vmem [#allocation6], %s6396_s29 }
  0x52   :  { %v10893_v16 = vpack.c.bf16 %v244_v46, %v237_v45  ;;  %v10895_v17 = vpack.c.bf16 %v258_v60, %v251_v49  ;;  %v10897_v19 = vpack.c.bf16 %v272_v1, %v265_v61  ;;  %v342_v20 = vand.u32 4294901760, %v10878_v2  ;;  %s108_s26 = scalar_lea.vmem [#allocation6], %s6394_s20  ;;  %s6402_s13 = sld [smem:[#allocation2 + $0x301]] }
  0x53   :  { %9272 = vmatpush3.bf16.msra.mxu1 %v10818_v30  ;;  %9416 = vmatpush3.bf16.msra.mxu0 %v10818_v30  ;;  %v10900_v21 = vpack.c.bf16 %v286_v5, %v279_v4  ;;  %v10902_v22 = vpack.c.bf16 %v300_v7, %v293_v6  ;;  %v10904_v23 = vpack.c.bf16 %v314_v10, %v307_v9  ;;  %v239_v24 = vand.u32 4294901760, %v238_v59  ;;  %s111_s0 = scalar_lea.vmem [#allocation6], %s6395_s23  ;;  %s788_s14 = scalar_lea.vmem [#allocation6], %s6399_s7 }
  0x54   :  { %9273 = vmatprep.subr.bf16.mxu1 %v10706_v3  ;;  %9417 = vmatprep.subr.bf16.mxu0 %v10706_v3  ;;  %v246_v25 = vand.u32 4294901760, %v245_v63  ;;  %v259_v26 = vsub.f32 %v10843_v47, %v258_v60  ;;  %v10908_v27 = vpack.c.bf16 %v328_v14, %v321_v11  ;;  %v10912_v28 = vpack.c.bf16 %v342_v20, %v335_v15  ;;  %s6403_s1 = sld [smem:[#allocation2 + $0x381]]  ;;  %s791_s21 = scalar_lea.vmem [#allocation6], %s6400_s8 }
  0x55   :  { %v266_v29 = vsub.f32 %v10845_v48, %v265_v61  ;;  %v253_v32 = vand.u32 4294901760, %v252_v0  ;;  %v273_v34 = vsub.f32 %v10848_v50, %v272_v1  ;;  %v280_v35 = vsub.f32 %v10850_v51, %v279_v4  ;;  %s794_s3 = scalar_lea.vmem [#allocation6], %s6401_s10  ;;  %s6405_s15 = sld [smem:[#allocation2 + $0x82]] }
  0x56   :  { %v10917_v31 = vpack.c.bf16 %v246_v25, %v239_v24  ;;  %v260_v33 = vand.u32 4294901760, %v259_v26  ;;  %v287_v36 = vsub.f32 %v10852_v52, %v286_v5  ;;  %v294_v61 = vsub.f32 %v10855_v53, %v293_v6  ;;  %s6406_s16 = sld [smem:[#allocation2 + $0x102]]  ;;  %s6413_s7 = sld [smem:[#allocation2 + $0x83]] }
  0x57   :  { %9275 = vmatpush3.bf16.msra.mxu1 %v10830_v41  ;;  %9419 = vmatpush3.bf16.msra.mxu0 %v10830_v41  ;;  %v267_v45 = vand.u32 4294901760, %v266_v29  ;;  %v274_v46 = vand.u32 4294901760, %v273_v34  ;;  %v281_v49 = vand.u32 4294901760, %v280_v35  ;;  %v301_v63 = vsub.f32 %v10857_v54, %v300_v7  ;;  %s6407_s18 = sld [smem:[#allocation2 + $0x182]]  ;;  %s6414_s8 = sld [smem:[#allocation2 + $0x103]] }
  0x58   :  { %9276 = vmatprep.subr.bf16.mxu1 %v10706_v3  ;;  %9420 = vmatprep.subr.bf16.mxu0 %v10706_v3  ;;  %v10927_v37 = vpack.c.bf16 %v260_v33, %v253_v32  ;;  %v288_v59 = vand.u32 4294901760, %v287_v36  ;;  %v295_v1 = vand.u32 4294901760, %v294_v61  ;;  %v308_v5 = vsub.f32 %v10859_v55, %v307_v9  ;;  %v94_v61 = vld [vmem:[%s93_s17] sm:$0x1]  ;;  %s797_s30 = scalar_lea.vmem [#allocation6], %s6402_s13  ;;  %s6404_s17 = sld [smem:[#allocation2 + $0x2]] }
  0x59   :  { %v10933_v60 = vpack.c.bf16 %v274_v46, %v267_v45  ;;  %v302_v4 = vand.u32 4294901760, %v301_v63  ;;  %v315_v24 = vsub.f32 %v10863_v56, %v314_v10  ;;  %v322_v25 = vsub.f32 %v10865_v57, %v321_v11  ;;  %v97_v63 = vld [vmem:[%s96_s2] sm:$0x1]  ;;  %s6408_s2 = sld [smem:[#allocation2 + $0x202]]  ;;  %s6415_s10 = sld [smem:[#allocation2 + $0x183]] }
  0x5a   :  { %v10938_v0 = vpack.c.bf16 %v288_v59, %v281_v49  ;;  %v309_v7 = vand.u32 4294901760, %v308_v5  ;;  %v329_v29 = vsub.f32 %v10867_v58, %v328_v14  ;;  %v336_v33 = vsub.f32 %v10873_v62, %v335_v15  ;;  %v100_v5 = vld [vmem:[%s99_s22] sm:$0x1]  ;;  %s800_s6 = scalar_lea.vmem [#allocation6], %s6403_s1  ;;  %s6409_s20 = sld [smem:[#allocation2 + $0x282]] }
  0x5b   :  { %9278 = vmatpush3.bf16.msra.mxu1 %v10834_v42  ;;  %9422 = vmatpush3.bf16.msra.mxu0 %v10834_v42  ;;  %v10946_v6 = vpack.c.bf16 %v302_v4, %v295_v1  ;;  %v316_v26 = vand.u32 4294901760, %v315_v24  ;;  %v323_v32 = vand.u32 4294901760, %v322_v25  ;;  %v343_v11 = vsub.f32 %v10878_v2, %v342_v20  ;;  %v91_v4 = vld [vmem:[%s90_s19] sm:$0x1]  ;;  %s1477_s19 = scalar_lea.vmem [#allocation6], %s6405_s15  ;;  %s6417_s13 = sld [smem:[#allocation2 + $0x283]] }
  0x5c   :  { %9279 = vmatprep.subr.bf16.mxu1 %v10706_v3  ;;  %9423 = vmatprep.subr.bf16.mxu0 %v10706_v3  ;;  %v330_v10 = vand.u32 4294901760, %v329_v29  ;;  %v337_v35 = vand.u32 4294901760, %v336_v33  ;;  %v10967_v15 = vpack.c.bf16 %v10825_v39, %v10823_v38  ;;  %v10974_v20 = vpack.c.bf16 %v10843_v47, %v10827_v40  ;;  %s1480_s22 = scalar_lea.vmem [#allocation6], %s6406_s16 }
  0x5d   :  { %v10951_v9 = vpack.c.bf16 %v316_v26, %v309_v7  ;;  %v344_v14 = vand.u32 4294901760, %v343_v11  ;;  %v10982_v38 = vpack.c.bf16 %v10848_v50, %v10845_v48  ;;  %v10988_v39 = vpack.c.bf16 %v10852_v52, %v10850_v51  ;;  %v103_v7 = vld [vmem:[%s102_s24] sm:$0x1]  ;;  %s6410_s24 = sld [smem:[#allocation2 + $0x302]] }
  0x5e   :  { %v10957_v34 = vpack.c.bf16 %v330_v10, %v323_v32  ;;  %v10994_v40 = vpack.c.bf16 %v10857_v54, %v10855_v53  ;;  %v11000_v47 = vpack.c.bf16 %v10863_v56, %v10859_v55  ;;  %v11006_v48 = vpack.c.bf16 %v10867_v58, %v10865_v57  ;;  %v106_v32 = vld [vmem:[%s105_s25] sm:$0x1]  ;;  %s1474_s23 = scalar_lea.vmem [#allocation6], %s6404_s17  ;;  %s1483_s25 = scalar_lea.vmem [#allocation6], %s6407_s18 }
  0x5f   :  { %9281 = vmatpush3.bf16.msra.mxu1 %v10836_v43  ;;  %9425 = vmatpush3.bf16.msra.mxu0 %v10836_v43  ;;  %v10961_v36 = vpack.c.bf16 %v344_v14, %v337_v35  ;;  %v11012_v50 = vpack.c.bf16 %v10878_v2, %v10873_v62  ;;  %v114_v1 = vrot.slane %v94_v61, 7  ;;  %vm134_vm1 = vcmask 1040384   ;;  %v109_v11 = vld [vmem:[%s108_s26] sm:$0x1]  ;;  %s6411_s26 = sld [smem:[#allocation2 + $0x382]]  ;;  %s6421_s18 = sld [smem:[#allocation2 + $0x84]] }
  0x60   :  { %9282 = vmatprep.subr.bf16.mxu1 %v10706_v3  ;;  %9426 = vmatprep.subr.bf16.mxu0 %v10706_v3  ;;  %v117_v24 = vrot.slane %v97_v63, 6  ;;  %vm136_vm2 = vcmask 1041408   ;;  %v120_v26 = vrot.slane %v100_v5, 5  ;;  %vm138_vm3 = vcmask 1042432   ;;  %s1489_s27 = scalar_lea.vmem [#allocation6], %s6409_s20  ;;  %s6423_s20 = sld [smem:[#allocation2 + $0x184]] }
  0x61   :  { %v135_v25 = vsel %vm134_vm1, %v91_v4, %v114_v1  ;;  %v123_v10 = vrot.slane %v103_v7, 4  ;;  %vm140_vm4 = vcmask 1043456   ;;  %v126_v35 = vrot.slane %v106_v32, 3  ;;  %s2184_s15 = scalar_lea.vmem [#allocation6], %s6417_s13  ;;  %s6431_s13 = sld [smem:[#allocation2 + $0x185]] }
  0x62   :  { %v137_v29 = vsel %vm136_vm2, %v135_v25, %v117_v24  ;;  %vm142_vm5 = vcmask 1044480   ;;  %vm144_vm6 = vcmask 1045504   ;;  %vm146_vm7 = vcmask 1046528  }
  0x63   :  { %9284 = vmatpush3.bf16.msra.mxu1 %v10838_v44  ;;  %9428 = vmatpush3.bf16.msra.mxu0 %v10838_v44  ;;  %v139_v33 = vsel %vm138_vm3, %v137_v29, %v120_v26  ;;  %s1492_s28 = scalar_lea.vmem [#allocation6], %s6410_s24  ;;  %s6425_s24 = sld [smem:[#allocation2 + $0x284]] }
  0x64   :  { %9285 = vmatprep.subr.bf16.mxu1 %v10706_v3  ;;  %9453 = vmatprep.subr.bf16.mxu0 %v10706_v3  ;;  %v141_v14 = vsel %vm140_vm4, %v139_v33, %v123_v10 }
  0x65   :  { %s1495_s29 = scalar_lea.vmem [#allocation6], %s6411_s26 }
  0x66   :  { %7404 = vmatmul.mubr.f32.vlgmr.msra.gmra.mrb[0].mxu1 %v10708_v8 }
  0x67   :  { %9287 = vmatpush3.bf16.msra.mxu1 %v10917_v31  ;;  %7438 = vmatprep.mubr.msk.f32.mxu1 %vm10707_vm0, %v10708_v8 }
  0x68   :  { %9288 = vmatprep.subr.bf16.mxu1 %v10706_v3 }
  0x6b   :  { %9290 = vmatpush3.bf16.msra.mxu1 %v10927_v37 }
  0x6c   :  { %9291 = vmatprep.subr.bf16.mxu1 %v10706_v3 }
  0x6f   :  { %9293 = vmatpush3.bf16.msra.mxu1 %v10933_v60 }
  0x70   :  { %9294 = vmatprep.subr.bf16.mxu1 %v10706_v3 }
  0x73   :  { %9296 = vmatpush3.bf16.msra.mxu1 %v10938_v0 }
  0x74   :  { %9297 = vmatprep.subr.bf16.mxu1 %v10706_v3 }
  0x77   :  { %9299 = vmatpush3.bf16.msra.mxu1 %v10946_v6 }
  0x78   :  { %9300 = vmatprep.subr.bf16.mxu1 %v10706_v3 }
  0x7b   :  { %9302 = vmatpush3.bf16.msra.mxu1 %v10951_v9 }
  0x7c   :  { %9303 = vmatprep.subr.bf16.mxu1 %v10706_v3 }
  0x7f   :  { %9305 = vmatpush3.bf16.msra.mxu1 %v10957_v34 }
  0x80   :  { %9306 = vmatprep.subr.bf16.mxu1 %v10706_v3 }
  0x83   :  { %9308 = vmatpush3.bf16.msra.mxu1 %v10961_v36 }
  0x84   :  { %9309 = vmatprep.subr.bf16.mxu1 %v10706_v3 }
  0x86   :  { %7439 = vmatmul.mubr.f32.vlgmr.msra.gmra.mrb[2].mxu1 %v10708_v8 }
  0x87   :  { %9311 = vmatpush3.bf16.msra.mxu1 %v10967_v15  ;;  %7473 = vmatprep.mubr.msk.f32.mxu1 %vm10707_vm0, %v10708_v8 }
  0x88   :  { %9312 = vmatprep.subr.bf16.mxu1 %v10706_v3 }
  0x8b   :  { %9314 = vmatpush3.bf16.msra.mxu1 %v10974_v20 }
  0x8c   :  { %9315 = vmatprep.subr.bf16.mxu1 %v10706_v3 }
  0x8f   :  { %9317 = vmatpush3.bf16.msra.mxu1 %v10982_v38 }
  0x90   :  { %9318 = vmatprep.subr.bf16.mxu1 %v10706_v3 }
  0x93   :  { %9320 = vmatpush3.bf16.msra.mxu1 %v10988_v39 }
  0x94   :  { %9321 = vmatprep.subr.bf16.mxu1 %v10706_v3 }
  0x97   :  { %9323 = vmatpush3.bf16.msra.mxu1 %v10994_v40 }
  0x98   :  { %9324 = vmatprep.subr.bf16.mxu1 %v10706_v3 }
  0x9b   :  { %9326 = vmatpush3.bf16.msra.mxu1 %v11000_v47 }
  0x9c   :  { %9327 = vmatprep.subr.bf16.mxu1 %v10706_v3 }
  0x9f   :  { %9329 = vmatpush3.bf16.msra.mxu1 %v11006_v48 }
  0xa0   :  { %9330 = vmatprep.subr.bf16.mxu1 %v10706_v3 }
  0xa3   :  { %9332 = vmatpush3.bf16.msra.mxu1 %v11012_v50 }
  0xa4   :  { %9333 = vmatprep.subr.bf16.mxu1 %v10706_v3 }
  0xa6   :  { %7474 = vmatmul.mubr.f32.vlgmr.msra.gmra.mrb[4].mxu1 %v10708_v8 }
  0xa7   :  { %9335 = vmatpush3.bf16.msra.mxu1 %v10803_v12  ;;  %7508 = vmatprep.mubr.msk.f32.mxu1 %vm10707_vm0, %v10708_v8 }
  0xa8   :  { %9336 = vmatprep.subr.bf16.mxu1 %v10706_v3 }
  0xab   :  { %9338 = vmatpush3.bf16.msra.mxu1 %v10806_v13 }
  0xac   :  { %9339 = vmatprep.subr.bf16.mxu1 %v10706_v3 }
  0xaf   :  { %9341 = vmatpush3.bf16.msra.mxu1 %v10812_v18 }
  0xb0   :  { %9342 = vmatprep.subr.bf16.mxu1 %v10706_v3 }
  0xb3   :  { %9344 = vmatpush3.bf16.msra.mxu1 %v10818_v30 }
  0xb4   :  { %9345 = vmatprep.subr.bf16.mxu1 %v10706_v3 }
  0xb7   :  { %9347 = vmatpush3.bf16.msra.mxu1 %v10830_v41 }
  0xb8   :  { %9348 = vmatprep.subr.bf16.mxu1 %v10706_v3 }
  0xbb   :  { %9350 = vmatpush3.bf16.msra.mxu1 %v10834_v42 }
  0xbc   :  { %9351 = vmatprep.subr.bf16.mxu1 %v10706_v3 }
  0xbf   :  { %9353 = vmatpush3.bf16.msra.mxu1 %v10836_v43 }
  0xc0   :  { %9354 = vmatprep.subr.bf16.mxu1 %v10706_v3 }
  0xc3   :  { %9356 = vmatpush3.bf16.msra.mxu1 %v10838_v44 }
  0xc4   :  { %9357 = vmatprep.subr.bf16.mxu1 %v10706_v3 }
  0xc6   :  { %7509 = vmatmul.mubr.f32.vlgmr.msra.gmra.mrb[6].mxu1 %v10708_v8 }
  0xc7   :  { %9359 = vmatpush3.bf16.msra.mxu1 %v10893_v16  ;;  %7543 = vmatprep.mubr.msk.f32.mxu1 %vm10707_vm0, %v10708_v8 }
  0xc8   :  { %9360 = vmatprep.subr.bf16.mxu1 %v10706_v3 }
  0xcb   :  { %9362 = vmatpush3.bf16.msra.mxu1 %v10895_v17 }
  0xcc   :  { %9363 = vmatprep.subr.bf16.mxu1 %v10706_v3 }
  0xcf   :  { %9365 = vmatpush3.bf16.msra.mxu1 %v10897_v19 }
  0xd0   :  { %9366 = vmatprep.subr.bf16.mxu1 %v10706_v3 }
  0xd3   :  { %9368 = vmatpush3.bf16.msra.mxu1 %v10900_v21 }
  0xd4   :  { %9369 = vmatprep.subr.bf16.mxu1 %v10706_v3 }
  0xd7   :  { %9371 = vmatpush3.bf16.msra.mxu1 %v10902_v22 }
  0xd8   :  { %9372 = vmatprep.subr.bf16.mxu1 %v10706_v3 }
  0xdb   :  { %9374 = vmatpush3.bf16.msra.mxu1 %v10904_v23 }
  0xdc   :  { %9375 = vmatprep.subr.bf16.mxu1 %v10706_v3 }
  0xdf   :  { %9377 = vmatpush3.bf16.msra.mxu1 %v10908_v27 }
  0xe0   :  { %9378 = vmatprep.subr.bf16.mxu1 %v10706_v3 }
  0xe3   :  { %9380 = vmatpush3.bf16.msra.mxu1 %v10912_v28 }
  0xe4   :  { %9381 = vmatprep.subr.bf16.mxu1 %v10706_v3 }
  0xe6   :  { %7544 = vmatmul.mubr.f32.vlgmr.msra.gmra.mrb[8].mxu1 %v10708_v8 }
  0xe7   :  { %9383 = vmatpush3.bf16.msra.mxu1 %v10803_v12  ;;  %7578 = vmatprep.mubr.msk.f32.mxu1 %vm10707_vm0, %v10708_v8 }
  0xe8   :  { %9384 = vmatprep.subr.bf16.mxu1 %v10706_v3 }
  0xeb   :  { %9386 = vmatpush3.bf16.msra.mxu1 %v10806_v13 }
  0xec   :  { %9387 = vmatprep.subr.bf16.mxu1 %v10706_v3 }
  0xef   :  { %9389 = vmatpush3.bf16.msra.mxu1 %v10812_v18 }
  0xf0   :  { %9390 = vmatprep.subr.bf16.mxu1 %v10706_v3 }
  0xf3   :  { %9392 = vmatpush3.bf16.msra.mxu1 %v10818_v30 }
  0xf4   :  { %9393 = vmatprep.subr.bf16.mxu1 %v10706_v3 }
  0xf7   :  { %9395 = vmatpush3.bf16.msra.mxu1 %v10830_v41 }
  0xf8   :  { %9396 = vmatprep.subr.bf16.mxu1 %v10706_v3 }
  0xfb   :  { %9398 = vmatpush3.bf16.msra.mxu1 %v10834_v42 }
  0xfc   :  { %9399 = vmatprep.subr.bf16.mxu1 %v10706_v3 }
  0xff   :  { %9401 = vmatpush3.bf16.msra.mxu1 %v10836_v43 }
 0x100   :  { %9402 = vmatprep.subr.bf16.mxu1 %v10706_v3 }
 0x103   :  { %9404 = vmatpush3.bf16.msra.mxu1 %v10838_v44 }
 0x104   :  { %9429 = vmatprep.subr.bf16.mxu1 %v10706_v3 }
 0x106   :  { %7579 = vmatmul.mubr.f32.vlgmr.msra.gmra.mrb[10].mxu1 %v10708_v8 }
 0x107   :  { %9431 = vmatpush3.bf16.msra.mxu1 %v10917_v31  ;;  %7648 = vmatprep.mubr.msk.f32.mxu1 %vm10707_vm0, %v10708_v8 }
 0x108   :  { %9432 = vmatprep.subr.bf16.mxu1 %v10706_v3 }
 0x10b   :  { %9434 = vmatpush3.bf16.msra.mxu1 %v10927_v37 }
 0x10c   :  { %9435 = vmatprep.subr.bf16.mxu1 %v10706_v3 }
 0x10f   :  { %9437 = vmatpush3.bf16.msra.mxu1 %v10933_v60 }
 0x110   :  { %9438 = vmatprep.subr.bf16.mxu1 %v10706_v3 }
 0x113   :  { %9440 = vmatpush3.bf16.msra.mxu1 %v10938_v0 }
 0x114   :  { %9441 = vmatprep.subr.bf16.mxu1 %v10706_v3 }
 0x117   :  { %9443 = vmatpush3.bf16.msra.mxu1 %v10946_v6 }
 0x118   :  { %9444 = vmatprep.subr.bf16.mxu1 %v10706_v3 }
 0x11b   :  { %9446 = vmatpush3.bf16.msra.mxu1 %v10951_v9 }
 0x11c   :  { %9447 = vmatprep.subr.bf16.mxu1 %v10706_v3 }
 0x11f   :  { %9449 = vmatpush3.bf16.msra.mxu1 %v10957_v34 }
 0x120   :  { %9450 = vmatprep.subr.bf16.mxu1 %v10706_v3 }
 0x123   :  { %9452 = vmatpush3.bf16.msra.mxu1 %v10961_v36 }
 0x124   :  { %9477 = vmatprep.subr.bf16.mxu1 %v10706_v3 }
 0x139   :  { %v230_v51 = vpop.f32.mrb[0].mxu1 }
 0x13a   :  { %v7405_v52 = vpop.f32.mrb[1].mxu1 }
 0x13b   :  { %v129_v52 = vrot.slane %v109_v11, 2  ;;  %v783_v11 = vld [vmem:[%s782_s9] sm:$0x1]  ;;  %s6412_s9 = sld [smem:[#allocation2 + $0x3]] }
 0x141   :  { %s2169_s1 = scalar_lea.vmem [#allocation6], %s6412_s9 }
 0x159   :  { %v380_v53 = vpop.f32.mrb[2].mxu1 }
 0x15a   :  { %v381_v54 = vadd.f32 %v380_v53, %v230_v51  ;;  %v7440_v55 = vpop.f32.mrb[3].mxu1  ;;  %v112_v51 = vld [vmem:[%s111_s0] sm:$0x1]  ;;  %v143_v53 = vsel %vm142_vm5, %v141_v14, %v126_v35  ;;  %v803_v14 = vrot.slane %v783_v11, 7  ;;  %s1486_s0 = scalar_lea.vmem [#allocation6], %s6408_s2  ;;  %s6422_s2 = sld [smem:[#allocation2 + $0x104]] }
 0x15b   :  { %v145_v55 = vsel %vm144_vm6, %v143_v53, %v129_v52  ;;  %v786_v35 = vld [vmem:[%s785_s11] sm:$0x1]  ;;  %s6416_s11 = sld [smem:[#allocation2 + $0x203]] }
 0x15c   :  { %v789_v52 = vld [vmem:[%s788_s14] sm:$0x1]  ;;  %v806_v53 = vrot.slane %v786_v35, 6  ;;  %s2175_s14 = scalar_lea.vmem [#allocation6], %s6414_s8 }
 0x179   :  { %v482_v56 = vpop.f32.mrb[4].mxu1 }
 0x17a   :  { %v483_v57 = vadd.f32 %v482_v56, %v381_v54  ;;  %v7475_v58 = vpop.f32.mrb[5].mxu1  ;;  %v132_v54 = vrot.slane %v112_v51, 1  ;;  %v780_v51 = vld [vmem:[%s779_s12] sm:$0x1]  ;;  %s2172_s12 = scalar_lea.vmem [#allocation6], %s6413_s7  ;;  %s2879_s7 = scalar_lea.vmem [#allocation6], %s6425_s24 }
 0x17b   :  { %s6439_s24 = sld [smem:[#allocation2 + $0x186]] }
 0x17c   :  { %v147_v56 = vsel %vm146_vm7, %v145_v55, %v132_v54  ;;  %v823_v54 = vsel %vm134_vm1, %v780_v51, %v803_v14  ;;  %v792_v55 = vld [vmem:[%s791_s21] sm:$0x1]  ;;  %s6418_s21 = sld [smem:[#allocation2 + $0x303]] }
 0x182   :  { %s2187_s16 = scalar_lea.vmem [#allocation6], %s6418_s21  ;;  %s6433_s21 = sld [smem:[#allocation2 + $0x285]] }
 0x199   :  { %v568_v62 = vpop.f32.mrb[6].mxu1 }
 0x19a   :  { %v569_v2 = vadd.f32 %v568_v62, %v483_v57  ;;  %v7510_v45 = vpop.f32.mrb[7].mxu1 }
 0x1b9   :  { %v686_v46 = vpop.f32.mrb[8].mxu1 }
 0x1ba   :  { %v687_v49 = vadd.f32 %v686_v46, %v569_v2  ;;  %v7545_v59 = vpop.f32.mrb[9].mxu1 }
 0x1d9   :  { %v772_v57 = vpop.f32.mrb[10].mxu1 }
 0x1da   :  { %v773_v58 = vadd.f32 %v772_v57, %v687_v49  ;;  %v7580_v62 = vpop.f32.mrb[11].mxu1  ;;  %v824_v57 = vsel %vm136_vm2, %v823_v54, %v806_v53 }
 0x1db   :  { %v812_v62 = vrot.slane %v792_v55, 4 }
 0x1dc   :  { %v776_v2 = vadd.f32 %v773_v58, %v147_v56  ;;  %v809_v56 = vrot.slane %v789_v52, 5  ;;  %v795_v58 = vld [vmem:[%s794_s3] sm:$0x1]  ;;  %s2178_s3 = scalar_lea.vmem [#allocation6], %s6415_s10  ;;  %s6429_s10 = sld [smem:[#allocation2 + $0x85]] }
 0x1de   :  { %10578 = vtanh.f32 %v776_v2  ;;  %v825_v2 = vsel %vm138_vm3, %v824_v57, %v809_v56 }
 0x1e8   :  { %v10579_v45 = vpop.eup %10578 }
 0x1e9   :  { %v11100_v46 = vand.u32 4294901760, %v10579_v45 }
 0x1eb   :  { %7649 = vmatmul.mubr.f32.vlgmr.msra.gmra.mrb[12].mxu1 %v11100_v46  ;;  %v912_v59 = vsub.f32 %v10579_v45, %v11100_v46 }
 0x1ec   :  { %9479 = vmatpush3.bf16.msra.mxu1 %v10803_v12  ;;  %7718 = vmatprep.mubr.msk.f32.mxu1 %vm10707_vm0, %v10708_v8 }
 0x1ed   :  { %9480 = vmatprep.subr.bf16.mxu1 %v10706_v3  ;;  %v913_v61 = vand.u32 4294901760, %v912_v59 }
 0x1ef   :  { %v914_v63 = vsub.f32 %v912_v59, %v913_v61 }
 0x1f0   :  { %9482 = vmatpush3.bf16.msra.mxu1 %v10806_v13 }
 0x1f1   :  { %9483 = vmatprep.subr.bf16.mxu1 %v10706_v3  ;;  %v915_v49 = vand.u32 4294901760, %v914_v63  ;;  %v826_v63 = vsel %vm140_vm4, %v825_v2, %v812_v62 }
 0x1f3   :  { %7614 = vmatmul.mubr.f32.vlgmr.msra.gmra.mrb[0].mxu0 %v915_v49  ;;  %v801_v49 = vld [vmem:[%s800_s6] sm:$0x1]  ;;  %s2181_s6 = scalar_lea.vmem [#allocation6], %s6416_s11  ;;  %s6430_s11 = sld [smem:[#allocation2 + $0x105]] }
 0x1f4   :  { %9455 = vmatpush3.bf16.msra.mxu0 %v10967_v15  ;;  %9485 = vmatpush3.bf16.msra.mxu1 %v10812_v18 }
 0x1f5   :  { %9456 = vmatprep.subr.bf16.mxu0 %v10706_v3  ;;  %9486 = vmatprep.subr.bf16.mxu1 %v10706_v3 }
 0x1f6   :  { %7683 = vmatprep.mubr.msk.f32.mxu0 %vm10707_vm0, %v10708_v8 }
 0x1f8   :  { %9458 = vmatpush3.bf16.msra.mxu0 %v10974_v20  ;;  %9488 = vmatpush3.bf16.msra.mxu1 %v10818_v30 }
 0x1f9   :  { %9459 = vmatprep.subr.bf16.mxu0 %v10706_v3  ;;  %9489 = vmatprep.subr.bf16.mxu1 %v10706_v3 }
 0x1fc   :  { %9461 = vmatpush3.bf16.msra.mxu0 %v10982_v38  ;;  %9491 = vmatpush3.bf16.msra.mxu1 %v10830_v41 }
 0x1fd   :  { %9462 = vmatprep.subr.bf16.mxu0 %v10706_v3  ;;  %9492 = vmatprep.subr.bf16.mxu1 %v10706_v3 }
 0x200   :  { %9464 = vmatpush3.bf16.msra.mxu0 %v10988_v39  ;;  %9494 = vmatpush3.bf16.msra.mxu1 %v10834_v42 }
 0x201   :  { %9465 = vmatprep.subr.bf16.mxu0 %v10706_v3  ;;  %9495 = vmatprep.subr.bf16.mxu1 %v10706_v3 }
 0x204   :  { %9467 = vmatpush3.bf16.msra.mxu0 %v10994_v40  ;;  %9497 = vmatpush3.bf16.msra.mxu1 %v10836_v43 }
 0x205   :  { %9468 = vmatprep.subr.bf16.mxu0 %v10706_v3  ;;  %9498 = vmatprep.subr.bf16.mxu1 %v10706_v3 }
 0x208   :  { %9470 = vmatpush3.bf16.msra.mxu0 %v11000_v47  ;;  %9500 = vmatpush3.bf16.msra.mxu1 %v10838_v44 }
 0x209   :  { %9471 = vmatprep.subr.bf16.mxu0 %v10706_v3  ;;  %9525 = vmatprep.subr.bf16.mxu1 %v10706_v3 }
 0x20b   :  { %7719 = vmatmul.mubr.f32.vlgmr.msra.gmra.mrb[14].mxu1 %v913_v61 }
 0x20c   :  { %9473 = vmatpush3.bf16.msra.mxu0 %v11006_v48  ;;  %9527 = vmatpush3.bf16.msra.mxu1 %v10803_v12 }
 0x20d   :  { %9474 = vmatprep.subr.bf16.mxu0 %v10706_v3  ;;  %9528 = vmatprep.subr.bf16.mxu1 %v10706_v3 }
 0x20e   :  { %7788 = vmatprep.mubr.msk.f32.mxu1 %vm10707_vm0, %v10708_v8 }
 0x210   :  { %9476 = vmatpush3.bf16.msra.mxu0 %v11012_v50  ;;  %9530 = vmatpush3.bf16.msra.mxu1 %v10806_v13 }
 0x211   :  { %9501 = vmatprep.subr.bf16.mxu0 %v10706_v3  ;;  %9531 = vmatprep.subr.bf16.mxu1 %v10706_v3 }
 0x213   :  { %7684 = vmatmul.mubr.f32.vlgmr.msra.gmra.mrb[2].mxu0 %v912_v59  ;;  %v815_v59 = vrot.slane %v795_v58, 3 }
 0x214   :  { %9503 = vmatpush3.bf16.msra.mxu0 %v10893_v16  ;;  %9533 = vmatpush3.bf16.msra.mxu1 %v10812_v18 }
 0x215   :  { %9504 = vmatprep.subr.bf16.mxu0 %v10706_v3  ;;  %9534 = vmatprep.subr.bf16.mxu1 %v10706_v3 }
 0x216   :  { %7753 = vmatprep.mubr.msk.f32.mxu0 %vm10707_vm0, %v10708_v8 }
 0x218   :  { %9506 = vmatpush3.bf16.msra.mxu0 %v10895_v17  ;;  %9536 = vmatpush3.bf16.msra.mxu1 %v10818_v30 }
 0x219   :  { %9507 = vmatprep.subr.bf16.mxu0 %v10706_v3  ;;  %9537 = vmatprep.subr.bf16.mxu1 %v10706_v3 }
 0x21c   :  { %9509 = vmatpush3.bf16.msra.mxu0 %v10897_v19  ;;  %9539 = vmatpush3.bf16.msra.mxu1 %v10830_v41 }
 0x21d   :  { %9510 = vmatprep.subr.bf16.mxu0 %v10706_v3  ;;  %9540 = vmatprep.subr.bf16.mxu1 %v10706_v3 }
 0x220   :  { %9512 = vmatpush3.bf16.msra.mxu0 %v10900_v21  ;;  %9542 = vmatpush3.bf16.msra.mxu1 %v10834_v42 }
 0x221   :  { %9513 = vmatprep.subr.bf16.mxu0 %v10706_v3  ;;  %9543 = vmatprep.subr.bf16.mxu1 %v10706_v3 }
 0x224   :  { %9515 = vmatpush3.bf16.msra.mxu0 %v10902_v22  ;;  %9545 = vmatpush3.bf16.msra.mxu1 %v10836_v43 }
 0x225   :  { %9516 = vmatprep.subr.bf16.mxu0 %v10706_v3  ;;  %9546 = vmatprep.subr.bf16.mxu1 %v10706_v3 }
 0x228   :  { %9518 = vmatpush3.bf16.msra.mxu0 %v10904_v23  ;;  %9548 = vmatpush3.bf16.msra.mxu1 %v10838_v44 }
 0x229   :  { %9519 = vmatprep.subr.bf16.mxu0 %v10706_v3  ;;  %9573 = vmatprep.subr.bf16.mxu1 %v10706_v3 }
 0x22b   :  { %7789 = vmatmul.mubr.f32.vlgmr.msra.gmra.mrb[16].mxu1 %v11100_v46 }
 0x22c   :  { %9521 = vmatpush3.bf16.msra.mxu0 %v10908_v27  ;;  %9575 = vmatpush3.bf16.msra.mxu1 %v10917_v31 }
 0x22d   :  { %9522 = vmatprep.subr.bf16.mxu0 %v10706_v3  ;;  %9576 = vmatprep.subr.bf16.mxu1 %v10706_v3 }
 0x22e   :  { %7858 = vmatprep.mubr.msk.f32.mxu1 %vm10707_vm0, %v10708_v8 }
 0x230   :  { %9524 = vmatpush3.bf16.msra.mxu0 %v10912_v28  ;;  %9578 = vmatpush3.bf16.msra.mxu1 %v10927_v37 }
 0x231   :  { %9549 = vmatprep.subr.bf16.mxu0 %v10706_v3  ;;  %9579 = vmatprep.subr.bf16.mxu1 %v10706_v3 }
 0x233   :  { %7754 = vmatmul.mubr.f32.vlgmr.msra.gmra.mrb[4].mxu0 %v11100_v46  ;;  %v798_v46 = vld [vmem:[%s797_s30] sm:$0x1]  ;;  %s6419_s30 = sld [smem:[#allocation2 + $0x383]] }
 0x234   :  { %9551 = vmatpush3.bf16.msra.mxu0 %v10803_v12  ;;  %9581 = vmatpush3.bf16.msra.mxu1 %v10933_v60 }
 0x235   :  { %9552 = vmatprep.subr.bf16.mxu0 %v10706_v3  ;;  %9582 = vmatprep.subr.bf16.mxu1 %v10706_v3 }
 0x236   :  { %7823 = vmatprep.mubr.msk.f32.mxu0 %vm10707_vm0, %v10708_v8 }
 0x238   :  { %9554 = vmatpush3.bf16.msra.mxu0 %v10806_v13  ;;  %9584 = vmatpush3.bf16.msra.mxu1 %v10938_v0 }
 0x239   :  { %9555 = vmatprep.subr.bf16.mxu0 %v10706_v3  ;;  %9585 = vmatprep.subr.bf16.mxu1 %v10706_v3  ;;  %s2190_s17 = scalar_lea.vmem [#allocation6], %s6419_s30 }
 0x23c   :  { %9557 = vmatpush3.bf16.msra.mxu0 %v10812_v18  ;;  %9587 = vmatpush3.bf16.msra.mxu1 %v10946_v6 }
 0x23d   :  { %9558 = vmatprep.subr.bf16.mxu0 %v10706_v3  ;;  %9588 = vmatprep.subr.bf16.mxu1 %v10706_v3 }
 0x240   :  { %9560 = vmatpush3.bf16.msra.mxu0 %v10818_v30  ;;  %9590 = vmatpush3.bf16.msra.mxu1 %v10951_v9 }
 0x241   :  { %9561 = vmatprep.subr.bf16.mxu0 %v10706_v3  ;;  %9591 = vmatprep.subr.bf16.mxu1 %v10706_v3 }
 0x244   :  { %9563 = vmatpush3.bf16.msra.mxu0 %v10830_v41  ;;  %9593 = vmatpush3.bf16.msra.mxu1 %v10957_v34 }
 0x245   :  { %9564 = vmatprep.subr.bf16.mxu0 %v10706_v3  ;;  %9594 = vmatprep.subr.bf16.mxu1 %v10706_v3 }
 0x248   :  { %9566 = vmatpush3.bf16.msra.mxu0 %v10834_v42  ;;  %9596 = vmatpush3.bf16.msra.mxu1 %v10961_v36 }
 0x249   :  { %9567 = vmatprep.subr.bf16.mxu0 %v10706_v3  ;;  %9621 = vmatprep.subr.bf16.mxu1 %v10706_v3 }
 0x24c   :  { %9569 = vmatpush3.bf16.msra.mxu0 %v10836_v43 }
 0x24d   :  { %9570 = vmatprep.subr.bf16.mxu0 %v10706_v3 }
 0x250   :  { %9572 = vmatpush3.bf16.msra.mxu0 %v10838_v44 }
 0x251   :  { %9597 = vmatprep.subr.bf16.mxu0 %v10706_v3 }
 0x2be   :  { %v1068_v1 = vpop.f32.mrb[12].mxu1 }
 0x2bf   :  { %v7650_v4 = vpop.f32.mrb[13].mxu1 }
 0x2c0   :  { %v827_v4 = vsel %vm142_vm5, %v826_v63, %v815_v59  ;;  %v1481_v63 = vld [vmem:[%s1480_s22] sm:$0x1]  ;;  %s6424_s22 = sld [smem:[#allocation2 + $0x204]] }
 0x2c6   :  { %v917_v5 = vpop.f32.mrb[0].mxu0 }
 0x2c7   :  { %v1069_v24 = vadd.f32 %v1068_v1, %v917_v5  ;;  %v7615_v25 = vpop.f32.mrb[1].mxu0  ;;  %v818_v1 = vrot.slane %v798_v46, 2  ;;  %v821_v5 = vrot.slane %v801_v49, 1 }
 0x2de   :  { %v1261_v7 = vpop.f32.mrb[14].mxu1 }
 0x2df   :  { %v7720_v26 = vpop.f32.mrb[15].mxu1 }
 0x2e6   :  { %v1172_v29 = vpop.f32.mrb[2].mxu0 }
 0x2e7   :  { %v1173_v32 = vadd.f32 %v1172_v29, %v1069_v24  ;;  %v7685_v10 = vpop.f32.mrb[3].mxu0  ;;  %v828_v24 = vsel %vm144_vm6, %v827_v4, %v818_v1  ;;  %v1475_v1 = vld [vmem:[%s1474_s23] sm:$0x1]  ;;  %s2867_s23 = scalar_lea.vmem [#allocation6], %s6421_s18  ;;  %s3574_s18 = scalar_lea.vmem [#allocation6], %s6433_s21 }
 0x2e8   :  { %v829_v29 = vsel %vm146_vm7, %v828_v24, %v821_v5  ;;  %v1484_v4 = vld [vmem:[%s1483_s25] sm:$0x1]  ;;  %v1501_v5 = vrot.slane %v1481_v63, 6  ;;  %s2870_s25 = scalar_lea.vmem [#allocation6], %s6422_s2  ;;  %s6447_s21 = sld [smem:[#allocation2 + $0x187]] }
 0x2e9   :  { %v1262_v33 = vadd.f32 %v1261_v7, %v1173_v32 }
 0x2fe   :  { %v1467_v45 = vpop.f32.mrb[16].mxu1 }
 0x2ff   :  { %v7790_v61 = vpop.f32.mrb[17].mxu1 }
 0x300   :  { %v1478_v61 = vld [vmem:[%s1477_s19] sm:$0x1]  ;;  %s6420_s19 = sld [smem:[#allocation2 + $0x4]] }
 0x301   :  { %v1498_v49 = vrot.slane %v1478_v61, 7 }
 0x303   :  { %v1518_v24 = vsel %vm134_vm1, %v1475_v1, %v1498_v49 }
 0x306   :  { %v1380_v25 = vpop.f32.mrb[4].mxu0  ;;  %s2864_s26 = scalar_lea.vmem [#allocation6], %s6420_s19 }
 0x307   :  { %v1381_v7 = vadd.f32 %v1380_v25, %v1262_v33  ;;  %v7755_v26 = vpop.f32.mrb[5].mxu0  ;;  %v1487_v25 = vld [vmem:[%s1486_s0] sm:$0x1]  ;;  %s6426_s0 = sld [smem:[#allocation2 + $0x304]] }
 0x308   :  { %v1519_v26 = vsel %vm136_vm2, %v1518_v24, %v1501_v5 }
 0x309   :  { %v1468_v32 = vadd.f32 %v1467_v45, %v1381_v7  ;;  %v1504_v7 = vrot.slane %v1484_v4, 5 }
 0x30b   :  { %v1471_v10 = vadd.f32 %v1468_v32, %v829_v29  ;;  %v1490_v29 = vld [vmem:[%s1489_s27] sm:$0x1]  ;;  %v1507_v32 = vrot.slane %v1487_v25, 4  ;;  %s2873_s27 = scalar_lea.vmem [#allocation6], %s6423_s20  ;;  %s6437_s20 = sld [smem:[#allocation2 + $0x86]] }
 0x30d   :  { %10580 = vtanh.f32 %v1471_v10  ;;  %v1520_v10 = vsel %vm138_vm3, %v1519_v26, %v1504_v7  ;;  %s2882_s8 = scalar_lea.vmem [#allocation6], %s6426_s0  ;;  %s6441_s0 = sld [smem:[#allocation2 + $0x286]] }
 0x317   :  { %v10581_v11 = vpop.eup %10580 }
 0x318   :  { %v11221_v35 = vand.u32 4294901760, %v10581_v11 }
 0x31a   :  { %7859 = vmatmul.mubr.f32.vlgmr.msra.gmra.mrb[18].mxu1 %v11221_v35  ;;  %v1607_v14 = vsub.f32 %v10581_v11, %v11221_v35 }
 0x31b   :  { %9623 = vmatpush3.bf16.msra.mxu1 %v10803_v12  ;;  %7928 = vmatprep.mubr.msk.f32.mxu1 %vm10707_vm0, %v10708_v8 }
 0x31c   :  { %9624 = vmatprep.subr.bf16.mxu1 %v10706_v3  ;;  %v1608_v33 = vand.u32 4294901760, %v1607_v14 }
 0x31e   :  { %v1609_v51 = vsub.f32 %v1607_v14, %v1608_v33 }
 0x31f   :  { %9626 = vmatpush3.bf16.msra.mxu1 %v10806_v13 }
 0x320   :  { %9627 = vmatprep.subr.bf16.mxu1 %v10706_v3  ;;  %v1610_v52 = vand.u32 4294901760, %v1609_v51  ;;  %v1521_v51 = vsel %vm140_vm4, %v1520_v10, %v1507_v32 }
 0x322   :  { %7824 = vmatmul.mubr.f32.vlgmr.msra.gmra.mrb[6].mxu0 %v1610_v52  ;;  %v1496_v52 = vld [vmem:[%s1495_s29] sm:$0x1]  ;;  %s2876_s29 = scalar_lea.vmem [#allocation6], %s6424_s22  ;;  %s6438_s22 = sld [smem:[#allocation2 + $0x106]] }
 0x323   :  { %9599 = vmatpush3.bf16.msra.mxu0 %v10967_v15  ;;  %9629 = vmatpush3.bf16.msra.mxu1 %v10812_v18 }
 0x324   :  { %9600 = vmatprep.subr.bf16.mxu0 %v10706_v3  ;;  %9630 = vmatprep.subr.bf16.mxu1 %v10706_v3 }
 0x325   :  { %7893 = vmatprep.mubr.msk.f32.mxu0 %vm10707_vm0, %v10708_v8 }
 0x327   :  { %9602 = vmatpush3.bf16.msra.mxu0 %v10974_v20  ;;  %9632 = vmatpush3.bf16.msra.mxu1 %v10818_v30 }
 0x328   :  { %9603 = vmatprep.subr.bf16.mxu0 %v10706_v3  ;;  %9633 = vmatprep.subr.bf16.mxu1 %v10706_v3 }
 0x32b   :  { %9605 = vmatpush3.bf16.msra.mxu0 %v10982_v38  ;;  %9635 = vmatpush3.bf16.msra.mxu1 %v10830_v41 }
 0x32c   :  { %9606 = vmatprep.subr.bf16.mxu0 %v10706_v3  ;;  %9636 = vmatprep.subr.bf16.mxu1 %v10706_v3 }
 0x32f   :  { %9608 = vmatpush3.bf16.msra.mxu0 %v10988_v39  ;;  %9638 = vmatpush3.bf16.msra.mxu1 %v10834_v42 }
 0x330   :  { %9609 = vmatprep.subr.bf16.mxu0 %v10706_v3  ;;  %9639 = vmatprep.subr.bf16.mxu1 %v10706_v3 }
 0x333   :  { %9611 = vmatpush3.bf16.msra.mxu0 %v10994_v40  ;;  %9641 = vmatpush3.bf16.msra.mxu1 %v10836_v43 }
 0x334   :  { %9612 = vmatprep.subr.bf16.mxu0 %v10706_v3  ;;  %9642 = vmatprep.subr.bf16.mxu1 %v10706_v3 }
 0x337   :  { %9614 = vmatpush3.bf16.msra.mxu0 %v11000_v47  ;;  %9644 = vmatpush3.bf16.msra.mxu1 %v10838_v44 }
 0x338   :  { %9615 = vmatprep.subr.bf16.mxu0 %v10706_v3  ;;  %9669 = vmatprep.subr.bf16.mxu1 %v10706_v3 }
 0x33a   :  { %7929 = vmatmul.mubr.f32.vlgmr.msra.gmra.mrb[20].mxu1 %v1608_v33 }
 0x33b   :  { %9617 = vmatpush3.bf16.msra.mxu0 %v11006_v48  ;;  %9671 = vmatpush3.bf16.msra.mxu1 %v10803_v12 }
 0x33c   :  { %9618 = vmatprep.subr.bf16.mxu0 %v10706_v3  ;;  %9672 = vmatprep.subr.bf16.mxu1 %v10706_v3 }
 0x33d   :  { %7998 = vmatprep.mubr.msk.f32.mxu1 %vm10707_vm0, %v10708_v8 }
 0x33f   :  { %9620 = vmatpush3.bf16.msra.mxu0 %v11012_v50  ;;  %9674 = vmatpush3.bf16.msra.mxu1 %v10806_v13 }
 0x340   :  { %9645 = vmatprep.subr.bf16.mxu0 %v10706_v3  ;;  %9675 = vmatprep.subr.bf16.mxu1 %v10706_v3 }
 0x342   :  { %7894 = vmatmul.mubr.f32.vlgmr.msra.gmra.mrb[8].mxu0 %v1607_v14  ;;  %v1510_v14 = vrot.slane %v1490_v29, 3 }
 0x343   :  { %9647 = vmatpush3.bf16.msra.mxu0 %v10893_v16  ;;  %9677 = vmatpush3.bf16.msra.mxu1 %v10812_v18 }
 0x344   :  { %9648 = vmatprep.subr.bf16.mxu0 %v10706_v3  ;;  %9678 = vmatprep.subr.bf16.mxu1 %v10706_v3 }
 0x345   :  { %7963 = vmatprep.mubr.msk.f32.mxu0 %vm10707_vm0, %v10708_v8 }
 0x347   :  { %9650 = vmatpush3.bf16.msra.mxu0 %v10895_v17  ;;  %9680 = vmatpush3.bf16.msra.mxu1 %v10818_v30 }
 0x348   :  { %9651 = vmatprep.subr.bf16.mxu0 %v10706_v3  ;;  %9681 = vmatprep.subr.bf16.mxu1 %v10706_v3 }
 0x34b   :  { %9653 = vmatpush3.bf16.msra.mxu0 %v10897_v19  ;;  %9683 = vmatpush3.bf16.msra.mxu1 %v10830_v41 }
 0x34c   :  { %9654 = vmatprep.subr.bf16.mxu0 %v10706_v3  ;;  %9684 = vmatprep.subr.bf16.mxu1 %v10706_v3 }
 0x34f   :  { %9656 = vmatpush3.bf16.msra.mxu0 %v10900_v21  ;;  %9686 = vmatpush3.bf16.msra.mxu1 %v10834_v42 }
 0x350   :  { %9657 = vmatprep.subr.bf16.mxu0 %v10706_v3  ;;  %9687 = vmatprep.subr.bf16.mxu1 %v10706_v3 }
 0x353   :  { %9659 = vmatpush3.bf16.msra.mxu0 %v10902_v22  ;;  %9689 = vmatpush3.bf16.msra.mxu1 %v10836_v43 }
 0x354   :  { %9660 = vmatprep.subr.bf16.mxu0 %v10706_v3  ;;  %9690 = vmatprep.subr.bf16.mxu1 %v10706_v3 }
 0x357   :  { %9662 = vmatpush3.bf16.msra.mxu0 %v10904_v23  ;;  %9692 = vmatpush3.bf16.msra.mxu1 %v10838_v44 }
 0x358   :  { %9663 = vmatprep.subr.bf16.mxu0 %v10706_v3  ;;  %9717 = vmatprep.subr.bf16.mxu1 %v10706_v3 }
 0x35a   :  { %7999 = vmatmul.mubr.f32.vlgmr.msra.gmra.mrb[22].mxu1 %v11221_v35 }
 0x35b   :  { %9665 = vmatpush3.bf16.msra.mxu0 %v10908_v27  ;;  %9719 = vmatpush3.bf16.msra.mxu1 %v10917_v31 }
 0x35c   :  { %9666 = vmatprep.subr.bf16.mxu0 %v10706_v3  ;;  %9720 = vmatprep.subr.bf16.mxu1 %v10706_v3 }
 0x35d   :  { %8068 = vmatprep.mubr.msk.f32.mxu1 %vm10707_vm0, %v10708_v8 }
 0x35f   :  { %9668 = vmatpush3.bf16.msra.mxu0 %v10912_v28  ;;  %9722 = vmatpush3.bf16.msra.mxu1 %v10927_v37 }
 0x360   :  { %9693 = vmatprep.subr.bf16.mxu0 %v10706_v3  ;;  %9723 = vmatprep.subr.bf16.mxu1 %v10706_v3 }
 0x362   :  { %7964 = vmatmul.mubr.f32.vlgmr.msra.gmra.mrb[10].mxu0 %v11221_v35  ;;  %v1493_v35 = vld [vmem:[%s1492_s28] sm:$0x1]  ;;  %s6427_s28 = sld [smem:[#allocation2 + $0x384]] }
 0x363   :  { %9695 = vmatpush3.bf16.msra.mxu0 %v10803_v12  ;;  %9725 = vmatpush3.bf16.msra.mxu1 %v10933_v60 }
 0x364   :  { %9696 = vmatprep.subr.bf16.mxu0 %v10706_v3  ;;  %9726 = vmatprep.subr.bf16.mxu1 %v10706_v3 }
 0x365   :  { %8033 = vmatprep.mubr.msk.f32.mxu0 %vm10707_vm0, %v10708_v8 }
 0x367   :  { %9698 = vmatpush3.bf16.msra.mxu0 %v10806_v13  ;;  %9728 = vmatpush3.bf16.msra.mxu1 %v10938_v0 }
 0x368   :  { %9699 = vmatprep.subr.bf16.mxu0 %v10706_v3  ;;  %9729 = vmatprep.subr.bf16.mxu1 %v10706_v3  ;;  %s2885_s9 = scalar_lea.vmem [#allocation6], %s6427_s28 }
 0x36b   :  { %9701 = vmatpush3.bf16.msra.mxu0 %v10812_v18  ;;  %9731 = vmatpush3.bf16.msra.mxu1 %v10946_v6 }
 0x36c   :  { %9702 = vmatprep.subr.bf16.mxu0 %v10706_v3  ;;  %9732 = vmatprep.subr.bf16.mxu1 %v10706_v3 }
 0x36f   :  { %9704 = vmatpush3.bf16.msra.mxu0 %v10818_v30  ;;  %9734 = vmatpush3.bf16.msra.mxu1 %v10951_v9 }
 0x370   :  { %9705 = vmatprep.subr.bf16.mxu0 %v10706_v3  ;;  %9735 = vmatprep.subr.bf16.mxu1 %v10706_v3 }
 0x373   :  { %9707 = vmatpush3.bf16.msra.mxu0 %v10830_v41  ;;  %9737 = vmatpush3.bf16.msra.mxu1 %v10957_v34 }
 0x374   :  { %9708 = vmatprep.subr.bf16.mxu0 %v10706_v3  ;;  %9738 = vmatprep.subr.bf16.mxu1 %v10706_v3 }
 0x377   :  { %9710 = vmatpush3.bf16.msra.mxu0 %v10834_v42  ;;  %9740 = vmatpush3.bf16.msra.mxu1 %v10961_v36 }
 0x378   :  { %9711 = vmatprep.subr.bf16.mxu0 %v10706_v3  ;;  %9765 = vmatprep.subr.bf16.mxu1 %v10706_v3 }
 0x37b   :  { %9713 = vmatpush3.bf16.msra.mxu0 %v10836_v43 }
 0x37c   :  { %9714 = vmatprep.subr.bf16.mxu0 %v10706_v3 }
 0x37f   :  { %9716 = vmatpush3.bf16.msra.mxu0 %v10838_v44 }
 0x380   :  { %9741 = vmatprep.subr.bf16.mxu0 %v10706_v3 }
 0x3ed   :  { %v1763_v53 = vpop.f32.mrb[18].mxu1 }
 0x3ee   :  { %v7860_v54 = vpop.f32.mrb[19].mxu1 }
 0x3ef   :  { %v1522_v54 = vsel %vm142_vm5, %v1521_v51, %v1510_v14  ;;  %v2176_v51 = vld [vmem:[%s2175_s14] sm:$0x1]  ;;  %s6432_s14 = sld [smem:[#allocation2 + $0x205]] }
 0x3f5   :  { %v1612_v55 = vpop.f32.mrb[6].mxu0 }
 0x3f6   :  { %v1764_v56 = vadd.f32 %v1763_v53, %v1612_v55  ;;  %v7825_v57 = vpop.f32.mrb[7].mxu0  ;;  %v1513_v53 = vrot.slane %v1493_v35, 2  ;;  %v1516_v55 = vrot.slane %v1496_v52, 1 }
 0x40d   :  { %v1956_v58 = vpop.f32.mrb[20].mxu1 }
 0x40e   :  { %v7930_v62 = vpop.f32.mrb[21].mxu1 }
 0x415   :  { %v1867_v2 = vpop.f32.mrb[8].mxu0 }
 0x416   :  { %v1868_v45 = vadd.f32 %v1867_v2, %v1764_v56  ;;  %v7895_v46 = vpop.f32.mrb[9].mxu0  ;;  %v1523_v56 = vsel %vm144_vm6, %v1522_v54, %v1513_v53  ;;  %v2170_v53 = vld [vmem:[%s2169_s1] sm:$0x1]  ;;  %s3562_s1 = scalar_lea.vmem [#allocation6], %s6429_s10  ;;  %s4269_s10 = scalar_lea.vmem [#allocation6], %s6441_s0 }
 0x417   :  { %v1524_v2 = vsel %vm146_vm7, %v1523_v56, %v1516_v55  ;;  %v2179_v54 = vld [vmem:[%s2178_s3] sm:$0x1]  ;;  %v2196_v55 = vrot.slane %v2176_v51, 6  ;;  %s3565_s3 = scalar_lea.vmem [#allocation6], %s6430_s11 }
 0x418   :  { %v1957_v59 = vadd.f32 %v1956_v58, %v1868_v45 }
 0x42d   :  { %v2162_v11 = vpop.f32.mrb[22].mxu1 }
 0x42e   :  { %v8000_v33 = vpop.f32.mrb[23].mxu1 }
 0x42f   :  { %v2173_v33 = vld [vmem:[%s2172_s12] sm:$0x1]  ;;  %s6428_s12 = sld [smem:[#allocation2 + $0x5]] }
 0x430   :  { %v2193_v52 = vrot.slane %v2173_v33, 7 }
 0x432   :  { %v2213_v56 = vsel %vm134_vm1, %v2170_v53, %v2193_v52 }
 0x435   :  { %v2075_v57 = vpop.f32.mrb[10].mxu0  ;;  %s3559_s30 = scalar_lea.vmem [#allocation6], %s6428_s12 }
 0x436   :  { %v2076_v58 = vadd.f32 %v2075_v57, %v1957_v59  ;;  %v7965_v62 = vpop.f32.mrb[11].mxu0  ;;  %v2182_v57 = vld [vmem:[%s2181_s6] sm:$0x1]  ;;  %s6434_s6 = sld [smem:[#allocation2 + $0x305]] }
 0x437   :  { %v2214_v62 = vsel %vm136_vm2, %v2213_v56, %v2196_v55 }
 0x438   :  { %v2163_v45 = vadd.f32 %v2162_v11, %v2076_v58  ;;  %v2199_v58 = vrot.slane %v2179_v54, 5 }
 0x43a   :  { %v2166_v46 = vadd.f32 %v2163_v45, %v1524_v2  ;;  %v2185_v2 = vld [vmem:[%s2184_s15] sm:$0x1]  ;;  %v2202_v45 = vrot.slane %v2182_v57, 4  ;;  %s3568_s15 = scalar_lea.vmem [#allocation6], %s6431_s13  ;;  %s6445_s13 = sld [smem:[#allocation2 + $0x87]] }
 0x43c   :  { %10582 = vtanh.f32 %v2166_v46  ;;  %v2215_v46 = vsel %vm138_vm3, %v2214_v62, %v2199_v58  ;;  %s3577_s2 = scalar_lea.vmem [#allocation6], %s6434_s6  ;;  %s6449_s6 = sld [smem:[#allocation2 + $0x287]] }
 0x446   :  { %v10583_v61 = vpop.eup %10582 }
 0x447   :  { %v11342_v63 = vand.u32 4294901760, %v10583_v61 }
 0x449   :  { %8069 = vmatmul.mubr.f32.vlgmr.msra.gmra.mrb[24].mxu1 %v11342_v63  ;;  %v2302_v49 = vsub.f32 %v10583_v61, %v11342_v63 }
 0x44a   :  { %9767 = vmatpush3.bf16.msra.mxu1 %v10803_v12  ;;  %8138 = vmatprep.mubr.msk.f32.mxu1 %vm10707_vm0, %v10708_v8 }
 0x44b   :  { %9768 = vmatprep.subr.bf16.mxu1 %v10706_v3  ;;  %v2303_v59 = vand.u32 4294901760, %v2302_v49 }
 0x44d   :  { %v2304_v1 = vsub.f32 %v2302_v49, %v2303_v59 }
 0x44e   :  { %9770 = vmatpush3.bf16.msra.mxu1 %v10806_v13 }
 0x44f   :  { %9771 = vmatprep.subr.bf16.mxu1 %v10706_v3  ;;  %v2305_v4 = vand.u32 4294901760, %v2304_v1  ;;  %v2216_v1 = vsel %vm140_vm4, %v2215_v46, %v2202_v45 }
 0x451   :  { %8034 = vmatmul.mubr.f32.vlgmr.msra.gmra.mrb[12].mxu0 %v2305_v4  ;;  %v2191_v4 = vld [vmem:[%s2190_s17] sm:$0x1]  ;;  %s3571_s17 = scalar_lea.vmem [#allocation6], %s6432_s14  ;;  %s6446_s14 = sld [smem:[#allocation2 + $0x107]] }
 0x452   :  { %9743 = vmatpush3.bf16.msra.mxu0 %v10967_v15  ;;  %9773 = vmatpush3.bf16.msra.mxu1 %v10812_v18 }
 0x453   :  { %9744 = vmatprep.subr.bf16.mxu0 %v10706_v3  ;;  %9774 = vmatprep.subr.bf16.mxu1 %v10706_v3 }
 0x454   :  { %8103 = vmatprep.mubr.msk.f32.mxu0 %vm10707_vm0, %v10708_v8 }
 0x456   :  { %9746 = vmatpush3.bf16.msra.mxu0 %v10974_v20  ;;  %9776 = vmatpush3.bf16.msra.mxu1 %v10818_v30 }
 0x457   :  { %9747 = vmatprep.subr.bf16.mxu0 %v10706_v3  ;;  %9777 = vmatprep.subr.bf16.mxu1 %v10706_v3 }
 0x45a   :  { %9749 = vmatpush3.bf16.msra.mxu0 %v10982_v38  ;;  %9779 = vmatpush3.bf16.msra.mxu1 %v10830_v41 }
 0x45b   :  { %9750 = vmatprep.subr.bf16.mxu0 %v10706_v3  ;;  %9780 = vmatprep.subr.bf16.mxu1 %v10706_v3 }
 0x45e   :  { %9752 = vmatpush3.bf16.msra.mxu0 %v10988_v39  ;;  %9782 = vmatpush3.bf16.msra.mxu1 %v10834_v42 }
 0x45f   :  { %9753 = vmatprep.subr.bf16.mxu0 %v10706_v3  ;;  %9783 = vmatprep.subr.bf16.mxu1 %v10706_v3 }
 0x462   :  { %9755 = vmatpush3.bf16.msra.mxu0 %v10994_v40  ;;  %9785 = vmatpush3.bf16.msra.mxu1 %v10836_v43 }
 0x463   :  { %9756 = vmatprep.subr.bf16.mxu0 %v10706_v3  ;;  %9786 = vmatprep.subr.bf16.mxu1 %v10706_v3 }
 0x466   :  { %9758 = vmatpush3.bf16.msra.mxu0 %v11000_v47  ;;  %9788 = vmatpush3.bf16.msra.mxu1 %v10838_v44 }
 0x467   :  { %9759 = vmatprep.subr.bf16.mxu0 %v10706_v3  ;;  %9813 = vmatprep.subr.bf16.mxu1 %v10706_v3 }
 0x469   :  { %8139 = vmatmul.mubr.f32.vlgmr.msra.gmra.mrb[26].mxu1 %v2303_v59 }
 0x46a   :  { %9761 = vmatpush3.bf16.msra.mxu0 %v11006_v48  ;;  %9815 = vmatpush3.bf16.msra.mxu1 %v10803_v12 }
 0x46b   :  { %9762 = vmatprep.subr.bf16.mxu0 %v10706_v3  ;;  %9816 = vmatprep.subr.bf16.mxu1 %v10706_v3 }
 0x46c   :  { %8208 = vmatprep.mubr.msk.f32.mxu1 %vm10707_vm0, %v10708_v8 }
 0x46e   :  { %9764 = vmatpush3.bf16.msra.mxu0 %v11012_v50  ;;  %9818 = vmatpush3.bf16.msra.mxu1 %v10806_v13 }
 0x46f   :  { %9789 = vmatprep.subr.bf16.mxu0 %v10706_v3  ;;  %9819 = vmatprep.subr.bf16.mxu1 %v10706_v3 }
 0x471   :  { %8104 = vmatmul.mubr.f32.vlgmr.msra.gmra.mrb[14].mxu0 %v2302_v49  ;;  %v2205_v49 = vrot.slane %v2185_v2, 3 }
 0x472   :  { %9791 = vmatpush3.bf16.msra.mxu0 %v10893_v16  ;;  %9821 = vmatpush3.bf16.msra.mxu1 %v10812_v18 }
 0x473   :  { %9792 = vmatprep.subr.bf16.mxu0 %v10706_v3  ;;  %9822 = vmatprep.subr.bf16.mxu1 %v10706_v3 }
 0x474   :  { %8173 = vmatprep.mubr.msk.f32.mxu0 %vm10707_vm0, %v10708_v8 }
 0x476   :  { %9794 = vmatpush3.bf16.msra.mxu0 %v10895_v17  ;;  %9824 = vmatpush3.bf16.msra.mxu1 %v10818_v30 }
 0x477   :  { %9795 = vmatprep.subr.bf16.mxu0 %v10706_v3  ;;  %9825 = vmatprep.subr.bf16.mxu1 %v10706_v3 }
 0x47a   :  { %9797 = vmatpush3.bf16.msra.mxu0 %v10897_v19  ;;  %9827 = vmatpush3.bf16.msra.mxu1 %v10830_v41 }
 0x47b   :  { %9798 = vmatprep.subr.bf16.mxu0 %v10706_v3  ;;  %9828 = vmatprep.subr.bf16.mxu1 %v10706_v3 }
 0x47e   :  { %9800 = vmatpush3.bf16.msra.mxu0 %v10900_v21  ;;  %9830 = vmatpush3.bf16.msra.mxu1 %v10834_v42 }
 0x47f   :  { %9801 = vmatprep.subr.bf16.mxu0 %v10706_v3  ;;  %9831 = vmatprep.subr.bf16.mxu1 %v10706_v3 }
 0x482   :  { %9803 = vmatpush3.bf16.msra.mxu0 %v10902_v22  ;;  %9833 = vmatpush3.bf16.msra.mxu1 %v10836_v43 }
 0x483   :  { %9804 = vmatprep.subr.bf16.mxu0 %v10706_v3  ;;  %9834 = vmatprep.subr.bf16.mxu1 %v10706_v3 }
 0x486   :  { %9806 = vmatpush3.bf16.msra.mxu0 %v10904_v23  ;;  %9836 = vmatpush3.bf16.msra.mxu1 %v10838_v44 }
 0x487   :  { %9807 = vmatprep.subr.bf16.mxu0 %v10706_v3  ;;  %9861 = vmatprep.subr.bf16.mxu1 %v10706_v3 }
 0x489   :  { %8209 = vmatmul.mubr.f32.vlgmr.msra.gmra.mrb[28].mxu1 %v11342_v63 }
 0x48a   :  { %9809 = vmatpush3.bf16.msra.mxu0 %v10908_v27  ;;  %9863 = vmatpush3.bf16.msra.mxu1 %v10917_v31 }
 0x48b   :  { %9810 = vmatprep.subr.bf16.mxu0 %v10706_v3  ;;  %9864 = vmatprep.subr.bf16.mxu1 %v10706_v3 }
 0x48c   :  { %8278 = vmatprep.mubr.msk.f32.mxu1 %vm10707_vm0, %v10708_v8 }
 0x48e   :  { %9812 = vmatpush3.bf16.msra.mxu0 %v10912_v28  ;;  %9866 = vmatpush3.bf16.msra.mxu1 %v10927_v37 }
 0x48f   :  { %9837 = vmatprep.subr.bf16.mxu0 %v10706_v3  ;;  %9867 = vmatprep.subr.bf16.mxu1 %v10706_v3 }
 0x491   :  { %8174 = vmatmul.mubr.f32.vlgmr.msra.gmra.mrb[16].mxu0 %v11342_v63  ;;  %v2188_v63 = vld [vmem:[%s2187_s16] sm:$0x1]  ;;  %s6435_s16 = sld [smem:[#allocation2 + $0x385]] }
 0x492   :  { %9839 = vmatpush3.bf16.msra.mxu0 %v10803_v12  ;;  %9869 = vmatpush3.bf16.msra.mxu1 %v10933_v60 }
 0x493   :  { %9840 = vmatprep.subr.bf16.mxu0 %v10706_v3  ;;  %9870 = vmatprep.subr.bf16.mxu1 %v10706_v3 }
 0x494   :  { %8243 = vmatprep.mubr.msk.f32.mxu0 %vm10707_vm0, %v10708_v8 }
 0x496   :  { %9842 = vmatpush3.bf16.msra.mxu0 %v10806_v13  ;;  %9872 = vmatpush3.bf16.msra.mxu1 %v10938_v0 }
 0x497   :  { %9843 = vmatprep.subr.bf16.mxu0 %v10706_v3  ;;  %9873 = vmatprep.subr.bf16.mxu1 %v10706_v3  ;;  %s3580_s19 = scalar_lea.vmem [#allocation6], %s6435_s16 }
 0x49a   :  { %9845 = vmatpush3.bf16.msra.mxu0 %v10812_v18  ;;  %9875 = vmatpush3.bf16.msra.mxu1 %v10946_v6 }
 0x49b   :  { %9846 = vmatprep.subr.bf16.mxu0 %v10706_v3  ;;  %9876 = vmatprep.subr.bf16.mxu1 %v10706_v3 }
 0x49e   :  { %9848 = vmatpush3.bf16.msra.mxu0 %v10818_v30  ;;  %9878 = vmatpush3.bf16.msra.mxu1 %v10951_v9 }
 0x49f   :  { %9849 = vmatprep.subr.bf16.mxu0 %v10706_v3  ;;  %9879 = vmatprep.subr.bf16.mxu1 %v10706_v3 }
 0x4a2   :  { %9851 = vmatpush3.bf16.msra.mxu0 %v10830_v41  ;;  %9881 = vmatpush3.bf16.msra.mxu1 %v10957_v34 }
 0x4a3   :  { %9852 = vmatprep.subr.bf16.mxu0 %v10706_v3  ;;  %9882 = vmatprep.subr.bf16.mxu1 %v10706_v3 }
 0x4a6   :  { %9854 = vmatpush3.bf16.msra.mxu0 %v10834_v42  ;;  %9884 = vmatpush3.bf16.msra.mxu1 %v10961_v36 }
 0x4a7   :  { %9855 = vmatprep.subr.bf16.mxu0 %v10706_v3  ;;  %9909 = vmatprep.subr.bf16.mxu1 %v10706_v3 }
 0x4aa   :  { %9857 = vmatpush3.bf16.msra.mxu0 %v10836_v43 }
 0x4ab   :  { %9858 = vmatprep.subr.bf16.mxu0 %v10706_v3 }
 0x4ae   :  { %9860 = vmatpush3.bf16.msra.mxu0 %v10838_v44 }
 0x4af   :  { %9885 = vmatprep.subr.bf16.mxu0 %v10706_v3 }
 0x51c   :  { %v2458_v5 = vpop.f32.mrb[24].mxu1 }
 0x51d   :  { %v8070_v24 = vpop.f32.mrb[25].mxu1 }
 0x51e   :  { %v2217_v24 = vsel %vm142_vm5, %v2216_v1, %v2205_v49  ;;  %v2871_v1 = vld [vmem:[%s2870_s25] sm:$0x1]  ;;  %s6440_s25 = sld [smem:[#allocation2 + $0x206]] }
 0x524   :  { %v2307_v25 = vpop.f32.mrb[12].mxu0 }
 0x525   :  { %v2459_v7 = vadd.f32 %v2458_v5, %v2307_v25  ;;  %v8035_v26 = vpop.f32.mrb[13].mxu0  ;;  %v2208_v5 = vrot.slane %v2188_v63, 2  ;;  %v2211_v25 = vrot.slane %v2191_v4, 1 }
 0x53c   :  { %v2651_v29 = vpop.f32.mrb[26].mxu1 }
 0x53d   :  { %v8140_v32 = vpop.f32.mrb[27].mxu1 }
 0x544   :  { %v2562_v10 = vpop.f32.mrb[14].mxu0 }
 0x545   :  { %v2563_v11 = vadd.f32 %v2562_v10, %v2459_v7  ;;  %v8105_v35 = vpop.f32.mrb[15].mxu0  ;;  %v2218_v7 = vsel %vm144_vm6, %v2217_v24, %v2208_v5  ;;  %v2865_v5 = vld [vmem:[%s2864_s26] sm:$0x1]  ;;  %s4257_s26 = scalar_lea.vmem [#allocation6], %s6437_s20  ;;  %s4964_s20 = scalar_lea.vmem [#allocation6], %s6449_s6 }
 0x546   :  { %v2219_v10 = vsel %vm146_vm7, %v2218_v7, %v2211_v25  ;;  %v2874_v24 = vld [vmem:[%s2873_s27] sm:$0x1]  ;;  %v2891_v25 = vrot.slane %v2871_v1, 6  ;;  %s4260_s27 = scalar_lea.vmem [#allocation6], %s6438_s22 }
 0x547   :  { %v2652_v14 = vadd.f32 %v2651_v29, %v2563_v11 }
 0x55c   :  { %v2857_v61 = vpop.f32.mrb[28].mxu1 }
 0x55d   :  { %v8210_v59 = vpop.f32.mrb[29].mxu1 }
 0x55e   :  { %v2868_v59 = vld [vmem:[%s2867_s23] sm:$0x1]  ;;  %s6436_s23 = sld [smem:[#allocation2 + $0x6]] }
 0x55f   :  { %v2888_v4 = vrot.slane %v2868_v59, 7 }
 0x561   :  { %v2908_v7 = vsel %vm134_vm1, %v2865_v5, %v2888_v4 }
 0x564   :  { %v2770_v26 = vpop.f32.mrb[16].mxu0  ;;  %s4254_s28 = scalar_lea.vmem [#allocation6], %s6436_s23 }
 0x565   :  { %v2771_v29 = vadd.f32 %v2770_v26, %v2652_v14  ;;  %v8175_v32 = vpop.f32.mrb[17].mxu0  ;;  %v2877_v26 = vld [vmem:[%s2876_s29] sm:$0x1]  ;;  %s6442_s29 = sld [smem:[#allocation2 + $0x306]] }
 0x566   :  { %v2909_v32 = vsel %vm136_vm2, %v2908_v7, %v2891_v25 }
 0x567   :  { %v2858_v11 = vadd.f32 %v2857_v61, %v2771_v29  ;;  %v2894_v29 = vrot.slane %v2874_v24, 5 }
 0x569   :  { %v2861_v35 = vadd.f32 %v2858_v11, %v2219_v10  ;;  %v2880_v10 = vld [vmem:[%s2879_s7] sm:$0x1]  ;;  %v2897_v11 = vrot.slane %v2877_v26, 4  ;;  %s4263_s7 = scalar_lea.vmem [#allocation6], %s6439_s24 }
 0x56b   :  { %10584 = vtanh.f32 %v2861_v35  ;;  %v2910_v35 = vsel %vm138_vm3, %v2909_v32, %v2894_v29  ;;  %s4272_s11 = scalar_lea.vmem [#allocation6], %s6442_s29 }
 0x575   :  { %v10585_v33 = vpop.eup %10584 }
 0x576   :  { %v11463_v51 = vand.u32 4294901760, %v10585_v33 }
 0x578   :  { %8279 = vmatmul.mubr.f32.vlgmr.msra.gmra.mrb[30].mxu1 %v11463_v51  ;;  %v2997_v52 = vsub.f32 %v10585_v33, %v11463_v51 }
 0x579   :  { %9911 = vmatpush3.bf16.msra.mxu1 %v10803_v12  ;;  %8348 = vmatprep.mubr.msk.f32.mxu1 %vm10707_vm0, %v10708_v8 }
 0x57a   :  { %9912 = vmatprep.subr.bf16.mxu1 %v10706_v3  ;;  %v2998_v14 = vand.u32 4294901760, %v2997_v52 }
 0x57c   :  { %v2999_v53 = vsub.f32 %v2997_v52, %v2998_v14 }
 0x57d   :  { %9914 = vmatpush3.bf16.msra.mxu1 %v10806_v13 }
 0x57e   :  { %9915 = vmatprep.subr.bf16.mxu1 %v10706_v3  ;;  %v3000_v54 = vand.u32 4294901760, %v2999_v53  ;;  %v2911_v53 = vsel %vm140_vm4, %v2910_v35, %v2897_v11 }
 0x580   :  { %8244 = vmatmul.mubr.f32.vlgmr.msra.gmra.mrb[18].mxu0 %v3000_v54  ;;  %v2886_v54 = vld [vmem:[%s2885_s9] sm:$0x1]  ;;  %s4266_s9 = scalar_lea.vmem [#allocation6], %s6440_s25 }
 0x581   :  { %9887 = vmatpush3.bf16.msra.mxu0 %v10967_v15  ;;  %9917 = vmatpush3.bf16.msra.mxu1 %v10812_v18 }
 0x582   :  { %9888 = vmatprep.subr.bf16.mxu0 %v10706_v3  ;;  %9918 = vmatprep.subr.bf16.mxu1 %v10706_v3 }
 0x583   :  { %8313 = vmatprep.mubr.msk.f32.mxu0 %vm10707_vm0, %v10708_v8 }
 0x585   :  { %9890 = vmatpush3.bf16.msra.mxu0 %v10974_v20  ;;  %9920 = vmatpush3.bf16.msra.mxu1 %v10818_v30 }
 0x586   :  { %9891 = vmatprep.subr.bf16.mxu0 %v10706_v3  ;;  %9921 = vmatprep.subr.bf16.mxu1 %v10706_v3 }
 0x589   :  { %9893 = vmatpush3.bf16.msra.mxu0 %v10982_v38  ;;  %9923 = vmatpush3.bf16.msra.mxu1 %v10830_v41 }
 0x58a   :  { %9894 = vmatprep.subr.bf16.mxu0 %v10706_v3  ;;  %9924 = vmatprep.subr.bf16.mxu1 %v10706_v3 }
 0x58d   :  { %9896 = vmatpush3.bf16.msra.mxu0 %v10988_v39  ;;  %9926 = vmatpush3.bf16.msra.mxu1 %v10834_v42 }
 0x58e   :  { %9897 = vmatprep.subr.bf16.mxu0 %v10706_v3  ;;  %9927 = vmatprep.subr.bf16.mxu1 %v10706_v3 }
 0x591   :  { %9899 = vmatpush3.bf16.msra.mxu0 %v10994_v40  ;;  %9929 = vmatpush3.bf16.msra.mxu1 %v10836_v43 }
 0x592   :  { %9900 = vmatprep.subr.bf16.mxu0 %v10706_v3  ;;  %9930 = vmatprep.subr.bf16.mxu1 %v10706_v3 }
 0x595   :  { %9902 = vmatpush3.bf16.msra.mxu0 %v11000_v47  ;;  %9932 = vmatpush3.bf16.msra.mxu1 %v10838_v44 }
 0x596   :  { %9903 = vmatprep.subr.bf16.mxu0 %v10706_v3  ;;  %9957 = vmatprep.subr.bf16.mxu1 %v10706_v3 }
 0x598   :  { %8349 = vmatmul.mubr.f32.vlgmr.msra.gmra.mrb[32].mxu1 %v2998_v14 }
 0x599   :  { %9905 = vmatpush3.bf16.msra.mxu0 %v11006_v48  ;;  %9959 = vmatpush3.bf16.msra.mxu1 %v10803_v12 }
 0x59a   :  { %9906 = vmatprep.subr.bf16.mxu0 %v10706_v3  ;;  %9960 = vmatprep.subr.bf16.mxu1 %v10706_v3 }
 0x59b   :  { %8418 = vmatprep.mubr.msk.f32.mxu1 %vm10707_vm0, %v10708_v8 }
 0x59d   :  { %9908 = vmatpush3.bf16.msra.mxu0 %v11012_v50  ;;  %9962 = vmatpush3.bf16.msra.mxu1 %v10806_v13 }
 0x59e   :  { %9933 = vmatprep.subr.bf16.mxu0 %v10706_v3  ;;  %9963 = vmatprep.subr.bf16.mxu1 %v10706_v3 }
 0x5a0   :  { %8314 = vmatmul.mubr.f32.vlgmr.msra.gmra.mrb[20].mxu0 %v2997_v52  ;;  %v2900_v52 = vrot.slane %v2880_v10, 3 }
 0x5a1   :  { %9935 = vmatpush3.bf16.msra.mxu0 %v10893_v16  ;;  %9965 = vmatpush3.bf16.msra.mxu1 %v10812_v18 }
 0x5a2   :  { %9936 = vmatprep.subr.bf16.mxu0 %v10706_v3  ;;  %9966 = vmatprep.subr.bf16.mxu1 %v10706_v3 }
 0x5a3   :  { %8383 = vmatprep.mubr.msk.f32.mxu0 %vm10707_vm0, %v10708_v8 }
 0x5a5   :  { %9938 = vmatpush3.bf16.msra.mxu0 %v10895_v17  ;;  %9968 = vmatpush3.bf16.msra.mxu1 %v10818_v30 }
 0x5a6   :  { %9939 = vmatprep.subr.bf16.mxu0 %v10706_v3  ;;  %9969 = vmatprep.subr.bf16.mxu1 %v10706_v3 }
 0x5a9   :  { %9941 = vmatpush3.bf16.msra.mxu0 %v10897_v19  ;;  %9971 = vmatpush3.bf16.msra.mxu1 %v10830_v41 }
 0x5aa   :  { %9942 = vmatprep.subr.bf16.mxu0 %v10706_v3  ;;  %9972 = vmatprep.subr.bf16.mxu1 %v10706_v3 }
 0x5ad   :  { %9944 = vmatpush3.bf16.msra.mxu0 %v10900_v21  ;;  %9974 = vmatpush3.bf16.msra.mxu1 %v10834_v42 }
 0x5ae   :  { %9945 = vmatprep.subr.bf16.mxu0 %v10706_v3  ;;  %9975 = vmatprep.subr.bf16.mxu1 %v10706_v3 }
 0x5b1   :  { %9947 = vmatpush3.bf16.msra.mxu0 %v10902_v22  ;;  %9977 = vmatpush3.bf16.msra.mxu1 %v10836_v43 }
 0x5b2   :  { %9948 = vmatprep.subr.bf16.mxu0 %v10706_v3  ;;  %9978 = vmatprep.subr.bf16.mxu1 %v10706_v3 }
 0x5b5   :  { %9950 = vmatpush3.bf16.msra.mxu0 %v10904_v23  ;;  %9980 = vmatpush3.bf16.msra.mxu1 %v10838_v44 }
 0x5b6   :  { %9951 = vmatprep.subr.bf16.mxu0 %v10706_v3  ;;  %10005 = vmatprep.subr.bf16.mxu1 %v10706_v3 }
 0x5b8   :  { %8419 = vmatmul.mubr.f32.vlgmr.msra.gmra.mrb[34].mxu1 %v11463_v51 }
 0x5b9   :  { %9953 = vmatpush3.bf16.msra.mxu0 %v10908_v27  ;;  %10007 = vmatpush3.bf16.msra.mxu1 %v10917_v31 }
 0x5ba   :  { %9954 = vmatprep.subr.bf16.mxu0 %v10706_v3  ;;  %10008 = vmatprep.subr.bf16.mxu1 %v10706_v3 }
 0x5bb   :  { %8488 = vmatprep.mubr.msk.f32.mxu1 %vm10707_vm0, %v10708_v8 }
 0x5bd   :  { %9956 = vmatpush3.bf16.msra.mxu0 %v10912_v28  ;;  %10010 = vmatpush3.bf16.msra.mxu1 %v10927_v37 }
 0x5be   :  { %9981 = vmatprep.subr.bf16.mxu0 %v10706_v3  ;;  %10011 = vmatprep.subr.bf16.mxu1 %v10706_v3 }
 0x5c0   :  { %8384 = vmatmul.mubr.f32.vlgmr.msra.gmra.mrb[22].mxu0 %v11463_v51  ;;  %v2883_v51 = vld [vmem:[%s2882_s8] sm:$0x1]  ;;  %s6443_s8 = sld [smem:[#allocation2 + $0x386]] }
 0x5c1   :  { %9983 = vmatpush3.bf16.msra.mxu0 %v10803_v12  ;;  %10013 = vmatpush3.bf16.msra.mxu1 %v10933_v60 }
 0x5c2   :  { %9984 = vmatprep.subr.bf16.mxu0 %v10706_v3  ;;  %10014 = vmatprep.subr.bf16.mxu1 %v10706_v3 }
 0x5c3   :  { %8453 = vmatprep.mubr.msk.f32.mxu0 %vm10707_vm0, %v10708_v8 }
 0x5c5   :  { %9986 = vmatpush3.bf16.msra.mxu0 %v10806_v13  ;;  %10016 = vmatpush3.bf16.msra.mxu1 %v10938_v0 }
 0x5c6   :  { %9987 = vmatprep.subr.bf16.mxu0 %v10706_v3  ;;  %10017 = vmatprep.subr.bf16.mxu1 %v10706_v3  ;;  %s4275_s12 = scalar_lea.vmem [#allocation6], %s6443_s8 }
 0x5c9   :  { %9989 = vmatpush3.bf16.msra.mxu0 %v10812_v18  ;;  %10019 = vmatpush3.bf16.msra.mxu1 %v10946_v6 }
 0x5ca   :  { %9990 = vmatprep.subr.bf16.mxu0 %v10706_v3  ;;  %10020 = vmatprep.subr.bf16.mxu1 %v10706_v3 }
 0x5cd   :  { %9992 = vmatpush3.bf16.msra.mxu0 %v10818_v30  ;;  %10022 = vmatpush3.bf16.msra.mxu1 %v10951_v9 }
 0x5ce   :  { %9993 = vmatprep.subr.bf16.mxu0 %v10706_v3  ;;  %10023 = vmatprep.subr.bf16.mxu1 %v10706_v3 }
 0x5d1   :  { %9995 = vmatpush3.bf16.msra.mxu0 %v10830_v41  ;;  %10025 = vmatpush3.bf16.msra.mxu1 %v10957_v34 }
 0x5d2   :  { %9996 = vmatprep.subr.bf16.mxu0 %v10706_v3  ;;  %10026 = vmatprep.subr.bf16.mxu1 %v10706_v3 }
 0x5d5   :  { %9998 = vmatpush3.bf16.msra.mxu0 %v10834_v42  ;;  %10028 = vmatpush3.bf16.msra.mxu1 %v10961_v36 }
 0x5d6   :  { %9999 = vmatprep.subr.bf16.mxu0 %v10706_v3  ;;  %10053 = vmatprep.subr.bf16.mxu1 %v10706_v3 }
 0x5d9   :  { %10001 = vmatpush3.bf16.msra.mxu0 %v10836_v43 }
 0x5da   :  { %10002 = vmatprep.subr.bf16.mxu0 %v10706_v3 }
 0x5dd   :  { %10004 = vmatpush3.bf16.msra.mxu0 %v10838_v44 }
 0x5de   :  { %10029 = vmatprep.subr.bf16.mxu0 %v10706_v3 }
 0x64b   :  { %v3153_v55 = vpop.f32.mrb[30].mxu1 }
 0x64c   :  { %v8280_v56 = vpop.f32.mrb[31].mxu1 }
 0x64d   :  { %v2912_v56 = vsel %vm142_vm5, %v2911_v53, %v2900_v52  ;;  %v3566_v53 = vld [vmem:[%s3565_s3] sm:$0x1]  ;;  %s6448_s3 = sld [smem:[#allocation2 + $0x207]] }
 0x653   :  { %v3002_v57 = vpop.f32.mrb[18].mxu0 }
 0x654   :  { %v3154_v58 = vadd.f32 %v3153_v55, %v3002_v57  ;;  %v8245_v62 = vpop.f32.mrb[19].mxu0  ;;  %v2903_v55 = vrot.slane %v2883_v51, 2  ;;  %v2906_v57 = vrot.slane %v2886_v54, 1 }
 0x66b   :  { %v3346_v2 = vpop.f32.mrb[32].mxu1 }
 0x66c   :  { %v8350_v45 = vpop.f32.mrb[33].mxu1 }
 0x673   :  { %v3257_v46 = vpop.f32.mrb[20].mxu0 }
 0x674   :  { %v3258_v61 = vadd.f32 %v3257_v46, %v3154_v58  ;;  %v8315_v63 = vpop.f32.mrb[21].mxu0  ;;  %v2913_v58 = vsel %vm144_vm6, %v2912_v56, %v2903_v55  ;;  %v3560_v55 = vld [vmem:[%s3559_s30] sm:$0x1]  ;;  %s4952_s30 = scalar_lea.vmem [#allocation6], %s6445_s13 }
 0x675   :  { %v2914_v46 = vsel %vm146_vm7, %v2913_v58, %v2906_v57  ;;  %v3569_v56 = vld [vmem:[%s3568_s15] sm:$0x1]  ;;  %v3586_v57 = vrot.slane %v3566_v53, 6  ;;  %s4955_s15 = scalar_lea.vmem [#allocation6], %s6446_s14 }
 0x676   :  { %v3347_v49 = vadd.f32 %v3346_v2, %v3258_v61 }
 0x68b   :  { %v3552_v33 = vpop.f32.mrb[34].mxu1 }
 0x68c   :  { %v8420_v14 = vpop.f32.mrb[35].mxu1 }
 0x68d   :  { %v3563_v14 = vld [vmem:[%s3562_s1] sm:$0x1]  ;;  %s6444_s1 = sld [smem:[#allocation2 + $0x7]] }
 0x68e   :  { %v3583_v54 = vrot.slane %v3563_v14, 7 }
 0x690   :  { %v3603_v58 = vsel %vm134_vm1, %v3560_v55, %v3583_v54 }
 0x693   :  { %v3465_v62 = vpop.f32.mrb[22].mxu0  ;;  %s4949_s16 = scalar_lea.vmem [#allocation6], %s6444_s1 }
 0x694   :  { %v3466_v2 = vadd.f32 %v3465_v62, %v3347_v49  ;;  %v8385_v45 = vpop.f32.mrb[23].mxu0  ;;  %v3572_v62 = vld [vmem:[%s3571_s17] sm:$0x1]  ;;  %s6450_s17 = sld [smem:[#allocation2 + $0x307]] }
 0x695   :  { %v3604_v45 = vsel %vm136_vm2, %v3603_v58, %v3586_v57 }
 0x696   :  { %v3553_v61 = vadd.f32 %v3552_v33, %v3466_v2  ;;  %v3589_v2 = vrot.slane %v3569_v56, 5 }
 0x698   :  { %v3556_v63 = vadd.f32 %v3553_v61, %v2914_v46  ;;  %v3575_v46 = vld [vmem:[%s3574_s18] sm:$0x1]  ;;  %v3592_v61 = vrot.slane %v3572_v62, 4  ;;  %s4958_s18 = scalar_lea.vmem [#allocation6], %s6447_s21 }
 0x69a   :  { %10586 = vtanh.f32 %v3556_v63  ;;  %v3605_v63 = vsel %vm138_vm3, %v3604_v45, %v3589_v2  ;;  %v4258_v2 = vld [vmem:[%s4257_s26] sm:$0x1]  ;;  %s4967_s22 = scalar_lea.vmem [#allocation6], %s6450_s17  ;;  %s10709_s26 = smov [#allocation10]  }
 0x69b   :  { %v4261_v45 = vld [vmem:[%s4260_s27] sm:$0x1]  ;;  %s6314_s0 = sshll.u32 %s10709_s26, 4  ;;  %s6315_s0 = int_to_ptr.vmem [resolvable:$true] %s6314_s0 }
 0x69c   :  { %s10670_s27 = scalar_lea.vmem %s6315_s0, 128  ;;  %p10675_p0 = scmp.lt.s32.totalorder %s6315_s0, %s6315_s0 }
 0x69d   :  { %p10671_p13 = scmp.ne.s32.totalorder %s6315_s0, %s10670_s27  ;;  %p10676_p1 = scmp.lt.s32.totalorder %s10670_s27, %s10670_s27 }
 0x69f   :  { %p10677_p2 = por %p10676_p1, %p10675_p0 }
 0x6a1   :  { %p10678_p3 = pnand %p10677_p2, %p10671_p13 }
 0x6a4   :  { %v10587_v59 = vpop.eup %10586 }
 0x6a5   :  { %v11584_v1 = vand.u32 4294901760, %v10587_v59 }
 0x6a7   :  { %8489 = vmatmul.mubr.f32.vlgmr.msra.gmra.mrb[36].mxu1 %v11584_v1  ;;  %v3692_v4 = vsub.f32 %v10587_v59, %v11584_v1 }
 0x6a8   :  { %10055 = vmatpush3.bf16.msra.mxu1 %v10803_v12  ;;  %8558 = vmatprep.mubr.msk.f32.mxu1 %vm10707_vm0, %v10708_v8 }
 0x6a9   :  { %10056 = vmatprep.subr.bf16.mxu1 %v10706_v3  ;;  %v3693_v49 = vand.u32 4294901760, %v3692_v4 }
 0x6ab   :  { %v3694_v5 = vsub.f32 %v3692_v4, %v3693_v49 }
 0x6ac   :  { %10058 = vmatpush3.bf16.msra.mxu1 %v10806_v13 }
 0x6ad   :  { %10059 = vmatprep.subr.bf16.mxu1 %v10706_v3  ;;  %v3695_v24 = vand.u32 4294901760, %v3694_v5  ;;  %v3606_v5 = vsel %vm140_vm4, %v3605_v63, %v3592_v61  ;;  %v4255_v61 = vld [vmem:[%s4254_s28] sm:$0x1] }
 0x6ae   :  { %v4264_v63 = vld [vmem:[%s4263_s7] sm:$0x1] }
 0x6af   :  { %8454 = vmatmul.mubr.f32.vlgmr.msra.gmra.mrb[24].mxu0 %v3695_v24  ;;  %v3581_v24 = vld [vmem:[%s3580_s19] sm:$0x1]  ;;  %s4961_s19 = scalar_lea.vmem [#allocation6], %s6448_s3 }
 0x6b0   :  { %10031 = vmatpush3.bf16.msra.mxu0 %v10967_v15  ;;  %10061 = vmatpush3.bf16.msra.mxu1 %v10812_v18 }
 0x6b1   :  { %10032 = vmatprep.subr.bf16.mxu0 %v10706_v3  ;;  %10062 = vmatprep.subr.bf16.mxu1 %v10706_v3 }
 0x6b2   :  { %8523 = vmatprep.mubr.msk.f32.mxu0 %vm10707_vm0, %v10708_v8 }
 0x6b4   :  { %10034 = vmatpush3.bf16.msra.mxu0 %v10974_v20  ;;  %10064 = vmatpush3.bf16.msra.mxu1 %v10818_v30 }
 0x6b5   :  { %10035 = vmatprep.subr.bf16.mxu0 %v10706_v3  ;;  %10065 = vmatprep.subr.bf16.mxu1 %v10706_v3 }
 0x6b8   :  { %10037 = vmatpush3.bf16.msra.mxu0 %v10982_v38  ;;  %10067 = vmatpush3.bf16.msra.mxu1 %v10830_v41 }
 0x6b9   :  { %10038 = vmatprep.subr.bf16.mxu0 %v10706_v3  ;;  %10068 = vmatprep.subr.bf16.mxu1 %v10706_v3 }
 0x6bc   :  { %10040 = vmatpush3.bf16.msra.mxu0 %v10988_v39  ;;  %10070 = vmatpush3.bf16.msra.mxu1 %v10834_v42 }
 0x6bd   :  { %10041 = vmatprep.subr.bf16.mxu0 %v10706_v3  ;;  %10071 = vmatprep.subr.bf16.mxu1 %v10706_v3 }
 0x6c0   :  { %10043 = vmatpush3.bf16.msra.mxu0 %v10994_v40  ;;  %10073 = vmatpush3.bf16.msra.mxu1 %v10836_v43 }
 0x6c1   :  { %10044 = vmatprep.subr.bf16.mxu0 %v10706_v3  ;;  %10074 = vmatprep.subr.bf16.mxu1 %v10706_v3 }
 0x6c4   :  { %10046 = vmatpush3.bf16.msra.mxu0 %v11000_v47  ;;  %10076 = vmatpush3.bf16.msra.mxu1 %v10838_v44 }
 0x6c5   :  { %10047 = vmatprep.subr.bf16.mxu0 %v10706_v3  ;;  %10101 = vmatprep.subr.bf16.mxu1 %v10706_v3 }
 0x6c7   :  { %8559 = vmatmul.mubr.f32.vlgmr.msra.gmra.mrb[38].mxu1 %v3693_v49 }
 0x6c8   :  { %10049 = vmatpush3.bf16.msra.mxu0 %v11006_v48  ;;  %10103 = vmatpush3.bf16.msra.mxu1 %v10803_v12 }
 0x6c9   :  { %10050 = vmatprep.subr.bf16.mxu0 %v10706_v3  ;;  %10104 = vmatprep.subr.bf16.mxu1 %v10706_v3 }
 0x6ca   :  { %8628 = vmatprep.mubr.msk.f32.mxu1 %vm10707_vm0, %v10708_v8 }
 0x6cc   :  { %10052 = vmatpush3.bf16.msra.mxu0 %v11012_v50  ;;  %10106 = vmatpush3.bf16.msra.mxu1 %v10806_v13 }
 0x6cd   :  { %10077 = vmatprep.subr.bf16.mxu0 %v10706_v3  ;;  %10107 = vmatprep.subr.bf16.mxu1 %v10706_v3 }
 0x6cf   :  { %8524 = vmatmul.mubr.f32.vlgmr.msra.gmra.mrb[26].mxu0 %v3692_v4  ;;  %v3595_v4 = vrot.slane %v3575_v46, 3  ;;  %v4278_v46 = vrot.slane %v4258_v2, 7  ;;  %v5653_v2 = vld [vmem:[#allocation9 + $0x50] sm:$0xff] }
 0x6d0   :  { %10079 = vmatpush3.bf16.msra.mxu0 %v10893_v16  ;;  %10109 = vmatpush3.bf16.msra.mxu1 %v10812_v18 }
 0x6d1   :  { %10080 = vmatprep.subr.bf16.mxu0 %v10706_v3  ;;  %10110 = vmatprep.subr.bf16.mxu1 %v10706_v3 }
 0x6d2   :  { %8593 = vmatprep.mubr.msk.f32.mxu0 %vm10707_vm0, %v10708_v8 }
 0x6d4   :  { %10082 = vmatpush3.bf16.msra.mxu0 %v10895_v17  ;;  %10112 = vmatpush3.bf16.msra.mxu1 %v10818_v30 }
 0x6d5   :  { %10083 = vmatprep.subr.bf16.mxu0 %v10706_v3  ;;  %10113 = vmatprep.subr.bf16.mxu1 %v10706_v3 }
 0x6d8   :  { %10085 = vmatpush3.bf16.msra.mxu0 %v10897_v19  ;;  %10115 = vmatpush3.bf16.msra.mxu1 %v10830_v41 }
 0x6d9   :  { %10086 = vmatprep.subr.bf16.mxu0 %v10706_v3  ;;  %10116 = vmatprep.subr.bf16.mxu1 %v10706_v3 }
 0x6dc   :  { %10088 = vmatpush3.bf16.msra.mxu0 %v10900_v21  ;;  %10118 = vmatpush3.bf16.msra.mxu1 %v10834_v42 }
 0x6dd   :  { %10089 = vmatprep.subr.bf16.mxu0 %v10706_v3  ;;  %10119 = vmatprep.subr.bf16.mxu1 %v10706_v3 }
 0x6e0   :  { %10091 = vmatpush3.bf16.msra.mxu0 %v10902_v22  ;;  %10121 = vmatpush3.bf16.msra.mxu1 %v10836_v43 }
 0x6e1   :  { %10092 = vmatprep.subr.bf16.mxu0 %v10706_v3  ;;  %10122 = vmatprep.subr.bf16.mxu1 %v10706_v3 }
 0x6e4   :  { %10094 = vmatpush3.bf16.msra.mxu0 %v10904_v23  ;;  %10124 = vmatpush3.bf16.msra.mxu1 %v10838_v44 }
 0x6e5   :  { %10095 = vmatprep.subr.bf16.mxu0 %v10706_v3  ;;  %10149 = vmatprep.subr.bf16.mxu1 %v10706_v3 }
 0x6e7   :  { %8629 = vmatmul.mubr.f32.vlgmr.msra.gmra.mrb[40].mxu1 %v11584_v1 }
 0x6e8   :  { %10097 = vmatpush3.bf16.msra.mxu0 %v10908_v27  ;;  %10151 = vmatpush3.bf16.msra.mxu1 %v10917_v31 }
 0x6e9   :  { %10098 = vmatprep.subr.bf16.mxu0 %v10706_v3  ;;  %10152 = vmatprep.subr.bf16.mxu1 %v10706_v3 }
 0x6ea   :  { %8698 = vmatprep.mubr.msk.f32.mxu1 %vm10707_vm0, %v10708_v8 }
 0x6ec   :  { %10100 = vmatpush3.bf16.msra.mxu0 %v10912_v28  ;;  %10154 = vmatpush3.bf16.msra.mxu1 %v10927_v37 }
 0x6ed   :  { %10125 = vmatprep.subr.bf16.mxu0 %v10706_v3  ;;  %10155 = vmatprep.subr.bf16.mxu1 %v10706_v3 }
 0x6ef   :  { %8594 = vmatmul.mubr.f32.vlgmr.msra.gmra.mrb[28].mxu0 %v11584_v1  ;;  %v3578_v1 = vld [vmem:[%s3577_s2] sm:$0x1]  ;;  %s6451_s2 = sld [smem:[#allocation2 + $0x387]] }
 0x6f0   :  { %10127 = vmatpush3.bf16.msra.mxu0 %v10803_v12  ;;  %10157 = vmatpush3.bf16.msra.mxu1 %v10933_v60 }
 0x6f1   :  { %10128 = vmatprep.subr.bf16.mxu0 %v10706_v3  ;;  %10158 = vmatprep.subr.bf16.mxu1 %v10706_v3 }
 0x6f2   :  { %8663 = vmatprep.mubr.msk.f32.mxu0 %vm10707_vm0, %v10708_v8 }
 0x6f4   :  { %10130 = vmatpush3.bf16.msra.mxu0 %v10806_v13  ;;  %10160 = vmatpush3.bf16.msra.mxu1 %v10938_v0 }
 0x6f5   :  { %10131 = vmatprep.subr.bf16.mxu0 %v10706_v3  ;;  %10161 = vmatprep.subr.bf16.mxu1 %v10706_v3  ;;  %s4970_s23 = scalar_lea.vmem [#allocation6], %s6451_s2 }
 0x6f8   :  { %10133 = vmatpush3.bf16.msra.mxu0 %v10812_v18  ;;  %10163 = vmatpush3.bf16.msra.mxu1 %v10946_v6 }
 0x6f9   :  { %10134 = vmatprep.subr.bf16.mxu0 %v10706_v3  ;;  %10164 = vmatprep.subr.bf16.mxu1 %v10706_v3 }
 0x6fc   :  { %10136 = vmatpush3.bf16.msra.mxu0 %v10818_v30  ;;  %10166 = vmatpush3.bf16.msra.mxu1 %v10951_v9 }
 0x6fd   :  { %10137 = vmatprep.subr.bf16.mxu0 %v10706_v3  ;;  %10167 = vmatprep.subr.bf16.mxu1 %v10706_v3 }
 0x700   :  { %10139 = vmatpush3.bf16.msra.mxu0 %v10830_v41  ;;  %10169 = vmatpush3.bf16.msra.mxu1 %v10957_v34 }
 0x701   :  { %10140 = vmatprep.subr.bf16.mxu0 %v10706_v3  ;;  %10170 = vmatprep.subr.bf16.mxu1 %v10706_v3 }
 0x704   :  { %10142 = vmatpush3.bf16.msra.mxu0 %v10834_v42  ;;  %10172 = vmatpush3.bf16.msra.mxu1 %v10961_v36 }
 0x705   :  { %10143 = vmatprep.subr.bf16.mxu0 %v10706_v3  ;;  %10197 = vmatprep.subr.bf16.mxu1 %v10706_v3 }
 0x708   :  { %10145 = vmatpush3.bf16.msra.mxu0 %v10836_v43 }
 0x709   :  { %10146 = vmatprep.subr.bf16.mxu0 %v10706_v3 }
 0x70c   :  { %10148 = vmatpush3.bf16.msra.mxu0 %v10838_v44 }
 0x70d   :  { %10173 = vmatprep.subr.bf16.mxu0 %v10706_v3 }
 0x77a   :  { %v3848_v25 = vpop.f32.mrb[36].mxu1 }
 0x77b   :  { %v8490_v7 = vpop.f32.mrb[37].mxu1 }
 0x77c   :  { %v3607_v7 = vsel %vm142_vm5, %v3606_v5, %v3595_v4  ;;  %v4267_v4 = vld [vmem:[%s4266_s9] sm:$0x1] }
 0x782   :  { %v3697_v26 = vpop.f32.mrb[24].mxu0 }
 0x783   :  { %v3849_v29 = vadd.f32 %v3848_v25, %v3697_v26  ;;  %v8455_v32 = vpop.f32.mrb[25].mxu0  ;;  %v3598_v25 = vrot.slane %v3578_v1, 2  ;;  %v3601_v26 = vrot.slane %v3581_v24, 1  ;;  %v4298_v1 = vsel %vm134_vm1, %v4255_v61, %v4278_v46  ;;  %v4270_v24 = vld [vmem:[%s4269_s10] sm:$0x1] }
 0x784   :  { %v5697_v46 = vand.u32 4294901760, %v5653_v2 }
 0x79a   :  { %v4041_v10 = vpop.f32.mrb[38].mxu1 }
 0x79b   :  { %v8560_v11 = vpop.f32.mrb[39].mxu1 }
 0x7a2   :  { %v3952_v35 = vpop.f32.mrb[26].mxu0 }
 0x7a3   :  { %v3953_v33 = vadd.f32 %v3952_v35, %v3849_v29  ;;  %v8525_v51 = vpop.f32.mrb[27].mxu0  ;;  %v3608_v29 = vsel %vm144_vm6, %v3607_v7, %v3598_v25  ;;  %v4287_v25 = vrot.slane %v4267_v4, 4 }
 0x7a4   :  { %v3609_v35 = vsel %vm146_vm7, %v3608_v29, %v3601_v26  ;;  %v4273_v29 = vld [vmem:[%s4272_s11] sm:$0x1] }
 0x7a5   :  { %v4042_v52 = vadd.f32 %v4041_v10, %v3953_v33 }
 0x7ba   :  { %v4247_v59 = vpop.f32.mrb[40].mxu1 }
 0x7bb   :  { %v8630_v49 = vpop.f32.mrb[41].mxu1 }
 0x7bc   :  { %v4284_v49 = vrot.slane %v4264_v63, 5 }
 0x7c2   :  { %v4160_v32 = vpop.f32.mrb[28].mxu0 }
 0x7c3   :  { %v4161_v10 = vadd.f32 %v4160_v32, %v4042_v52  ;;  %v8595_v11 = vpop.f32.mrb[29].mxu0  ;;  %v4290_v32 = vrot.slane %v4270_v24, 3 }
 0x7c5   :  { %v4248_v33 = vadd.f32 %v4247_v59, %v4161_v10  ;;  %v4281_v59 = vrot.slane %v4261_v45, 6  ;;  %v5654_v45 = vld [vmem:[#allocation9 + $0x58] sm:$0xff] }
 0x7c6   :  { %v5700_v61 = vand.u32 4294901760, %v5654_v45 }
 0x7c7   :  { %v4251_v51 = vadd.f32 %v4248_v33, %v3609_v35  ;;  %v4299_v5 = vsel %vm136_vm2, %v4298_v1, %v4281_v59  ;;  %v4276_v35 = vld [vmem:[%s4275_s12] sm:$0x1]  ;;  %v4293_v33 = vrot.slane %v4273_v29, 2  ;;  %v5656_v1 = vld [vmem:[#allocation9 + $0x68] sm:$0xff]  ;;  %v5658_v29 = vld [vmem:[#allocation9 + $0x78] sm:$0xff] }
 0x7c8   :  { %v4300_v7 = vsel %vm138_vm3, %v4299_v5, %v4284_v49  ;;  %v11928_v63 = vpack.c.bf16 %v5700_v61, %v5697_v46  ;;  %v5655_v59 = vld [vmem:[#allocation9 + $0x60] sm:$0xff]  ;;  %v5706_v49 = vand.u32 4294901760, %v5656_v1 }
 0x7c9   :  { %10588 = vtanh.f32 %v4251_v51  ;;  %v4301_v11 = vsel %vm140_vm4, %v4300_v7, %v4287_v25  ;;  %v5703_v4 = vand.u32 4294901760, %v5655_v59 }
 0x7ca   :  { %v4302_v51 = vsel %vm142_vm5, %v4301_v11, %v4290_v32 }
 0x7d3   :  { %v10589_v14 = vpop.eup %10588 }
 0x7d4   :  { %v11705_v53 = vand.u32 4294901760, %v10589_v14 }
 0x7d6   :  { %8699 = vmatmul.mubr.f32.vlgmr.msra.gmra.mrb[42].mxu1 %v11705_v53  ;;  %v4387_v54 = vsub.f32 %v10589_v14, %v11705_v53  ;;  %v4296_v14 = vrot.slane %v4276_v35, 1 }
 0x7d7   :  { %10199 = vmatpush3.bf16.msra.mxu1 %v10803_v12  ;;  %8768 = vmatprep.mubr.msk.f32.mxu1 %vm10707_vm0, %v10708_v8 }
 0x7d8   :  { %10200 = vmatprep.subr.bf16.mxu1 %v10706_v3  ;;  %v4388_v52 = vand.u32 4294901760, %v4387_v54 }
 0x7da   :  { %v4389_v55 = vsub.f32 %v4387_v54, %v4388_v52 }
 0x7db   :  { %10202 = vmatpush3.bf16.msra.mxu1 %v10806_v13 }
 0x7dc   :  { %10203 = vmatprep.subr.bf16.mxu1 %v10706_v3  ;;  %v4390_v56 = vand.u32 4294901760, %v4389_v55 }
 0x7de   :  { %8664 = vmatmul.mubr.f32.vlgmr.msra.gmra.mrb[30].mxu0 %v4390_v56 }
 0x7df   :  { %10175 = vmatpush3.bf16.msra.mxu0 %v10967_v15  ;;  %10205 = vmatpush3.bf16.msra.mxu1 %v10812_v18 }
 0x7e0   :  { %10176 = vmatprep.subr.bf16.mxu0 %v10706_v3  ;;  %10206 = vmatprep.subr.bf16.mxu1 %v10706_v3 }
 0x7e1   :  { %8733 = vmatprep.mubr.msk.f32.mxu0 %vm10707_vm0, %v10708_v8 }
 0x7e3   :  { %10178 = vmatpush3.bf16.msra.mxu0 %v10974_v20  ;;  %10208 = vmatpush3.bf16.msra.mxu1 %v10818_v30 }
 0x7e4   :  { %10179 = vmatprep.subr.bf16.mxu0 %v10706_v3  ;;  %10209 = vmatprep.subr.bf16.mxu1 %v10706_v3 }
 0x7e7   :  { %10181 = vmatpush3.bf16.msra.mxu0 %v10982_v38  ;;  %10211 = vmatpush3.bf16.msra.mxu1 %v10830_v41 }
 0x7e8   :  { %10182 = vmatprep.subr.bf16.mxu0 %v10706_v3  ;;  %10212 = vmatprep.subr.bf16.mxu1 %v10706_v3 }
 0x7eb   :  { %10184 = vmatpush3.bf16.msra.mxu0 %v10988_v39  ;;  %10214 = vmatpush3.bf16.msra.mxu1 %v10834_v42 }
 0x7ec   :  { %10185 = vmatprep.subr.bf16.mxu0 %v10706_v3  ;;  %10215 = vmatprep.subr.bf16.mxu1 %v10706_v3 }
 0x7ef   :  { %10187 = vmatpush3.bf16.msra.mxu0 %v10994_v40  ;;  %10217 = vmatpush3.bf16.msra.mxu1 %v10836_v43 }
 0x7f0   :  { %10188 = vmatprep.subr.bf16.mxu0 %v10706_v3  ;;  %10218 = vmatprep.subr.bf16.mxu1 %v10706_v3 }
 0x7f3   :  { %10190 = vmatpush3.bf16.msra.mxu0 %v11000_v47  ;;  %10220 = vmatpush3.bf16.msra.mxu1 %v10838_v44 }
 0x7f4   :  { %10191 = vmatprep.subr.bf16.mxu0 %v10706_v3  ;;  %10245 = vmatprep.subr.bf16.mxu1 %v10706_v3 }
 0x7f6   :  { %8769 = vmatmul.mubr.f32.vlgmr.msra.gmra.mrb[44].mxu1 %v4388_v52 }
 0x7f7   :  { %10193 = vmatpush3.bf16.msra.mxu0 %v11006_v48  ;;  %10247 = vmatpush3.bf16.msra.mxu1 %v10803_v12 }
 0x7f8   :  { %10194 = vmatprep.subr.bf16.mxu0 %v10706_v3  ;;  %10248 = vmatprep.subr.bf16.mxu1 %v10706_v3 }
 0x7f9   :  { %8838 = vmatprep.mubr.msk.f32.mxu1 %vm10707_vm0, %v10708_v8 }
 0x7fb   :  { %10196 = vmatpush3.bf16.msra.mxu0 %v11012_v50  ;;  %10250 = vmatpush3.bf16.msra.mxu1 %v10806_v13 }
 0x7fc   :  { %10221 = vmatprep.subr.bf16.mxu0 %v10706_v3  ;;  %10251 = vmatprep.subr.bf16.mxu1 %v10706_v3 }
 0x7fe   :  { %8734 = vmatmul.mubr.f32.vlgmr.msra.gmra.mrb[32].mxu0 %v4387_v54 }
 0x7ff   :  { %10223 = vmatpush3.bf16.msra.mxu0 %v10893_v16  ;;  %10253 = vmatpush3.bf16.msra.mxu1 %v10812_v18 }
 0x800   :  { %10224 = vmatprep.subr.bf16.mxu0 %v10706_v3  ;;  %10254 = vmatprep.subr.bf16.mxu1 %v10706_v3 }
 0x801   :  { %8803 = vmatprep.mubr.msk.f32.mxu0 %vm10707_vm0, %v10708_v8 }
 0x803   :  { %10226 = vmatpush3.bf16.msra.mxu0 %v10895_v17  ;;  %10256 = vmatpush3.bf16.msra.mxu1 %v10818_v30 }
 0x804   :  { %10227 = vmatprep.subr.bf16.mxu0 %v10706_v3  ;;  %10257 = vmatprep.subr.bf16.mxu1 %v10706_v3 }
 0x807   :  { %10229 = vmatpush3.bf16.msra.mxu0 %v10897_v19  ;;  %10259 = vmatpush3.bf16.msra.mxu1 %v10830_v41 }
 0x808   :  { %10230 = vmatprep.subr.bf16.mxu0 %v10706_v3  ;;  %10260 = vmatprep.subr.bf16.mxu1 %v10706_v3 }
 0x80b   :  { %10232 = vmatpush3.bf16.msra.mxu0 %v10900_v21  ;;  %10262 = vmatpush3.bf16.msra.mxu1 %v10834_v42 }
 0x80c   :  { %10233 = vmatprep.subr.bf16.mxu0 %v10706_v3  ;;  %10263 = vmatprep.subr.bf16.mxu1 %v10706_v3 }
 0x80f   :  { %10235 = vmatpush3.bf16.msra.mxu0 %v10902_v22  ;;  %10265 = vmatpush3.bf16.msra.mxu1 %v10836_v43 }
 0x810   :  { %10236 = vmatprep.subr.bf16.mxu0 %v10706_v3  ;;  %10266 = vmatprep.subr.bf16.mxu1 %v10706_v3 }
 0x813   :  { %10238 = vmatpush3.bf16.msra.mxu0 %v10904_v23  ;;  %10268 = vmatpush3.bf16.msra.mxu1 %v10838_v44 }
 0x814   :  { %10239 = vmatprep.subr.bf16.mxu0 %v10706_v3  ;;  %10293 = vmatprep.subr.bf16.mxu1 %v10706_v3 }
 0x816   :  { %8839 = vmatmul.mubr.f32.vlgmr.msra.gmra.mrb[46].mxu1 %v11705_v53 }
 0x817   :  { %10241 = vmatpush3.bf16.msra.mxu0 %v10908_v27  ;;  %10295 = vmatpush3.bf16.msra.mxu1 %v10917_v31 }
 0x818   :  { %10242 = vmatprep.subr.bf16.mxu0 %v10706_v3  ;;  %10296 = vmatprep.subr.bf16.mxu1 %v10706_v3 }
 0x819   :  { %8908 = vmatprep.mubr.msk.f32.mxu1 %vm10707_vm0, %v10708_v8 }
 0x81b   :  { %10244 = vmatpush3.bf16.msra.mxu0 %v10912_v28  ;;  %10298 = vmatpush3.bf16.msra.mxu1 %v10927_v37 }
 0x81c   :  { %10269 = vmatprep.subr.bf16.mxu0 %v10706_v3  ;;  %10299 = vmatprep.subr.bf16.mxu1 %v10706_v3 }
 0x81e   :  { %8804 = vmatmul.mubr.f32.vlgmr.msra.gmra.mrb[34].mxu0 %v11705_v53  ;;  %v4303_v53 = vsel %vm144_vm6, %v4302_v51, %v4293_v33  ;;  %v11949_v33 = vsub.f32 %v5653_v2, %v5697_v46  ;;  %v11951_v51 = vsub.f32 %v5654_v45, %v5700_v61 }
 0x81f   :  { %10271 = vmatpush3.bf16.msra.mxu0 %v10803_v12  ;;  %10301 = vmatpush3.bf16.msra.mxu1 %v10933_v60  ;;  %v4304_v56 = vsel %vm146_vm7, %v4303_v53, %v4296_v14  ;;  %v11953_v14 = vpack.c.bf16 %v5706_v49, %v5703_v4  ;;  %v11955_v53 = vsub.f32 %v5655_v59, %v5703_v4 }
 0x820   :  { %10272 = vmatprep.subr.bf16.mxu0 %v10706_v3  ;;  %10302 = vmatprep.subr.bf16.mxu1 %v10706_v3 }
 0x821   :  { %8873 = vmatprep.mubr.msk.f32.mxu0 %vm10707_vm0, %v10708_v8 }
 0x823   :  { %10274 = vmatpush3.bf16.msra.mxu0 %v10806_v13  ;;  %10304 = vmatpush3.bf16.msra.mxu1 %v10938_v0 }
 0x824   :  { %10275 = vmatprep.subr.bf16.mxu0 %v10706_v3  ;;  %10305 = vmatprep.subr.bf16.mxu1 %v10706_v3 }
 0x827   :  { %10277 = vmatpush3.bf16.msra.mxu0 %v10812_v18  ;;  %10307 = vmatpush3.bf16.msra.mxu1 %v10946_v6 }
 0x828   :  { %10278 = vmatprep.subr.bf16.mxu0 %v10706_v3  ;;  %10308 = vmatprep.subr.bf16.mxu1 %v10706_v3 }
 0x82b   :  { %10280 = vmatpush3.bf16.msra.mxu0 %v10818_v30  ;;  %10310 = vmatpush3.bf16.msra.mxu1 %v10951_v9 }
 0x82c   :  { %10281 = vmatprep.subr.bf16.mxu0 %v10706_v3  ;;  %10311 = vmatprep.subr.bf16.mxu1 %v10706_v3 }
 0x82f   :  { %10283 = vmatpush3.bf16.msra.mxu0 %v10830_v41  ;;  %10313 = vmatpush3.bf16.msra.mxu1 %v10957_v34 }
 0x830   :  { %10284 = vmatprep.subr.bf16.mxu0 %v10706_v3  ;;  %10314 = vmatprep.subr.bf16.mxu1 %v10706_v3 }
 0x833   :  { %10286 = vmatpush3.bf16.msra.mxu0 %v10834_v42  ;;  %10316 = vmatpush3.bf16.msra.mxu1 %v10961_v36 }
 0x834   :  { %10287 = vmatprep.subr.bf16.mxu0 %v10706_v3  ;;  %10341 = vmatprep.subr.bf16.mxu1 %v10706_v3 }
 0x837   :  { %10289 = vmatpush3.bf16.msra.mxu0 %v10836_v43 }
 0x838   :  { %10290 = vmatprep.subr.bf16.mxu0 %v10706_v3 }
 0x83b   :  { %10292 = vmatpush3.bf16.msra.mxu0 %v10838_v44 }
 0x83c   :  { %10317 = vmatprep.subr.bf16.mxu0 %v10706_v3 }
 0x8a9   :  { %v4543_v31 = vpop.f32.mrb[42].mxu1 }
 0x8aa   :  { %v8700_v37 = vpop.f32.mrb[43].mxu1 }
 0x8b1   :  { %v4392_v60 = vpop.f32.mrb[30].mxu0 }
 0x8b2   :  { %v4544_v0 = vadd.f32 %v4543_v31, %v4392_v60  ;;  %v8665_v6 = vpop.f32.mrb[31].mxu0 }
 0x8c9   :  { %v4736_v9 = vpop.f32.mrb[44].mxu1 }
 0x8ca   :  { %v8770_v34 = vpop.f32.mrb[45].mxu1 }
 0x8d1   :  { %v4647_v36 = vpop.f32.mrb[32].mxu0 }
 0x8d2   :  { %v4648_v57 = vadd.f32 %v4647_v36, %v4544_v0  ;;  %v8735_v58 = vpop.f32.mrb[33].mxu0 }
 0x8d4   :  { %v4737_v62 = vadd.f32 %v4736_v9, %v4648_v57 }
 0x8e9   :  { %v4942_v26 = vpop.f32.mrb[46].mxu1 }
 0x8ea   :  { %v8840_v10 = vpop.f32.mrb[47].mxu1 }
 0x8f1   :  { %v4855_v54 = vpop.f32.mrb[34].mxu0 }
 0x8f2   :  { %v4856_v52 = vadd.f32 %v4855_v54, %v4737_v62  ;;  %v8805_v55 = vpop.f32.mrb[35].mxu0  ;;  %v11957_v54 = vsub.f32 %v5656_v1, %v5706_v49 }
 0x8f3   :  { %v5712_v55 = vand.u32 4294901760, %v5658_v29 }
 0x8f4   :  { %v4943_v31 = vadd.f32 %v4942_v26, %v4856_v52  ;;  %v5657_v26 = vld [vmem:[#allocation9 + $0x70] sm:$0xff] }
 0x8f5   :  { %v5709_v52 = vand.u32 4294901760, %v5657_v26 }
 0x8f6   :  { %v4946_v37 = vadd.f32 %v4943_v31, %v4304_v56 }
 0x8f8   :  { %10590 = vtanh.f32 %v4946_v37  ;;  %v11963_v37 = vpack.c.bf16 %v5712_v55, %v5709_v52 }
 0x902   :  { %v10591_v60 = vpop.eup %10590 }
 0x903   :  { %v11826_v0 = vand.u32 4294901760, %v10591_v60 }
 0x905   :  { %8909 = vmatmul.mubr.f32.vlgmr.msra.gmra.mrb[48].mxu1 %v11826_v0  ;;  %v5082_v6 = vsub.f32 %v10591_v60, %v11826_v0  ;;  %v11965_v60 = vsub.f32 %v5657_v26, %v5709_v52  ;;  %v12233_v26 = vand.u32 4294901760, %v11949_v33 }
 0x906   :  { %10343 = vmatpush3.bf16.msra.mxu1 %v10803_v12  ;;  %8978 = vmatprep.mubr.msk.f32.mxu1 %vm10707_vm0, %v10708_v8 }
 0x907   :  { %10344 = vmatprep.subr.bf16.mxu1 %v10706_v3  ;;  %v5083_v9 = vand.u32 4294901760, %v5082_v6 }
 0x909   :  { %v5084_v34 = vsub.f32 %v5082_v6, %v5083_v9 }
 0x90a   :  { %10346 = vmatpush3.bf16.msra.mxu1 %v10806_v13 }
 0x90b   :  { %10347 = vmatprep.subr.bf16.mxu1 %v10706_v3  ;;  %v5085_v36 = vand.u32 4294901760, %v5084_v34 }
 0x90d   :  { %8874 = vmatmul.mubr.f32.vlgmr.msra.gmra.mrb[36].mxu0 %v5085_v36 }
 0x90e   :  { %10319 = vmatpush3.bf16.msra.mxu0 %v10967_v15  ;;  %10349 = vmatpush3.bf16.msra.mxu1 %v10812_v18  ;;  %v5649_v15 = vld [vmem:[#allocation9 + $0x30] sm:$0xff] }
 0x90f   :  { %10320 = vmatprep.subr.bf16.mxu0 %v10706_v3  ;;  %10350 = vmatprep.subr.bf16.mxu1 %v10706_v3 }
 0x910   :  { %8943 = vmatprep.mubr.msk.f32.mxu0 %vm10707_vm0, %v10708_v8 }
 0x912   :  { %10322 = vmatpush3.bf16.msra.mxu0 %v10974_v20  ;;  %10352 = vmatpush3.bf16.msra.mxu1 %v10818_v30  ;;  %v5650_v20 = vld [vmem:[#allocation9 + $0x38] sm:$0xff] }
 0x913   :  { %10323 = vmatprep.subr.bf16.mxu0 %v10706_v3  ;;  %10353 = vmatprep.subr.bf16.mxu1 %v10706_v3 }
 0x916   :  { %10325 = vmatpush3.bf16.msra.mxu0 %v10982_v38  ;;  %10355 = vmatpush3.bf16.msra.mxu1 %v10830_v41 }
 0x917   :  { %10326 = vmatprep.subr.bf16.mxu0 %v10706_v3  ;;  %10356 = vmatprep.subr.bf16.mxu1 %v10706_v3 }
 0x91a   :  { %10328 = vmatpush3.bf16.msra.mxu0 %v10988_v39  ;;  %10358 = vmatpush3.bf16.msra.mxu1 %v10834_v42  ;;  %v5685_v39 = vand.u32 4294901760, %v5649_v15 }
 0x91b   :  { %10329 = vmatprep.subr.bf16.mxu0 %v10706_v3  ;;  %10359 = vmatprep.subr.bf16.mxu1 %v10706_v3 }
 0x91c   :  { %v11940_v32 = vsub.f32 %v5649_v15, %v5685_v39 }
 0x91e   :  { %10331 = vmatpush3.bf16.msra.mxu0 %v10994_v40  ;;  %10361 = vmatpush3.bf16.msra.mxu1 %v10836_v43  ;;  %v5688_v40 = vand.u32 4294901760, %v5650_v20 }
 0x91f   :  { %10332 = vmatprep.subr.bf16.mxu0 %v10706_v3  ;;  %10362 = vmatprep.subr.bf16.mxu1 %v10706_v3 }
 0x920   :  { %v11942_v10 = vsub.f32 %v5650_v20, %v5688_v40 }
 0x922   :  { %10334 = vmatpush3.bf16.msra.mxu0 %v11000_v47  ;;  %10364 = vmatpush3.bf16.msra.mxu1 %v10838_v44  ;;  %v11920_v47 = vpack.c.bf16 %v5688_v40, %v5685_v39  ;;  %v12237_v39 = vand.u32 4294901760, %v11940_v32  ;;  %v12236_v40 = vand.u32 4294901760, %v11942_v10 }
 0x923   :  { %10335 = vmatprep.subr.bf16.mxu0 %v10706_v3  ;;  %10389 = vmatprep.subr.bf16.mxu1 %v10706_v3 }
 0x925   :  { %8979 = vmatmul.mubr.f32.vlgmr.msra.gmra.mrb[50].mxu1 %v5083_v9 }
 0x926   :  { %10337 = vmatpush3.bf16.msra.mxu0 %v11006_v48  ;;  %10391 = vmatpush3.bf16.msra.mxu1 %v10803_v12  ;;  %v5643_v12 = vld [vmem:[#allocation9] sm:$0xff] }
 0x927   :  { %10338 = vmatprep.subr.bf16.mxu0 %v10706_v3  ;;  %10392 = vmatprep.subr.bf16.mxu1 %v10706_v3  ;;  %v5651_v48 = vld [vmem:[#allocation9 + $0x40] sm:$0xff] }
 0x928   :  { %9048 = vmatprep.mubr.msk.f32.mxu1 %vm10707_vm0, %v10708_v8  ;;  %v5691_v57 = vand.u32 4294901760, %v5651_v48 }
 0x92a   :  { %10340 = vmatpush3.bf16.msra.mxu0 %v11012_v50  ;;  %10394 = vmatpush3.bf16.msra.mxu1 %v10806_v13  ;;  %v5644_v13 = vld [vmem:[#allocation9 + $0x8] sm:$0xff]  ;;  %v11944_v11 = vsub.f32 %v5651_v48, %v5691_v57 }
 0x92b   :  { %10365 = vmatprep.subr.bf16.mxu0 %v10706_v3  ;;  %10395 = vmatprep.subr.bf16.mxu1 %v10706_v3  ;;  %v5652_v50 = vld [vmem:[#allocation9 + $0x48] sm:$0xff] }
 0x92c   :  { %v5694_v58 = vand.u32 4294901760, %v5652_v50  ;;  %v12235_v45 = vand.u32 4294901760, %v11944_v11 }
 0x92d   :  { %8944 = vmatmul.mubr.f32.vlgmr.msra.gmra.mrb[38].mxu0 %v5082_v6 }
 0x92e   :  { %10367 = vmatpush3.bf16.msra.mxu0 %v10893_v16  ;;  %10397 = vmatpush3.bf16.msra.mxu1 %v10812_v18  ;;  %v5667_v18 = vand.u32 4294901760, %v5643_v12  ;;  %v5646_v16 = vld [vmem:[#allocation9 + $0x18] sm:$0xff]  ;;  %v11924_v62 = vpack.c.bf16 %v5694_v58, %v5691_v57  ;;  %v11946_v35 = vsub.f32 %v5652_v50, %v5694_v58  ;;  %v5803_v50 = vsub.f32 %v11940_v32, %v12237_v39 }
 0x92f   :  { %10368 = vmatprep.subr.bf16.mxu0 %v10706_v3  ;;  %10398 = vmatprep.subr.bf16.mxu1 %v10706_v3  ;;  %v5810_v57 = vsub.f32 %v11942_v10, %v12236_v40  ;;  %v5817_v59 = vsub.f32 %v11944_v11, %v12235_v45  ;;  %v4968_v40 = vld [vmem:[%s4967_s22] sm:$0x1] }
 0x930   :  { %9013 = vmatprep.mubr.msk.f32.mxu0 %vm10707_vm0, %v10708_v8  ;;  %v5804_v58 = vand.u32 4294901760, %v5803_v50  ;;  %v12234_v46 = vand.u32 4294901760, %v11946_v35 }
 0x931   :  { %v5811_v2 = vand.u32 4294901760, %v5810_v57  ;;  %v5818_v4 = vand.u32 4294901760, %v5817_v59 }
 0x932   :  { %10370 = vmatpush3.bf16.msra.mxu0 %v10895_v17  ;;  %10400 = vmatpush3.bf16.msra.mxu1 %v10818_v30  ;;  %v5670_v30 = vand.u32 4294901760, %v5644_v13  ;;  %v5824_v1 = vsub.f32 %v11946_v35, %v12234_v46 }
 0x933   :  { %10371 = vmatprep.subr.bf16.mxu0 %v10706_v3  ;;  %10401 = vmatprep.subr.bf16.mxu1 %v10706_v3  ;;  %v12009_v61 = vpack.c.bf16 %v5811_v2, %v5804_v58 }
 0x934   :  { %v5825_v49 = vand.u32 4294901760, %v5824_v1 }
 0x936   :  { %10373 = vmatpush3.bf16.msra.mxu0 %v10897_v19  ;;  %10403 = vmatpush3.bf16.msra.mxu1 %v10830_v41  ;;  %v11905_v41 = vpack.c.bf16 %v5670_v30, %v5667_v18  ;;  %v5676_v19 = vand.u32 4294901760, %v5646_v16  ;;  %v12019_v52 = vpack.c.bf16 %v5825_v49, %v5818_v4 }
 0x937   :  { %10374 = vmatprep.subr.bf16.mxu0 %v10706_v3  ;;  %10404 = vmatprep.subr.bf16.mxu1 %v10706_v3 }
 0x938   :  { %v11933_v24 = vsub.f32 %v5646_v16, %v5676_v19 }
 0x93a   :  { %10376 = vmatpush3.bf16.msra.mxu0 %v10900_v21  ;;  %10406 = vmatpush3.bf16.msra.mxu1 %v10834_v42  ;;  %v11907_v42 = vsub.f32 %v5643_v12, %v5667_v18  ;;  %v5647_v21 = vld [vmem:[#allocation9 + $0x20] sm:$0xff]  ;;  %v12240_v12 = vand.u32 4294901760, %v11933_v24 }
 0x93b   :  { %10377 = vmatprep.subr.bf16.mxu0 %v10706_v3  ;;  %10407 = vmatprep.subr.bf16.mxu1 %v10706_v3 }
 0x93c   :  { %v5760_v56 = vand.u32 4294901760, %v11907_v42 }
 0x93e   :  { %10379 = vmatpush3.bf16.msra.mxu0 %v10902_v22  ;;  %10409 = vmatpush3.bf16.msra.mxu1 %v10836_v43  ;;  %v11909_v43 = vsub.f32 %v5644_v13, %v5670_v30  ;;  %v5761_v6 = vsub.f32 %v11907_v42, %v5760_v56  ;;  %v5782_v30 = vsub.f32 %v11933_v24, %v12240_v12 }
 0x93f   :  { %10380 = vmatprep.subr.bf16.mxu0 %v10706_v3  ;;  %10410 = vmatprep.subr.bf16.mxu1 %v10706_v3 }
 0x940   :  { %v12242_v31 = vand.u32 4294901760, %v11909_v43  ;;  %v5762_v34 = vand.u32 4294901760, %v5761_v6 }
 0x942   :  { %10382 = vmatpush3.bf16.msra.mxu0 %v10904_v23  ;;  %10412 = vmatpush3.bf16.msra.mxu1 %v10838_v44  ;;  %v5645_v44 = vld [vmem:[#allocation9 + $0x10] sm:$0xff]  ;;  %v5648_v23 = vld [vmem:[#allocation9 + $0x28] sm:$0xff]  ;;  %v5768_v9 = vsub.f32 %v11909_v43, %v12242_v31 }
 0x943   :  { %10383 = vmatprep.subr.bf16.mxu0 %v10706_v3  ;;  %v5673_v17 = vand.u32 4294901760, %v5645_v44 }
 0x944   :  { %v5769_v13 = vand.u32 4294901760, %v5768_v9 }
 0x945   :  { %9049 = vmatmul.mubr.f32.vlgmr.msra.gmra.mrb[52].mxu1 %v11826_v0  ;;  %v11913_v22 = vpack.c.bf16 %v5676_v19, %v5673_v17  ;;  %v11931_v5 = vsub.f32 %v5645_v44, %v5673_v17  ;;  %v5783_v17 = vand.u32 4294901760, %v5782_v30 }
 0x946   :  { %10385 = vmatpush3.bf16.msra.mxu0 %v10908_v27  ;;  %v5679_v27 = vand.u32 4294901760, %v5647_v21  ;;  %v11985_v44 = vpack.c.bf16 %v5769_v13, %v5762_v34  ;;  %v12231_v13 = vand.u32 4294901760, %v11955_v53 }
 0x947   :  { %10386 = vmatprep.subr.bf16.mxu0 %v10706_v3  ;;  %v12241_v36 = vand.u32 4294901760, %v11931_v5 }
 0x948   :  { %v11935_v25 = vsub.f32 %v5647_v21, %v5679_v27 }
 0x949   :  { %v5775_v18 = vsub.f32 %v11931_v5, %v12241_v36 }
 0x94a   :  { %10388 = vmatpush3.bf16.msra.mxu0 %v10912_v28  ;;  %v5682_v28 = vand.u32 4294901760, %v5648_v23  ;;  %v12239_v19 = vand.u32 4294901760, %v11935_v25 }
 0x94b   :  { %10413 = vmatprep.subr.bf16.mxu0 %v10706_v3  ;;  %v5776_v16 = vand.u32 4294901760, %v5775_v18  ;;  %v12230_v18 = vand.u32 4294901760, %v11957_v54 }
 0x94c   :  { %v11917_v38 = vpack.c.bf16 %v5682_v28, %v5679_v27  ;;  %v11937_v7 = vsub.f32 %v5648_v23, %v5682_v28  ;;  %v5789_v27 = vsub.f32 %v11935_v25, %v12239_v19  ;;  %v4971_v19 = vld [vmem:[%s4970_s23] sm:$0x1] }
 0x94d   :  { %9014 = vmatmul.mubr.f32.vlgmr.msra.gmra.mrb[40].mxu0 %v11826_v0  ;;  %v11967_v0 = vsub.f32 %v5658_v29, %v5712_v55  ;;  %v11989_v23 = vpack.c.bf16 %v5783_v17, %v5776_v16  ;;  %v12232_v29 = vand.u32 4294901760, %v11951_v51  ;;  %v5831_v55 = vsub.f32 %v11949_v33, %v12233_v26 }
 0x94e   :  { %9083 = vmatprep.mubr.msk.f32.mxu0 %vm10707_vm0, %v10708_v8  ;;  %10415 = vmatpush3.bf16.msra.mxu0 %v11905_v41  ;;  %v12238_v21 = vand.u32 4294901760, %v11937_v7  ;;  %v5790_v15 = vand.u32 4294901760, %v5789_v27  ;;  %v5845_v16 = vsub.f32 %v11955_v53, %v12231_v13  ;;  %v5852_v17 = vsub.f32 %v11957_v54, %v12230_v18  ;;  %v4956_v18 = vld [vmem:[%s4955_s15] sm:$0x1] }
 0x94f   :  { %10416 = vmatprep.subr.bf16.mxu0 %v10706_v3  ;;  %v5838_v6 = vsub.f32 %v11951_v51, %v12232_v29  ;;  %v5832_v9 = vand.u32 4294901760, %v5831_v55  ;;  %v10462_v55 = vpack.c.bf16 %v11909_v43, %v11907_v42  ;;  %v4950_v29 = vld [vmem:[%s4949_s16] sm:$0x1]  ;;  %v4976_v26 = vrot.slane %v4956_v18, 6 }
 0x950   :  { %v5796_v28 = vsub.f32 %v11937_v7, %v12238_v21  ;;  %v5846_v27 = vand.u32 4294901760, %v5845_v16  ;;  %v12246_v42 = vand.u32 4294901760, %v11935_v25 }
 0x951   :  { %v5839_v34 = vand.u32 4294901760, %v5838_v6  ;;  %v10465_v6 = vpack.c.bf16 %v11933_v24, %v11931_v5 }
 0x952   :  { %10418 = vmatpush3.bf16.msra.mxu0 %v11913_v22  ;;  %v5797_v20 = vand.u32 4294901760, %v5796_v28  ;;  %v5853_v28 = vand.u32 4294901760, %v5852_v17  ;;  %v10468_v17 = vpack.c.bf16 %v11937_v7, %v11935_v25  ;;  %v12252_v25 = vand.u32 4294901760, %v11949_v33 }
 0x953   :  { %10419 = vmatprep.subr.bf16.mxu0 %v10706_v3  ;;  %v12029_v30 = vpack.c.bf16 %v5839_v34, %v5832_v9 }
 0x954   :  { %v11999_v48 = vpack.c.bf16 %v5797_v20, %v5790_v15  ;;  %v12229_v15 = vand.u32 4294901760, %v11965_v60  ;;  %v12228_v20 = vand.u32 4294901760, %v11967_v0  ;;  %v12039_v50 = vpack.c.bf16 %v5853_v28, %v5846_v27 }
 0x955   :  { %v10471_v27 = vpack.c.bf16 %v11942_v10, %v11940_v32  ;;  %v10474_v28 = vpack.c.bf16 %v11946_v35, %v11944_v11 }
 0x956   :  { %10421 = vmatpush3.bf16.msra.mxu0 %v11917_v38  ;;  %v5859_v57 = vsub.f32 %v11965_v60, %v12229_v15  ;;  %v5866_v58 = vsub.f32 %v11967_v0, %v12228_v20  ;;  %v4953_v15 = vld [vmem:[%s4952_s30] sm:$0x1] }
 0x957   :  { %10422 = vmatprep.subr.bf16.mxu0 %v10706_v3  ;;  %v4973_v13 = vrot.slane %v4953_v15, 7 }
 0x958   :  { %v5860_v2 = vand.u32 4294901760, %v5859_v57  ;;  %v5867_v59 = vand.u32 4294901760, %v5866_v58  ;;  %v10477_v57 = vpack.c.bf16 %v11951_v51, %v11949_v33  ;;  %v10480_v58 = vpack.c.bf16 %v11957_v54, %v11955_v53 }
 0x95a   :  { %10424 = vmatpush3.bf16.msra.mxu0 %v11920_v47  ;;  %v12047_v1 = vpack.c.bf16 %v5867_v59, %v5860_v2  ;;  %v10483_v2 = vpack.c.bf16 %v11967_v0, %v11965_v60 }
 0x95b   :  { %10425 = vmatprep.subr.bf16.mxu0 %v10706_v3 }
 0x95e   :  { %10427 = vmatpush3.bf16.msra.mxu0 %v11924_v62 }
 0x95f   :  { %10428 = vmatprep.subr.bf16.mxu0 %v10706_v3 }
 0x962   :  { %10430 = vmatpush3.bf16.msra.mxu0 %v11928_v63 }
 0x963   :  { %10431 = vmatprep.subr.bf16.mxu0 %v10706_v3 }
 0x966   :  { %10433 = vmatpush3.bf16.msra.mxu0 %v11953_v14 }
 0x967   :  { %10434 = vmatprep.subr.bf16.mxu0 %v10706_v3 }
 0x96a   :  { %10436 = vmatpush3.bf16.msra.mxu0 %v11963_v37 }
 0x96b   :  { %10437 = vmatprep.subr.bf16.mxu0 %v10706_v3 }
 0x9d8   :  { %v5238_v4 = vpop.f32.mrb[48].mxu1 }
 0x9d9   :  { %v8910_v49 = vpop.f32.mrb[49].mxu1 }
 0x9e0   :  { %v5087_v9 = vpop.f32.mrb[36].mxu0 }
 0x9e1   :  { %v5239_v34 = vadd.f32 %v5238_v4, %v5087_v9  ;;  %v8875_v16 = vpop.f32.mrb[37].mxu0 }
 0x9f8   :  { %v5431_v59 = vpop.f32.mrb[50].mxu1 }
 0x9f9   :  { %v8980_v4 = vpop.f32.mrb[51].mxu1 }
 0x9fa   :  { %v4959_v4 = vld [vmem:[%s4958_s18] sm:$0x1] }
 0xa00   :  { %v5342_v49 = vpop.f32.mrb[38].mxu0 }
 0xa01   :  { %v5343_v9 = vadd.f32 %v5342_v49, %v5239_v34  ;;  %v8945_v16 = vpop.f32.mrb[39].mxu0  ;;  %v4993_v34 = vsel %vm134_vm1, %v4950_v29, %v4973_v13  ;;  %v4962_v49 = vld [vmem:[%s4961_s19] sm:$0x1]  ;;  %v4988_v29 = vrot.slane %v4968_v40, 2 }
 0xa02   :  { %v4965_v16 = vld [vmem:[%s4964_s20] sm:$0x1]  ;;  %v4982_v46 = vrot.slane %v4962_v49, 4 }
 0xa03   :  { %v5432_v20 = vadd.f32 %v5431_v59, %v5343_v9  ;;  %v4979_v59 = vrot.slane %v4959_v4, 5  ;;  %v4994_v9 = vsel %vm136_vm2, %v4993_v34, %v4976_v26  ;;  %v4985_v39 = vrot.slane %v4965_v16, 3 }
 0xa04   :  { %v4991_v4 = vrot.slane %v4971_v19, 1 }
 0xa05   :  { %v4995_v45 = vsel %vm138_vm3, %v4994_v9, %v4979_v59 }
 0xa06   :  { %v4996_v18 = vsel %vm140_vm4, %v4995_v45, %v4982_v46 }
 0xa07   :  { %v4997_v13 = vsel %vm142_vm5, %v4996_v18, %v4985_v39  ;;  %v12250_v39 = vand.u32 4294901760, %v11944_v11  ;;  %v12256_v11 = vand.u32 4294901760, %v11965_v60 }
 0xa08   :  { %v4998_v26 = vsel %vm144_vm6, %v4997_v13, %v4988_v29 }
 0xa09   :  { %v4999_v59 = vsel %vm146_vm7, %v4998_v26, %v4991_v4 }
 0xa18   :  { %v5637_v15 = vpop.f32.mrb[52].mxu1 }
 0xa19   :  { %v9050_v21 = vpop.f32.mrb[53].mxu1 }
 0xa20   :  { %v5550_v34 = vpop.f32.mrb[40].mxu0 }
 0xa21   :  { %v5551_v12 = vadd.f32 %v5550_v34, %v5432_v20  ;;  %v9015_v49 = vpop.f32.mrb[41].mxu0 }
 0xa23   :  { %v5638_v9 = vadd.f32 %v5637_v15, %v5551_v12  ;;  %v12244_v12 = vand.u32 4294901760, %v11931_v5  ;;  %v12249_v5 = vand.u32 4294901760, %v11942_v10  ;;  %v12255_v10 = vand.u32 4294901760, %v11957_v54 }
 0xa25   :  { %v5641_v36 = vadd.f32 %v5638_v9, %v4999_v59 }
 0xa27   :  { %10592 = vtanh.f32 %v5641_v36 }
 0xa31   :  { %v10593_v16 = vpop.eup %10592 }
 0xa32   :  { %v12072_v21 = vand.u32 4294901760, %v10593_v16 }
 0xa34   :  { %v5748_v45 = vsub.f32 %v10593_v16, %v12072_v21 }
 0xa36   :  { %v5749_v46 = vand.u32 4294901760, %v5748_v45 }
 0xa38   :  { %v5750_v40 = vsub.f32 %v5748_v45, %v5749_v46 }
 0xa3a   :  { %v5751_v31 = vand.u32 4294901760, %v5750_v40 }
 0xa3c   :  { %9084 = vmatmul.mubr.f32.vlgmr.msra.gmra.mrb[42].mxu0 %v5751_v31  ;;  %v12243_v31 = vand.u32 4294901760, %v11909_v43  ;;  %v12247_v43 = vand.u32 4294901760, %v11937_v7  ;;  %v12253_v7 = vand.u32 4294901760, %v11951_v51 }
 0xa3d   :  { %10439 = vmatpush3.bf16.msra.mxu0 %v11985_v44  ;;  %9118 = vmatprep.mubr.msk.f32.mxu0 %vm10707_vm0, %v10708_v8  ;;  %v12245_v44 = vand.u32 4294901760, %v11933_v24 }
 0xa3e   :  { %10440 = vmatprep.subr.bf16.mxu0 %v10706_v3  ;;  %v10510_v36 = vpack.c.bf16 %v12243_v31, %v5760_v56  ;;  %v10516_v56 = vpack.c.bf16 %v12247_v43, %v12246_v42 }
 0xa3f   :  { %v10513_v19 = vpack.c.bf16 %v12245_v44, %v12244_v12 }
 0xa41   :  { %10442 = vmatpush3.bf16.msra.mxu0 %v11989_v23  ;;  %v12248_v23 = vand.u32 4294901760, %v11940_v32  ;;  %v12254_v32 = vand.u32 4294901760, %v11955_v53 }
 0xa42   :  { %10443 = vmatprep.subr.bf16.mxu0 %v10706_v3 }
 0xa43   :  { %v10519_v24 = vpack.c.bf16 %v12249_v5, %v12248_v23 }
 0xa45   :  { %10445 = vmatpush3.bf16.msra.mxu0 %v11999_v48  ;;  %v12251_v48 = vand.u32 4294901760, %v11946_v35  ;;  %v12257_v35 = vand.u32 4294901760, %v11967_v0 }
 0xa46   :  { %10446 = vmatprep.subr.bf16.mxu0 %v10706_v3 }
 0xa47   :  { %v10531_v20 = vpack.c.bf16 %v12257_v35, %v12256_v11 }
 0xa49   :  { %10448 = vmatpush3.bf16.msra.mxu0 %v12009_v61  ;;  %v10522_v61 = vpack.c.bf16 %v12251_v48, %v12250_v39 }
 0xa4a   :  { %10449 = vmatprep.subr.bf16.mxu0 %v10706_v3 }
 0xa4d   :  { %10451 = vmatpush3.bf16.msra.mxu0 %v12019_v52  ;;  %v10525_v52 = vpack.c.bf16 %v12253_v7, %v12252_v25 }
 0xa4e   :  { %10452 = vmatprep.subr.bf16.mxu0 %v10706_v3 }
 0xa51   :  { %10454 = vmatpush3.bf16.msra.mxu0 %v12029_v30  ;;  %v10528_v30 = vpack.c.bf16 %v12255_v10, %v12254_v32 }
 0xa52   :  { %10455 = vmatprep.subr.bf16.mxu0 %v10706_v3 }
 0xa55   :  { %10457 = vmatpush3.bf16.msra.mxu0 %v12039_v50 }
 0xa56   :  { %10458 = vmatprep.subr.bf16.mxu0 %v10706_v3 }
 0xa59   :  { %10460 = vmatpush3.bf16.msra.mxu0 %v12047_v1 }
 0xa5a   :  { %10461 = vmatprep.subr.bf16.mxu0 %v10706_v3 }
 0xa5c   :  { %9119 = vmatmul.mubr.f32.vlgmr.msra.gmra.mrb[42].mxu0 %v12072_v21 }
 0xa5d   :  { %10463 = vmatpush3.bf16.msra.mxu0 %v10462_v55  ;;  %9153 = vmatprep.mubr.msk.f32.mxu0 %vm10707_vm0, %v10708_v8 }
 0xa5e   :  { %10464 = vmatprep.subr.bf16.mxu0 %v10706_v3 }
 0xa61   :  { %10466 = vmatpush3.bf16.msra.mxu0 %v10465_v6 }
 0xa62   :  { %10467 = vmatprep.subr.bf16.mxu0 %v10706_v3 }
 0xa65   :  { %10469 = vmatpush3.bf16.msra.mxu0 %v10468_v17 }
 0xa66   :  { %10470 = vmatprep.subr.bf16.mxu0 %v10706_v3 }
 0xa69   :  { %10472 = vmatpush3.bf16.msra.mxu0 %v10471_v27 }
 0xa6a   :  { %10473 = vmatprep.subr.bf16.mxu0 %v10706_v3 }
 0xa6d   :  { %10475 = vmatpush3.bf16.msra.mxu0 %v10474_v28 }
 0xa6e   :  { %10476 = vmatprep.subr.bf16.mxu0 %v10706_v3 }
 0xa71   :  { %10478 = vmatpush3.bf16.msra.mxu0 %v10477_v57 }
 0xa72   :  { %10479 = vmatprep.subr.bf16.mxu0 %v10706_v3 }
 0xa75   :  { %10481 = vmatpush3.bf16.msra.mxu0 %v10480_v58 }
 0xa76   :  { %10482 = vmatprep.subr.bf16.mxu0 %v10706_v3 }
 0xa79   :  { %10484 = vmatpush3.bf16.msra.mxu0 %v10483_v2 }
 0xa7a   :  { %10485 = vmatprep.subr.bf16.mxu0 %v10706_v3 }
 0xa7c   :  { %9154 = vmatmul.mubr.f32.vlgmr.msra.gmra.mrb[42].mxu0 %v5748_v45 }
 0xa7d   :  { %10487 = vmatpush3.bf16.msra.mxu0 %v11905_v41  ;;  %9188 = vmatprep.mubr.msk.f32.mxu0 %vm10707_vm0, %v10708_v8 }
 0xa7e   :  { %10488 = vmatprep.subr.bf16.mxu0 %v10706_v3 }
 0xa81   :  { %10490 = vmatpush3.bf16.msra.mxu0 %v11913_v22 }
 0xa82   :  { %10491 = vmatprep.subr.bf16.mxu0 %v10706_v3 }
 0xa85   :  { %10493 = vmatpush3.bf16.msra.mxu0 %v11917_v38 }
 0xa86   :  { %10494 = vmatprep.subr.bf16.mxu0 %v10706_v3 }
 0xa89   :  { %10496 = vmatpush3.bf16.msra.mxu0 %v11920_v47 }
 0xa8a   :  { %10497 = vmatprep.subr.bf16.mxu0 %v10706_v3 }
 0xa8d   :  { %10499 = vmatpush3.bf16.msra.mxu0 %v11924_v62 }
 0xa8e   :  { %10500 = vmatprep.subr.bf16.mxu0 %v10706_v3 }
 0xa91   :  { %10502 = vmatpush3.bf16.msra.mxu0 %v11928_v63 }
 0xa92   :  { %10503 = vmatprep.subr.bf16.mxu0 %v10706_v3 }
 0xa95   :  { %10505 = vmatpush3.bf16.msra.mxu0 %v11953_v14 }
 0xa96   :  { %10506 = vmatprep.subr.bf16.mxu0 %v10706_v3 }
 0xa99   :  { %10508 = vmatpush3.bf16.msra.mxu0 %v11963_v37 }
 0xa9a   :  { %10509 = vmatprep.subr.bf16.mxu0 %v10706_v3 }
 0xa9c   :  { %9189 = vmatmul.mubr.f32.vlgmr.msra.gmra.mrb[42].mxu0 %v5749_v46 }
 0xa9d   :  { %10511 = vmatpush3.bf16.msra.mxu0 %v10510_v36  ;;  %9223 = vmatprep.mubr.msk.f32.mxu0 %vm10707_vm0, %v10708_v8 }
 0xa9e   :  { %10512 = vmatprep.subr.bf16.mxu0 %v10706_v3 }
 0xaa1   :  { %10514 = vmatpush3.bf16.msra.mxu0 %v10513_v19 }
 0xaa2   :  { %10515 = vmatprep.subr.bf16.mxu0 %v10706_v3 }
 0xaa5   :  { %10517 = vmatpush3.bf16.msra.mxu0 %v10516_v56 }
 0xaa6   :  { %10518 = vmatprep.subr.bf16.mxu0 %v10706_v3 }
 0xaa9   :  { %10520 = vmatpush3.bf16.msra.mxu0 %v10519_v24 }
 0xaaa   :  { %10521 = vmatprep.subr.bf16.mxu0 %v10706_v3 }
 0xaad   :  { %10523 = vmatpush3.bf16.msra.mxu0 %v10522_v61 }
 0xaae   :  { %10524 = vmatprep.subr.bf16.mxu0 %v10706_v3 }
 0xab1   :  { %10526 = vmatpush3.bf16.msra.mxu0 %v10525_v52 }
 0xab2   :  { %10527 = vmatprep.subr.bf16.mxu0 %v10706_v3 }
 0xab5   :  { %10529 = vmatpush3.bf16.msra.mxu0 %v10528_v30 }
 0xab6   :  { %10530 = vmatprep.subr.bf16.mxu0 %v10706_v3 }
 0xab9   :  { %10532 = vmatpush3.bf16.msra.mxu0 %v10531_v20 }
 0xaba   :  { %10533 = vmatprep.subr.bf16.mxu0 %v10706_v3 }
 0xabc   :  { %9224 = vmatmul.mubr.f32.vlgmr.msra.gmra.mrb[42].mxu0 %v12072_v21 }
 0xabd   :  { %10535 = vmatpush3.bf16.msra.mxu0 %v11905_v41  ;;  %9258 = vmatprep.mubr.msk.f32.mxu0 %vm10707_vm0, %v10708_v8  ;;  %v6452_v8 = vld [vmem:[%s12226_s4] ss:$0 sm:$0xff] }
 0xabe   :  { %10536 = vmatprep.subr.bf16.mxu0 %v10706_v3 }
 0xac1   :  { %10538 = vmatpush3.bf16.msra.mxu0 %v11913_v22 }
 0xac2   :  { %10539 = vmatprep.subr.bf16.mxu0 %v10706_v3 }
 0xac5   :  { %10541 = vmatpush3.bf16.msra.mxu0 %v11917_v38 }
 0xac6   :  { %10542 = vmatprep.subr.bf16.mxu0 %v10706_v3 }
 0xac9   :  { %10544 = vmatpush3.bf16.msra.mxu0 %v11920_v47 }
 0xaca   :  { %10545 = vmatprep.subr.bf16.mxu0 %v10706_v3 }
 0xacd   :  { %10547 = vmatpush3.bf16.msra.mxu0 %v11924_v62 }
 0xace   :  { %10548 = vmatprep.subr.bf16.mxu0 %v10706_v3 }
 0xad1   :  { %10550 = vmatpush3.bf16.msra.mxu0 %v11928_v63 }
 0xad2   :  { %10551 = vmatprep.subr.bf16.mxu0 %v10706_v3 }
 0xad5   :  { %10553 = vmatpush3.bf16.msra.mxu0 %v11953_v14 }
 0xad6   :  { %10554 = vmatprep.subr.bf16.mxu0 %v10706_v3 }
 0xad9   :  { %10556 = vmatpush3.bf16.msra.mxu0 %v11963_v37 }
 0xadc   :  { %9259 = vmatmul.mubr.f32.vlgmr.msra.gmra.mrb[42].mxu0 %v12072_v21 }
 0xbaf   :  { %v6303_v41 = vpop.f32.mrb[42].mxu0 }
 0xbb0   :  { %v10557_v22 = vadd.f32 %v6452_v8, %v6303_v41  ;;  %v9260_v38 = vpop.f32.mrb[43].mxu0 }
 0xbb2   :  { %6307 = vst [vmem:[#allocation10] sm:$0xff] %v10557_v22 }
 0xbb3   :  { %10681 = shalt.err (!%p10678_p3)
}
 0xbb4   :  { %s10682_s7 = scalar_lea.hbm %s12227_s5, 128 }
 0xbb5   :  { %p10683_p4 = scmp.ne.s32.totalorder %s12227_s5, %s10682_s7  ;;  %p10686_p5 = scmp.lt.u32.totalorder %s10682_s7, %s12227_s5 }
 0xbb7   :  { %p10688_p6 = pnand %p10686_p5, %p10683_p4 }
 0xbb9   :  { %10691 = shalt.err (!%p10688_p6)
}
 0xbba   :  { %6317 = dma.vmem_to_hbm [thread:$0]  %s6315_s0, 128, %s12227_s5, [#allocation4]  }
 0xbbb   :  { %10698 = dma.done.wait [#allocation4], 128  }
 0xbbc   :  { %10699 = vsyncadd [#allocation4], 4294967168 }
 0xbbd   :  { %6321 = vsyncpa [#allocation3], 1 }
 0xbbe   :  { %6322 = vsyncpa [#allocation8], 1 }
 0xbbf   :  { %6323 = vsyncpa [#allocation4], 1 }
 0xbc0   :  { %6324 = vsyncpa [#allocation5], 1 }

</bundles_post_ra>
